<compile_context>
chip_gen: v7x
topology: tpu7x:2x2x1
jax: 0.10.0
libtpu: 0.0.40
codegen_flags: <defaults>
</compile_context>

<pallas_src>
import math
from functools import partial

import jax
import jax.numpy as jnp
from jax.experimental import pallas as pl
from jax.experimental.pallas import tpu as pltpu

LANE = 128
TM = 512              # max matmul row tile
MAX_K_BLOCK = 8192    # single-K-step threshold (real-model layers stay 1 step)
TK = 2048             # target K tile when K tiling kicks in (balanced below)
EW_WIDTH = 512        # lane-dense width for flattened elementwise kernels
EW_MAX_ROWS = 512     # row-tile cap for elementwise kernels


def _cdiv(a, b):
    return -(-a // b)


def _round_up(n, m):
    return _cdiv(n, m) * m


def _vmem_budget():
    # v5e/v6e: 128 MiB physical -> 64 MiB budget; v7x: 64 MiB physical -> 32 MiB.
    try:
        cap = int(pltpu.get_tpu_info().vmem_capacity_bytes)
        return min(max(cap // 2, 16 * 1024 * 1024), 64 * 1024 * 1024)
    except Exception:
        return 32 * 1024 * 1024


VMEM_LIMIT = _vmem_budget()


def _split_rows(m, max_tile, unit=8):
    """Row tile <= max_tile with >=2 grid steps when possible (v7x megacore);
    pads m only up to the chosen tile, not up to max_tile."""
    m_u = _round_up(m, unit)
    steps = max(_cdiv(m_u, max_tile), 2 if m_u >= 2 * unit else 1)
    tile = _round_up(_cdiv(m_u, steps), unit)
    m_pad = tile * _cdiv(m, tile)
    return tile, m_pad


# ----------------------------------------------------------------------------
# Fused matmul + BN shift (+residual) (+ReLU).  bf16 operands on the MXU,
# f32 accumulation; bf16 (or f32) stores.
# ----------------------------------------------------------------------------
def _mm_single_kernel(*refs, relu, has_res):
    if has_res:
        a_ref, b_ref, s_ref, r_ref, o_ref = refs
    else:
        a_ref, b_ref, s_ref, o_ref = refs
        r_ref = None
    acc = jnp.dot(a_ref[...], b_ref[...], preferred_element_type=jnp.float32)
    acc = acc + s_ref[...]
    if r_ref is not None:
        acc = acc + r_ref[...].astype(jnp.float32)
    if relu:
        acc = jnp.maximum(acc, 0.0)
    o_ref[...] = acc.astype(o_ref.dtype)


def _mm_multi_kernel(*refs, relu, has_res, b_resident, tk):
    if has_res:
        a_ref, b_ref, s_ref, r_ref, o_ref, acc_ref = refs
    else:
        a_ref, b_ref, s_ref, o_ref, acc_ref = refs
        r_ref = None
    k = pl.program_id(1)

    @pl.when(k == 0)
    def _():
        acc_ref[...] = jnp.zeros_like(acc_ref)

    if b_resident:
        koff = pl.multiple_of(k * tk, LANE)
        b_blk = b_ref[pl.ds(koff, tk), :]
    else:
        b_blk = b_ref[...]
    acc_ref[...] += jnp.dot(a_ref[...], b_blk, preferred_element_type=jnp.float32)

    @pl.when(k == pl.num_programs(1) - 1)
    def _():
        r = acc_ref[...] + s_ref[...]
        if r_ref is not None:
            r = r + r_ref[...].astype(jnp.float32)
        if relu:
            r = jnp.maximum(r, 0.0)
        o_ref[...] = r.astype(o_ref.dtype)


def matmul_shift(a, b, shift, residual=None, relu=False, out_dtype=jnp.bfloat16):
    """(a @ b) + shift (+residual) (+ReLU).  a:(M,K) b:(K,N) shift:(N,) res:(M,N)."""
    M, K = a.shape
    K2, N = b.shape
    assert K == K2
    has_res = residual is not None

    tm, m_pad = _split_rows(M, TM)
    n_pad = _round_up(N, LANE)          # lane-dense, unmasked stores
    k128 = _round_up(K, LANE)

    # Footprint if run as a single K step: 2x A tiles + resident B + out tiles.
    single_foot = 2 * tm * k128 * 2 + k128 * n_pad * 2 + 4 * tm * n_pad
    single = (k128 <= MAX_K_BLOCK) and (single_foot <= (VMEM_LIMIT * 3) // 4)

    if single:
        tk, k_pad = k128, k128
    else:
        ksteps = max(_cdiv(k128, TK), 1)
        tk = _round_up(_cdiv(k128, ksteps), LANE)   # balanced tk: minimal K padding
        k_pad = tk * _cdiv(k128, tk)

    a_p = jnp.pad(a.astype(jnp.bfloat16), ((0, m_pad - M), (0, k_pad - K)))
    b_p = jnp.pad(b.astype(jnp.bfloat16), ((0, k_pad - K), (0, n_pad - N)))
    s_p = jnp.pad(shift.astype(jnp.float32).reshape(1, N),
                  ((0, 0), (0, n_pad - N)))
    operands = [a_p, b_p, s_p]
    if has_res:
        operands.append(jnp.pad(residual, ((0, m_pad - M), (0, n_pad - N))))

    if single:
        in_specs = [
            pl.BlockSpec((tm, k_pad), lambda i: (i, 0)),
            pl.BlockSpec((k_pad, n_pad), lambda i: (0, 0)),   # resident B
            pl.BlockSpec((1, n_pad), lambda i: (0, 0)),
        ]
        if has_res:
            in_specs.append(pl.BlockSpec((tm, n_pad), lambda i: (i, 0)))
        out = pl.pallas_call(
            partial(_mm_single_kernel, relu=relu, has_res=has_res),
            out_shape=jax.ShapeDtypeStruct((m_pad, n_pad), out_dtype),
            grid=(m_pad // tm,),
            in_specs=in_specs,
            out_specs=pl.BlockSpec((tm, n_pad), lambda i: (i, 0)),
            compiler_params=pltpu.CompilerParams(
                dimension_semantics=("parallel",),
                vmem_limit_bytes=VMEM_LIMIT),
        )(*operands)
    else:
        # Hold B resident (sliced in-kernel) when it fits; else stream per-K tile.
        b_resident = (k_pad * n_pad * 2) <= (VMEM_LIMIT // 3)
        if b_resident:
            b_spec = pl.BlockSpec((k_pad, n_pad), lambda i, k: (0, 0))
        else:
            b_spec = pl.BlockSpec((tk, n_pad), lambda i, k: (k, 0))
        in_specs = [
            pl.BlockSpec((tm, tk), lambda i, k: (i, k)),
            b_spec,
            pl.BlockSpec((1, n_pad), lambda i, k: (0, 0)),
        ]
        if has_res:
            in_specs.append(pl.BlockSpec((tm, n_pad), lambda i, k: (i, 0)))
        out = pl.pallas_call(
            partial(_mm_multi_kernel, relu=relu, has_res=has_res,
                    b_resident=b_resident, tk=tk),
            out_shape=jax.ShapeDtypeStruct((m_pad, n_pad), out_dtype),
            grid=(m_pad // tm, k_pad // tk),
            in_specs=in_specs,
            out_specs=pl.BlockSpec((tm, n_pad), lambda i, k: (i, 0)),
            scratch_shapes=[pltpu.VMEM((tm, n_pad), jnp.float32)],
            compiler_params=pltpu.CompilerParams(
                dimension_semantics=("parallel", "arbitrary"),
                vmem_limit_bytes=VMEM_LIMIT),
        )(*operands)
    return out[:M, :N]


# ----------------------------------------------------------------------------
# Lane-dense elementwise max-of-3 (used by the separable max pool).
# ----------------------------------------------------------------------------
def _max3_kernel(a_ref, b_ref, c_ref, o_ref):
    o_ref[...] = jnp.maximum(jnp.maximum(a_ref[...], b_ref[...]), c_ref[...])


def _elementwise_max3(a, b, c):
    shape, dtype = a.shape, a.dtype
    n = a.size
    rows = _cdiv(n, EW_WIDTH)
    tr, rows_pad = _split_rows(rows, EW_MAX_ROWS)
    total = rows_pad * EW_WIDTH

    def prep(t):
        return jnp.pad(t.reshape(-1), (0, total - n)).reshape(rows_pad, EW_WIDTH)

    out = pl.pallas_call(
        _max3_kernel,
        out_shape=jax.ShapeDtypeStruct((rows_pad, EW_WIDTH), dtype),
        grid=(rows_pad // tr,),
        in_specs=[pl.BlockSpec((tr, EW_WIDTH), lambda i: (i, 0))] * 3,
        out_specs=pl.BlockSpec((tr, EW_WIDTH), lambda i: (i, 0)),
        compiler_params=pltpu.CompilerParams(
            dimension_semantics=("parallel",),
            vmem_limit_bytes=VMEM_LIMIT),
    )(prep(a), prep(b), prep(c))
    return out.reshape(-1)[:n].reshape(shape)


def _maxpool_axis(x, axis):
    """1-D max pool (k=3, s=2, p=1, -inf padding) along `axis` of an NDHWC tensor."""
    A = x.shape[axis]
    Ao = (A + 2 - 3) // 2 + 1
    cfg = [(0, 0)] * x.ndim
    cfg[axis] = (1, 1)
    xp = jnp.pad(x, cfg, constant_values=-jnp.inf)

    def tap(off):
        idx = [slice(None)] * x.ndim
        idx[axis] = slice(off, off + 2 * (Ao - 1) + 1, 2)
        return xp[tuple(idx)]

    return _elementwise_max3(tap(0), tap(1), tap(2))


def maxpool3d(x):
    """MaxPool3d(kernel=3, stride=2, padding=1) as three separable 1-D passes."""
    x = _maxpool_axis(x, 3)   # W
    x = _maxpool_axis(x, 2)   # H
    x = _maxpool_axis(x, 1)   # D
    return x


# ----------------------------------------------------------------------------
# AdaptiveAvgPool3d((1,1,1)) -> (B, C)
# ----------------------------------------------------------------------------
def _avgpool_kernel(x_ref, o_ref):
    o_ref[...] = jnp.mean(x_ref[...].astype(jnp.float32), axis=1, keepdims=True)


def global_avgpool(x):
    B, D, H, W, C = x.shape
    S = D * H * W
    x2 = x.reshape(B, S, C)
    # TODO(synk): tile the S reduction with a running-sum scratch for long clips.
    out = pl.pallas_call(
        _avgpool_kernel,
        out_shape=jax.ShapeDtypeStruct((B, 1, C), jnp.float32),
        grid=(B,),
        in_specs=[pl.BlockSpec((1, S, C), lambda b: (b, 0, 0))],
        out_specs=pl.BlockSpec((1, 1, C), lambda b: (b, 0, 0)),
        compiler_params=pltpu.CompilerParams(
            dimension_semantics=("parallel",),
            vmem_limit_bytes=VMEM_LIMIT),
    )(x2)
    return out.reshape(B, C)


# ----------------------------------------------------------------------------
# Conv3d (bf16 im2col glue + Pallas matmul), BN folded, optional fused
# residual-add + ReLU in the matmul epilogue.
# ----------------------------------------------------------------------------
def conv3d_bn(x, w, scale, shift, stride, padding, relu, residual=None):
    """x: (B,D,H,W,Cin) NDHWC; w: (Kt,Kh,Kw,Cin,Cout); bf16 output."""
    B, D, H, W, Cin = x.shape
    Kt, Kh, Kw, _, Cout = w.shape
    sd, sh, sw = stride
    pd, ph, pw = padding
    od = (D + 2 * pd - Kt) // sd + 1
    oh = (H + 2 * ph - Kh) // sh + 1
    ow = (W + 2 * pw - Kw) // sw + 1
    # im2col gathered directly in bf16 (see TODO at top: full fusion not done).
    xp = jnp.pad(x.astype(jnp.bfloat16),
                 ((0, 0), (pd, pd), (ph, ph), (pw, pw), (0, 0)))
    cols = []
    for kt in range(Kt):
        for kh in range(Kh):
            for kw in range(Kw):
                cols.append(xp[:,
                               kt:kt + sd * (od - 1) + 1:sd,
                               kh:kh + sh * (oh - 1) + 1:sh,
                               kw:kw + sw * (ow - 1) + 1:sw, :])
    a = jnp.concatenate(cols, axis=-1).reshape(B * od * oh * ow,
                                               Kt * Kh * Kw * Cin)
    # Fold BN scale into the weight matrix; epilogue applies shift (+res,+ReLU).
    b = w.reshape(Kt * Kh * Kw * Cin, Cout) * scale[None, :]
    res = None
    if residual is not None:
        res = residual.reshape(B * od * oh * ow, Cout)
    out = matmul_shift(a, b, shift, residual=res, relu=relu)
    return out.reshape(B, od, oh, ow, Cout)


# ----------------------------------------------------------------------------
# Parameters (deterministic, matching the PyTorch module's init)
# ----------------------------------------------------------------------------
def kaiming_conv(key, kt, kh, kw, cin, cout):
    # kaiming_normal_(mode='fan_out', nonlinearity='relu')
    fan_out = cout * kt * kh * kw
    std = math.sqrt(2.0 / fan_out)
    return jax.random.normal(key, (kt, kh, kw, cin, cout), jnp.float32) * std


def bn_fold(c, eps=1e-5):
    gamma = jnp.ones((c,), jnp.float32)
    beta = jnp.zeros((c,), jnp.float32)
    mean = jnp.zeros((c,), jnp.float32)
    var = jnp.ones((c,), jnp.float32)
    scale = gamma / jnp.sqrt(var + eps)
    shift = beta - mean * scale
    return scale, shift


def make_params(key,
                block_inplanes=(8, 16, 32, 64),
                layers_cfg=(1, 1, 1, 1),
                n_input_channels=3,
                conv1_t_size=7,
                n_classes=5):
    keys = iter(jax.random.split(key, 128))
    in_planes = block_inplanes[0]
    params = {}
    params['conv1_w'] = kaiming_conv(next(keys), conv1_t_size, 7, 7,
                                     n_input_channels, in_planes)
    params['bn1_scale'], params['bn1_shift'] = bn_fold(in_planes)

    layer_params = []
    for li, planes in enumerate(block_inplanes):
        layer_stride = 1 if li == 0 else 2
        blocks = []
        for bi in range(layers_cfg[li]):
            s = layer_stride if bi == 0 else 1
            blk = {'stride': s}
            blk['conv1_w'] = kaiming_conv(next(keys), 3, 3, 3, in_planes, planes)
            blk['bn1_scale'], blk['bn1_shift'] = bn_fold(planes)
            blk['conv2_w'] = kaiming_conv(next(keys), 3, 3, 3, planes, planes)
            blk['bn2_scale'], blk['bn2_shift'] = bn_fold(planes)
            if s != 1 or in_planes != planes:  # shortcut_type='B'
                ds = {'w': kaiming_conv(next(keys), 1, 1, 1, in_planes, planes)}
                ds['bn_scale'], ds['bn_shift'] = bn_fold(planes)
                blk['downsample'] = ds
            else:
                blk['downsample'] = None
            in_planes = planes
            blocks.append(blk)
        layer_params.append(blocks)
    params['layers'] = layer_params

    # nn.Linear default init: U(-1/sqrt(fan_in), 1/sqrt(fan_in))
    fan_in = block_inplanes[3]
    bound = 1.0 / math.sqrt(fan_in)
    params['fc_w'] = jax.random.uniform(next(keys), (fan_in, n_classes),
                                        jnp.float32, -bound, bound)
    params['fc_b'] = jax.random.uniform(next(keys), (n_classes,),
                                        jnp.float32, -bound, bound)
    return params


# ----------------------------------------------------------------------------
# Forward pass
# ----------------------------------------------------------------------------
def basic_block_forward(x, blk):
    s = blk['stride']
    out = conv3d_bn(x, blk['conv1_w'], blk['bn1_scale'], blk['bn1_shift'],
                    stride=(s, s, s), padding=(1, 1, 1), relu=True)
    if blk['downsample'] is not None:
        ds = blk['downsample']
        residual = conv3d_bn(x, ds['w'], ds['bn_scale'], ds['bn_shift'],
                             stride=(s, s, s), padding=(0, 0, 0), relu=False)
    else:
        residual = x
    # conv2 + BN + residual add + ReLU fused into one matmul epilogue.
    return conv3d_bn(out, blk['conv2_w'], blk['bn2_scale'], blk['bn2_shift'],
                     stride=(1, 1, 1), padding=(1, 1, 1), relu=True,
                     residual=residual)


def resnet_forward(params, x_ncdhw):
    # layout: convert PyTorch NCDHW -> NDHWC for the kernels.
    x = jnp.transpose(x_ncdhw, (0, 2, 3, 4, 1))
    x = conv3d_bn(x, params['conv1_w'], params['bn1_scale'], params['bn1_shift'],
                  stride=(1, 2, 2), padding=(3, 3, 3), relu=True)
    x = maxpool3d(x)
    for blocks in params['layers']:
        for blk in blocks:
            x = basic_block_forward(x, blk)
    x = global_avgpool(x)                                  # (B, C) f32
    out = matmul_shift(x, params['fc_w'], params['fc_b'],
                       relu=False, out_dtype=jnp.float32)
    return out                                             # (B, n_classes)


if __name__ == "__main__":
    key = jax.random.PRNGKey(0)
    pkey, xkey = jax.random.split(key)
    params = make_params(pkey)
    # small video clip: batch=2, channels=3, depth=8, spatial=16x16 (NCDHW)
    x = jax.random.normal(xkey, (2, 3, 8, 16, 16), jnp.float32)
    fwd = jax.jit(lambda v: resnet_forward(params, v))
    out = jax.block_until_ready(fwd(x))
    assert out.shape == (2, 5), out.shape
    assert bool(jnp.all(jnp.isfinite(out)))
    print("KERNEL_OK")
</pallas_src>

<mosaic_0001>
module attributes {stable_mosaic.version = 11 : i64} {
  func.func @_mm_single_kernel(%arg0: i32, %arg1: memref<512x1152xbf16, #tpu.memory_space<vmem>>, %arg2: memref<1152x128xbf16, #tpu.memory_space<vmem>>, %arg3: memref<1x128xf32, #tpu.memory_space<vmem>>, %arg4: memref<512x128xbf16, #tpu.memory_space<vmem>>) attributes {dimension_semantics = [#tpu.dimension_semantics<parallel>], iteration_bounds = array<i64: 2>, scalar_prefetch = 0 : i64, scratch_operands = 0 : i64, tpu.core_type = #tpu.core_type<tc>, window_params = [{transform_indices = @transform_0, window_bounds = array<i64: 512, 1152>}, {pipeline_mode = #tpu.pipeline_mode<synchronous>, transform_indices = @transform_1, window_bounds = array<i64: 1152, 128>}, {pipeline_mode = #tpu.pipeline_mode<synchronous>, transform_indices = @transform_2, window_bounds = array<i64: 1, 128>}, {transform_indices = @transform_3, window_bounds = array<i64: 512, 128>}]} {
    %c0 = arith.constant 0 : index
    %c0_0 = arith.constant 0 : index
    %0 = vector.load %arg1[%c0, %c0_0] : memref<512x1152xbf16, #tpu.memory_space<vmem>>, vector<512x1152xbf16>
    %c0_1 = arith.constant 0 : index
    %c0_2 = arith.constant 0 : index
    %1 = vector.load %arg2[%c0_1, %c0_2] : memref<1152x128xbf16, #tpu.memory_space<vmem>>, vector<1152x128xbf16>
    %cst = arith.constant dense<0.000000e+00> : vector<512x128xf32>
    %2 = tpu.matmul %0, %1, %cst {dimension_numbers = #tpu.dot_dimension_numbers<[1], [0], [0], [1], [0, 0, 1, 1], [], []>} : vector<512x1152xbf16>, vector<1152x128xbf16>, vector<512x128xf32> -> vector<512x128xf32>
    %c0_3 = arith.constant 0 : index
    %c0_4 = arith.constant 0 : index
    %3 = vector.load %arg3[%c0_3, %c0_4] : memref<1x128xf32, #tpu.memory_space<vmem>>, vector<1x128xf32>
    %4 = vector.broadcast %3 : vector<1x128xf32> to vector<512x128xf32>
    %5 = arith.addf %2, %4 : vector<512x128xf32>
    %cst_5 = arith.constant 0.000000e+00 : f32
    %6 = vector.broadcast %cst_5 : f32 to vector<512x128xf32>
    %7 = arith.maximumf %5, %6 : vector<512x128xf32>
    %8 = arith.truncf %7 : vector<512x128xf32> to vector<512x128xbf16>
    %c0_6 = arith.constant 0 : index
    %c0_7 = arith.constant 0 : index
    %9 = vector.load %arg4[%c0_6, %c0_7] : memref<512x128xbf16, #tpu.memory_space<vmem>>, vector<512x128xbf16>
    tpu.vector_store %arg4[%c0_6, %c0_7], %8 {strides = array<i32>} : memref<512x128xbf16, #tpu.memory_space<vmem>>, vector<512x128xbf16>,
    return
  }
  func.func @transform_0(%arg0: i32) -> (i32, i32) {
    %c0_i32 = arith.constant 0 : i32
    %c0_i32_0 = arith.constant 0 : i32
    return %arg0, %c0_i32 : i32, i32
  }
  func.func @transform_1(%arg0: i32) -> (i32, i32) {
    %c0_i32 = arith.constant 0 : i32
    %c0_i32_0 = arith.constant 0 : i32
    %c0_i32_1 = arith.constant 0 : i32
    return %c0_i32, %c0_i32_0 : i32, i32
  }
  func.func @transform_2(%arg0: i32) -> (i32, i32) {
    %c0_i32 = arith.constant 0 : i32
    %c0_i32_0 = arith.constant 0 : i32
    %c0_i32_1 = arith.constant 0 : i32
    return %c0_i32, %c0_i32_0 : i32, i32
  }
  func.func @transform_3(%arg0: i32) -> (i32, i32) {
    %c0_i32 = arith.constant 0 : i32
    %c0_i32_0 = arith.constant 0 : i32
    return %arg0, %c0_i32 : i32, i32
  }
}

module attributes {stable_mosaic.version = 11 : i64} {
  func.func @_max3_kernel(%arg0: i32, %arg1: memref<8x512xbf16, #tpu.memory_space<vmem>>, %arg2: memref<8x512xbf16, #tpu.memory_space<vmem>>, %arg3: memref<8x512xbf16, #tpu.memory_space<vmem>>, %arg4: memref<8x512xbf16, #tpu.memory_space<vmem>>) attributes {dimension_semantics = [#tpu.dimension_semantics<parallel>], iteration_bounds = array<i64: 1>, scalar_prefetch = 0 : i64, scratch_operands = 0 : i64, tpu.core_type = #tpu.core_type<tc>, window_params = [{transform_indices = @transform_0, window_bounds = array<i64: 8, 512>}, {transform_indices = @transform_1, window_bounds = array<i64: 8, 512>}, {transform_indices = @transform_2, window_bounds = array<i64: 8, 512>}, {transform_indices = @transform_3, window_bounds = array<i64: 8, 512>}]} {
    %c0 = arith.constant 0 : index
    %c0_0 = arith.constant 0 : index
    %0 = vector.load %arg1[%c0, %c0_0] : memref<8x512xbf16, #tpu.memory_space<vmem>>, vector<8x512xbf16>
    %c0_1 = arith.constant 0 : index
    %c0_2 = arith.constant 0 : index
    %1 = vector.load %arg2[%c0_1, %c0_2] : memref<8x512xbf16, #tpu.memory_space<vmem>>, vector<8x512xbf16>
    %2 = arith.maximumf %0, %1 : vector<8x512xbf16>
    %c0_3 = arith.constant 0 : index
    %c0_4 = arith.constant 0 : index
    %3 = vector.load %arg3[%c0_3, %c0_4] : memref<8x512xbf16, #tpu.memory_space<vmem>>, vector<8x512xbf16>
    %4 = arith.maximumf %2, %3 : vector<8x512xbf16>
    %c0_5 = arith.constant 0 : index
    %c0_6 = arith.constant 0 : index
    %5 = vector.load %arg4[%c0_5, %c0_6] : memref<8x512xbf16, #tpu.memory_space<vmem>>, vector<8x512xbf16>
    tpu.vector_store %arg4[%c0_5, %c0_6], %4 {strides = array<i32>} : memref<8x512xbf16, #tpu.memory_space<vmem>>, vector<8x512xbf16>,
    return
  }
  func.func @transform_0(%arg0: i32) -> (i32, i32) {
    %c0_i32 = arith.constant 0 : i32
    %c0_i32_0 = arith.constant 0 : i32
    return %arg0, %c0_i32 : i32, i32
  }
  func.func @transform_1(%arg0: i32) -> (i32, i32) {
    %c0_i32 = arith.constant 0 : i32
    %c0_i32_0 = arith.constant 0 : i32
    return %arg0, %c0_i32 : i32, i32
  }
  func.func @transform_2(%arg0: i32) -> (i32, i32) {
    %c0_i32 = arith.constant 0 : i32
    %c0_i32_0 = arith.constant 0 : i32
    return %arg0, %c0_i32 : i32, i32
  }
  func.func @transform_3(%arg0: i32) -> (i32, i32) {
    %c0_i32 = arith.constant 0 : i32
    %c0_i32_0 = arith.constant 0 : i32
    return %arg0, %c0_i32 : i32, i32
  }
}

module attributes {stable_mosaic.version = 11 : i64} {
  func.func @_mm_single_kernel(%arg0: i32, %arg1: memref<64x256xbf16, #tpu.memory_space<vmem>>, %arg2: memref<256x128xbf16, #tpu.memory_space<vmem>>, %arg3: memref<1x128xf32, #tpu.memory_space<vmem>>, %arg4: memref<64x128xbf16, #tpu.memory_space<vmem>>) attributes {dimension_semantics = [#tpu.dimension_semantics<parallel>], iteration_bounds = array<i64: 2>, scalar_prefetch = 0 : i64, scratch_operands = 0 : i64, tpu.core_type = #tpu.core_type<tc>, window_params = [{transform_indices = @transform_0, window_bounds = array<i64: 64, 256>}, {pipeline_mode = #tpu.pipeline_mode<synchronous>, transform_indices = @transform_1, window_bounds = array<i64: 256, 128>}, {pipeline_mode = #tpu.pipeline_mode<synchronous>, transform_indices = @transform_2, window_bounds = array<i64: 1, 128>}, {transform_indices = @transform_3, window_bounds = array<i64: 64, 128>}]} {
    %c0 = arith.constant 0 : index
    %c0_0 = arith.constant 0 : index
    %0 = vector.load %arg1[%c0, %c0_0] : memref<64x256xbf16, #tpu.memory_space<vmem>>, vector<64x256xbf16>
    %c0_1 = arith.constant 0 : index
    %c0_2 = arith.constant 0 : index
    %1 = vector.load %arg2[%c0_1, %c0_2] : memref<256x128xbf16, #tpu.memory_space<vmem>>, vector<256x128xbf16>
    %cst = arith.constant dense<0.000000e+00> : vector<64x128xf32>
    %2 = tpu.matmul %0, %1, %cst {dimension_numbers = #tpu.dot_dimension_numbers<[1], [0], [0], [1], [0, 0, 1, 1], [], []>} : vector<64x256xbf16>, vector<256x128xbf16>, vector<64x128xf32> -> vector<64x128xf32>
    %c0_3 = arith.constant 0 : index
    %c0_4 = arith.constant 0 : index
    %3 = vector.load %arg3[%c0_3, %c0_4] : memref<1x128xf32, #tpu.memory_space<vmem>>, vector<1x128xf32>
    %4 = vector.broadcast %3 : vector<1x128xf32> to vector<64x128xf32>
    %5 = arith.addf %2, %4 : vector<64x128xf32>
    %cst_5 = arith.constant 0.000000e+00 : f32
    %6 = vector.broadcast %cst_5 : f32 to vector<64x128xf32>
    %7 = arith.maximumf %5, %6 : vector<64x128xf32>
    %8 = arith.truncf %7 : vector<64x128xf32> to vector<64x128xbf16>
    %c0_6 = arith.constant 0 : index
    %c0_7 = arith.constant 0 : index
    %9 = vector.load %arg4[%c0_6, %c0_7] : memref<64x128xbf16, #tpu.memory_space<vmem>>, vector<64x128xbf16>
    tpu.vector_store %arg4[%c0_6, %c0_7], %8 {strides = array<i32>} : memref<64x128xbf16, #tpu.memory_space<vmem>>, vector<64x128xbf16>,
    return
  }
  func.func @transform_0(%arg0: i32) -> (i32, i32) {
    %c0_i32 = arith.constant 0 : i32
    %c0_i32_0 = arith.constant 0 : i32
    return %arg0, %c0_i32 : i32, i32
  }
  func.func @transform_1(%arg0: i32) -> (i32, i32) {
    %c0_i32 = arith.constant 0 : i32
    %c0_i32_0 = arith.constant 0 : i32
    %c0_i32_1 = arith.constant 0 : i32
    return %c0_i32, %c0_i32_0 : i32, i32
  }
  func.func @transform_2(%arg0: i32) -> (i32, i32) {
    %c0_i32 = arith.constant 0 : i32
    %c0_i32_0 = arith.constant 0 : i32
    %c0_i32_1 = arith.constant 0 : i32
    return %c0_i32, %c0_i32_0 : i32, i32
  }
  func.func @transform_3(%arg0: i32) -> (i32, i32) {
    %c0_i32 = arith.constant 0 : i32
    %c0_i32_0 = arith.constant 0 : i32
    return %arg0, %c0_i32 : i32, i32
  }
}

module attributes {stable_mosaic.version = 11 : i64} {
  func.func @_mm_single_kernel(%arg0: i32, %arg1: memref<64x256xbf16, #tpu.memory_space<vmem>>, %arg2: memref<256x128xbf16, #tpu.memory_space<vmem>>, %arg3: memref<1x128xf32, #tpu.memory_space<vmem>>, %arg4: memref<64x128xbf16, #tpu.memory_space<vmem>>, %arg5: memref<64x128xbf16, #tpu.memory_space<vmem>>) attributes {dimension_semantics = [#tpu.dimension_semantics<parallel>], iteration_bounds = array<i64: 2>, scalar_prefetch = 0 : i64, scratch_operands = 0 : i64, tpu.core_type = #tpu.core_type<tc>, window_params = [{transform_indices = @transform_0, window_bounds = array<i64: 64, 256>}, {pipeline_mode = #tpu.pipeline_mode<synchronous>, transform_indices = @transform_1, window_bounds = array<i64: 256, 128>}, {pipeline_mode = #tpu.pipeline_mode<synchronous>, transform_indices = @transform_2, window_bounds = array<i64: 1, 128>}, {transform_indices = @transform_3, window_bounds = array<i64: 64, 128>}, {transform_indices = @transform_4, window_bounds = array<i64: 64, 128>}]} {
    %c0 = arith.constant 0 : index
    %c0_0 = arith.constant 0 : index
    %0 = vector.load %arg1[%c0, %c0_0] : memref<64x256xbf16, #tpu.memory_space<vmem>>, vector<64x256xbf16>
    %c0_1 = arith.constant 0 : index
    %c0_2 = arith.constant 0 : index
    %1 = vector.load %arg2[%c0_1, %c0_2] : memref<256x128xbf16, #tpu.memory_space<vmem>>, vector<256x128xbf16>
    %cst = arith.constant dense<0.000000e+00> : vector<64x128xf32>
    %2 = tpu.matmul %0, %1, %cst {dimension_numbers = #tpu.dot_dimension_numbers<[1], [0], [0], [1], [0, 0, 1, 1], [], []>} : vector<64x256xbf16>, vector<256x128xbf16>, vector<64x128xf32> -> vector<64x128xf32>
    %c0_3 = arith.constant 0 : index
    %c0_4 = arith.constant 0 : index
    %3 = vector.load %arg3[%c0_3, %c0_4] : memref<1x128xf32, #tpu.memory_space<vmem>>, vector<1x128xf32>
    %4 = vector.broadcast %3 : vector<1x128xf32> to vector<64x128xf32>
    %5 = arith.addf %2, %4 : vector<64x128xf32>
    %c0_5 = arith.constant 0 : index
    %c0_6 = arith.constant 0 : index
    %6 = vector.load %arg4[%c0_5, %c0_6] : memref<64x128xbf16, #tpu.memory_space<vmem>>, vector<64x128xbf16>
    %7 = arith.extf %6 : vector<64x128xbf16> to vector<64x128xf32>
    %8 = arith.addf %5, %7 : vector<64x128xf32>
    %cst_7 = arith.constant 0.000000e+00 : f32
    %9 = vector.broadcast %cst_7 : f32 to vector<64x128xf32>
    %10 = arith.maximumf %8, %9 : vector<64x128xf32>
    %11 = arith.truncf %10 : vector<64x128xf32> to vector<64x128xbf16>
    %c0_8 = arith.constant 0 : index
    %c0_9 = arith.constant 0 : index
    %12 = vector.load %arg5[%c0_8, %c0_9] : memref<64x128xbf16, #tpu.memory_space<vmem>>, vector<64x128xbf16>
    tpu.vector_store %arg5[%c0_8, %c0_9], %11 {strides = array<i32>} : memref<64x128xbf16, #tpu.memory_space<vmem>>, vector<64x128xbf16>,
    return
  }
  func.func @transform_0(%arg0: i32) -> (i32, i32) {
    %c0_i32 = arith.constant 0 : i32
    %c0_i32_0 = arith.constant 0 : i32
    return %arg0, %c0_i32 : i32, i32
  }
  func.func @transform_1(%arg0: i32) -> (i32, i32) {
    %c0_i32 = arith.constant 0 : i32
    %c0_i32_0 = arith.constant 0 : i32
    %c0_i32_1 = arith.constant 0 : i32
    return %c0_i32, %c0_i32_0 : i32, i32
  }
  func.func @transform_2(%arg0: i32) -> (i32, i32) {
    %c0_i32 = arith.constant 0 : i32
    %c0_i32_0 = arith.constant 0 : i32
    %c0_i32_1 = arith.constant 0 : i32
    return %c0_i32, %c0_i32_0 : i32, i32
  }
  func.func @transform_3(%arg0: i32) -> (i32, i32) {
    %c0_i32 = arith.constant 0 : i32
    %c0_i32_0 = arith.constant 0 : i32
    return %arg0, %c0_i32 : i32, i32
  }
  func.func @transform_4(%arg0: i32) -> (i32, i32) {
    %c0_i32 = arith.constant 0 : i32
    %c0_i32_0 = arith.constant 0 : i32
    return %arg0, %c0_i32 : i32, i32
  }
}

module attributes {stable_mosaic.version = 11 : i64} {
  func.func @_mm_single_kernel(%arg0: i32, %arg1: memref<8x256xbf16, #tpu.memory_space<vmem>>, %arg2: memref<256x128xbf16, #tpu.memory_space<vmem>>, %arg3: memref<1x128xf32, #tpu.memory_space<vmem>>, %arg4: memref<8x128xbf16, #tpu.memory_space<vmem>>) attributes {dimension_semantics = [#tpu.dimension_semantics<parallel>], iteration_bounds = array<i64: 2>, scalar_prefetch = 0 : i64, scratch_operands = 0 : i64, tpu.core_type = #tpu.core_type<tc>, window_params = [{transform_indices = @transform_0, window_bounds = array<i64: 8, 256>}, {pipeline_mode = #tpu.pipeline_mode<synchronous>, transform_indices = @transform_1, window_bounds = array<i64: 256, 128>}, {pipeline_mode = #tpu.pipeline_mode<synchronous>, transform_indices = @transform_2, window_bounds = array<i64: 1, 128>}, {transform_indices = @transform_3, window_bounds = array<i64: 8, 128>}]} {
    %c0 = arith.constant 0 : index
    %c0_0 = arith.constant 0 : index
    %0 = vector.load %arg1[%c0, %c0_0] : memref<8x256xbf16, #tpu.memory_space<vmem>>, vector<8x256xbf16>
    %c0_1 = arith.constant 0 : index
    %c0_2 = arith.constant 0 : index
    %1 = vector.load %arg2[%c0_1, %c0_2] : memref<256x128xbf16, #tpu.memory_space<vmem>>, vector<256x128xbf16>
    %cst = arith.constant dense<0.000000e+00> : vector<8x128xf32>
    %2 = tpu.matmul %0, %1, %cst {dimension_numbers = #tpu.dot_dimension_numbers<[1], [0], [0], [1], [0, 0, 1, 1], [], []>} : vector<8x256xbf16>, vector<256x128xbf16>, vector<8x128xf32> -> vector<8x128xf32>
    %c0_3 = arith.constant 0 : index
    %c0_4 = arith.constant 0 : index
    %3 = vector.load %arg3[%c0_3, %c0_4] : memref<1x128xf32, #tpu.memory_space<vmem>>, vector<1x128xf32>
    %4 = vector.broadcast %3 : vector<1x128xf32> to vector<8x128xf32>
    %5 = arith.addf %2, %4 : vector<8x128xf32>
    %cst_5 = arith.constant 0.000000e+00 : f32
    %6 = vector.broadcast %cst_5 : f32 to vector<8x128xf32>
    %7 = arith.maximumf %5, %6 : vector<8x128xf32>
    %8 = arith.truncf %7 : vector<8x128xf32> to vector<8x128xbf16>
    %c0_6 = arith.constant 0 : index
    %c0_7 = arith.constant 0 : index
    %9 = vector.load %arg4[%c0_6, %c0_7] : memref<8x128xbf16, #tpu.memory_space<vmem>>, vector<8x128xbf16>
    tpu.vector_store %arg4[%c0_6, %c0_7], %8 {strides = array<i32>} : memref<8x128xbf16, #tpu.memory_space<vmem>>, vector<8x128xbf16>,
    return
  }
  func.func @transform_0(%arg0: i32) -> (i32, i32) {
    %c0_i32 = arith.constant 0 : i32
    %c0_i32_0 = arith.constant 0 : i32
    return %arg0, %c0_i32 : i32, i32
  }
  func.func @transform_1(%arg0: i32) -> (i32, i32) {
    %c0_i32 = arith.constant 0 : i32
    %c0_i32_0 = arith.constant 0 : i32
    %c0_i32_1 = arith.constant 0 : i32
    return %c0_i32, %c0_i32_0 : i32, i32
  }
  func.func @transform_2(%arg0: i32) -> (i32, i32) {
    %c0_i32 = arith.constant 0 : i32
    %c0_i32_0 = arith.constant 0 : i32
    %c0_i32_1 = arith.constant 0 : i32
    return %c0_i32, %c0_i32_0 : i32, i32
  }
  func.func @transform_3(%arg0: i32) -> (i32, i32) {
    %c0_i32 = arith.constant 0 : i32
    %c0_i32_0 = arith.constant 0 : i32
    return %arg0, %c0_i32 : i32, i32
  }
}

module attributes {stable_mosaic.version = 11 : i64} {
  func.func @_mm_single_kernel(%arg0: i32, %arg1: memref<8x512xbf16, #tpu.memory_space<vmem>>, %arg2: memref<512x128xbf16, #tpu.memory_space<vmem>>, %arg3: memref<1x128xf32, #tpu.memory_space<vmem>>, %arg4: memref<8x128xbf16, #tpu.memory_space<vmem>>, %arg5: memref<8x128xbf16, #tpu.memory_space<vmem>>) attributes {dimension_semantics = [#tpu.dimension_semantics<parallel>], iteration_bounds = array<i64: 2>, scalar_prefetch = 0 : i64, scratch_operands = 0 : i64, tpu.core_type = #tpu.core_type<tc>, window_params = [{transform_indices = @transform_0, window_bounds = array<i64: 8, 512>}, {pipeline_mode = #tpu.pipeline_mode<synchronous>, transform_indices = @transform_1, window_bounds = array<i64: 512, 128>}, {pipeline_mode = #tpu.pipeline_mode<synchronous>, transform_indices = @transform_2, window_bounds = array<i64: 1, 128>}, {transform_indices = @transform_3, window_bounds = array<i64: 8, 128>}, {transform_indices = @transform_4, window_bounds = array<i64: 8, 128>}]} {
    %c0 = arith.constant 0 : index
    %c0_0 = arith.constant 0 : index
    %0 = vector.load %arg1[%c0, %c0_0] : memref<8x512xbf16, #tpu.memory_space<vmem>>, vector<8x512xbf16>
    %c0_1 = arith.constant 0 : index
    %c0_2 = arith.constant 0 : index
    %1 = vector.load %arg2[%c0_1, %c0_2] : memref<512x128xbf16, #tpu.memory_space<vmem>>, vector<512x128xbf16>
    %cst = arith.constant dense<0.000000e+00> : vector<8x128xf32>
    %2 = tpu.matmul %0, %1, %cst {dimension_numbers = #tpu.dot_dimension_numbers<[1], [0], [0], [1], [0, 0, 1, 1], [], []>} : vector<8x512xbf16>, vector<512x128xbf16>, vector<8x128xf32> -> vector<8x128xf32>
    %c0_3 = arith.constant 0 : index
    %c0_4 = arith.constant 0 : index
    %3 = vector.load %arg3[%c0_3, %c0_4] : memref<1x128xf32, #tpu.memory_space<vmem>>, vector<1x128xf32>
    %4 = vector.broadcast %3 : vector<1x128xf32> to vector<8x128xf32>
    %5 = arith.addf %2, %4 : vector<8x128xf32>
    %c0_5 = arith.constant 0 : index
    %c0_6 = arith.constant 0 : index
    %6 = vector.load %arg4[%c0_5, %c0_6] : memref<8x128xbf16, #tpu.memory_space<vmem>>, vector<8x128xbf16>
    %7 = arith.extf %6 : vector<8x128xbf16> to vector<8x128xf32>
    %8 = arith.addf %5, %7 : vector<8x128xf32>
    %cst_7 = arith.constant 0.000000e+00 : f32
    %9 = vector.broadcast %cst_7 : f32 to vector<8x128xf32>
    %10 = arith.maximumf %8, %9 : vector<8x128xf32>
    %11 = arith.truncf %10 : vector<8x128xf32> to vector<8x128xbf16>
    %c0_8 = arith.constant 0 : index
    %c0_9 = arith.constant 0 : index
    %12 = vector.load %arg5[%c0_8, %c0_9] : memref<8x128xbf16, #tpu.memory_space<vmem>>, vector<8x128xbf16>
    tpu.vector_store %arg5[%c0_8, %c0_9], %11 {strides = array<i32>} : memref<8x128xbf16, #tpu.memory_space<vmem>>, vector<8x128xbf16>,
    return
  }
  func.func @transform_0(%arg0: i32) -> (i32, i32) {
    %c0_i32 = arith.constant 0 : i32
    %c0_i32_0 = arith.constant 0 : i32
    return %arg0, %c0_i32 : i32, i32
  }
  func.func @transform_1(%arg0: i32) -> (i32, i32) {
    %c0_i32 = arith.constant 0 : i32
    %c0_i32_0 = arith.constant 0 : i32
    %c0_i32_1 = arith.constant 0 : i32
    return %c0_i32, %c0_i32_0 : i32, i32
  }
  func.func @transform_2(%arg0: i32) -> (i32, i32) {
    %c0_i32 = arith.constant 0 : i32
    %c0_i32_0 = arith.constant 0 : i32
    %c0_i32_1 = arith.constant 0 : i32
    return %c0_i32, %c0_i32_0 : i32, i32
  }
  func.func @transform_3(%arg0: i32) -> (i32, i32) {
    %c0_i32 = arith.constant 0 : i32
    %c0_i32_0 = arith.constant 0 : i32
    return %arg0, %c0_i32 : i32, i32
  }
  func.func @transform_4(%arg0: i32) -> (i32, i32) {
    %c0_i32 = arith.constant 0 : i32
    %c0_i32_0 = arith.constant 0 : i32
    return %arg0, %c0_i32 : i32, i32
  }
}

module attributes {stable_mosaic.version = 11 : i64} {
  func.func @_mm_single_kernel(%arg0: i32, %arg1: memref<8x128xbf16, #tpu.memory_space<vmem>>, %arg2: memref<128x128xbf16, #tpu.memory_space<vmem>>, %arg3: memref<1x128xf32, #tpu.memory_space<vmem>>, %arg4: memref<8x128xbf16, #tpu.memory_space<vmem>>) attributes {dimension_semantics = [#tpu.dimension_semantics<parallel>], iteration_bounds = array<i64: 2>, scalar_prefetch = 0 : i64, scratch_operands = 0 : i64, tpu.core_type = #tpu.core_type<tc>, window_params = [{transform_indices = @transform_0, window_bounds = array<i64: 8, 128>}, {pipeline_mode = #tpu.pipeline_mode<synchronous>, transform_indices = @transform_1, window_bounds = array<i64: 128, 128>}, {pipeline_mode = #tpu.pipeline_mode<synchronous>, transform_indices = @transform_2, window_bounds = array<i64: 1, 128>}, {transform_indices = @transform_3, window_bounds = array<i64: 8, 128>}]} {
    %c0 = arith.constant 0 : index
    %c0_0 = arith.constant 0 : index
    %0 = vector.load %arg1[%c0, %c0_0] : memref<8x128xbf16, #tpu.memory_space<vmem>>, vector<8x128xbf16>
    %c0_1 = arith.constant 0 : index
    %c0_2 = arith.constant 0 : index
    %1 = vector.load %arg2[%c0_1, %c0_2] : memref<128x128xbf16, #tpu.memory_space<vmem>>, vector<128x128xbf16>
    %cst = arith.constant dense<0.000000e+00> : vector<8x128xf32>
    %2 = tpu.matmul %0, %1, %cst {dimension_numbers = #tpu.dot_dimension_numbers<[1], [0], [0], [1], [0, 0, 1, 1], [], []>} : vector<8x128xbf16>, vector<128x128xbf16>, vector<8x128xf32> -> vector<8x128xf32>
    %c0_3 = arith.constant 0 : index
    %c0_4 = arith.constant 0 : index
    %3 = vector.load %arg3[%c0_3, %c0_4] : memref<1x128xf32, #tpu.memory_space<vmem>>, vector<1x128xf32>
    %4 = vector.broadcast %3 : vector<1x128xf32> to vector<8x128xf32>
    %5 = arith.addf %2, %4 : vector<8x128xf32>
    %6 = arith.truncf %5 : vector<8x128xf32> to vector<8x128xbf16>
    %c0_5 = arith.constant 0 : index
    %c0_6 = arith.constant 0 : index
    %7 = vector.load %arg4[%c0_5, %c0_6] : memref<8x128xbf16, #tpu.memory_space<vmem>>, vector<8x128xbf16>
    tpu.vector_store %arg4[%c0_5, %c0_6], %6 {strides = array<i32>} : memref<8x128xbf16, #tpu.memory_space<vmem>>, vector<8x128xbf16>,
    return
  }
  func.func @transform_0(%arg0: i32) -> (i32, i32) {
    %c0_i32 = arith.constant 0 : i32
    %c0_i32_0 = arith.constant 0 : i32
    return %arg0, %c0_i32 : i32, i32
  }
  func.func @transform_1(%arg0: i32) -> (i32, i32) {
    %c0_i32 = arith.constant 0 : i32
    %c0_i32_0 = arith.constant 0 : i32
    %c0_i32_1 = arith.constant 0 : i32
    return %c0_i32, %c0_i32_0 : i32, i32
  }
  func.func @transform_2(%arg0: i32) -> (i32, i32) {
    %c0_i32 = arith.constant 0 : i32
    %c0_i32_0 = arith.constant 0 : i32
    %c0_i32_1 = arith.constant 0 : i32
    return %c0_i32, %c0_i32_0 : i32, i32
  }
  func.func @transform_3(%arg0: i32) -> (i32, i32) {
    %c0_i32 = arith.constant 0 : i32
    %c0_i32_0 = arith.constant 0 : i32
    return %arg0, %c0_i32 : i32, i32
  }
}

module attributes {stable_mosaic.version = 11 : i64} {
  func.func @_mm_single_kernel(%arg0: i32, %arg1: memref<8x512xbf16, #tpu.memory_space<vmem>>, %arg2: memref<512x128xbf16, #tpu.memory_space<vmem>>, %arg3: memref<1x128xf32, #tpu.memory_space<vmem>>, %arg4: memref<8x128xbf16, #tpu.memory_space<vmem>>) attributes {dimension_semantics = [#tpu.dimension_semantics<parallel>], iteration_bounds = array<i64: 1>, scalar_prefetch = 0 : i64, scratch_operands = 0 : i64, tpu.core_type = #tpu.core_type<tc>, window_params = [{transform_indices = @transform_0, window_bounds = array<i64: 8, 512>}, {pipeline_mode = #tpu.pipeline_mode<synchronous>, transform_indices = @transform_1, window_bounds = array<i64: 512, 128>}, {pipeline_mode = #tpu.pipeline_mode<synchronous>, transform_indices = @transform_2, window_bounds = array<i64: 1, 128>}, {transform_indices = @transform_3, window_bounds = array<i64: 8, 128>}]} {
    %c0 = arith.constant 0 : index
    %c0_0 = arith.constant 0 : index
    %0 = vector.load %arg1[%c0, %c0_0] : memref<8x512xbf16, #tpu.memory_space<vmem>>, vector<8x512xbf16>
    %c0_1 = arith.constant 0 : index
    %c0_2 = arith.constant 0 : index
    %1 = vector.load %arg2[%c0_1, %c0_2] : memref<512x128xbf16, #tpu.memory_space<vmem>>, vector<512x128xbf16>
    %cst = arith.constant dense<0.000000e+00> : vector<8x128xf32>
    %2 = tpu.matmul %0, %1, %cst {dimension_numbers = #tpu.dot_dimension_numbers<[1], [0], [0], [1], [0, 0, 1, 1], [], []>} : vector<8x512xbf16>, vector<512x128xbf16>, vector<8x128xf32> -> vector<8x128xf32>
    %c0_3 = arith.constant 0 : index
    %c0_4 = arith.constant 0 : index
    %3 = vector.load %arg3[%c0_3, %c0_4] : memref<1x128xf32, #tpu.memory_space<vmem>>, vector<1x128xf32>
    %4 = vector.broadcast %3 : vector<1x128xf32> to vector<8x128xf32>
    %5 = arith.addf %2, %4 : vector<8x128xf32>
    %cst_5 = arith.constant 0.000000e+00 : f32
    %6 = vector.broadcast %cst_5 : f32 to vector<8x128xf32>
    %7 = arith.maximumf %5, %6 : vector<8x128xf32>
    %8 = arith.truncf %7 : vector<8x128xf32> to vector<8x128xbf16>
    %c0_6 = arith.constant 0 : index
    %c0_7 = arith.constant 0 : index
    %9 = vector.load %arg4[%c0_6, %c0_7] : memref<8x128xbf16, #tpu.memory_space<vmem>>, vector<8x128xbf16>
    tpu.vector_store %arg4[%c0_6, %c0_7], %8 {strides = array<i32>} : memref<8x128xbf16, #tpu.memory_space<vmem>>, vector<8x128xbf16>,
    return
  }
  func.func @transform_0(%arg0: i32) -> (i32, i32) {
    %c0_i32 = arith.constant 0 : i32
    %c0_i32_0 = arith.constant 0 : i32
    return %arg0, %c0_i32 : i32, i32
  }
  func.func @transform_1(%arg0: i32) -> (i32, i32) {
    %c0_i32 = arith.constant 0 : i32
    %c0_i32_0 = arith.constant 0 : i32
    %c0_i32_1 = arith.constant 0 : i32
    return %c0_i32, %c0_i32_0 : i32, i32
  }
  func.func @transform_2(%arg0: i32) -> (i32, i32) {
    %c0_i32 = arith.constant 0 : i32
    %c0_i32_0 = arith.constant 0 : i32
    %c0_i32_1 = arith.constant 0 : i32
    return %c0_i32, %c0_i32_0 : i32, i32
  }
  func.func @transform_3(%arg0: i32) -> (i32, i32) {
    %c0_i32 = arith.constant 0 : i32
    %c0_i32_0 = arith.constant 0 : i32
    return %arg0, %c0_i32 : i32, i32
  }
}

module attributes {stable_mosaic.version = 11 : i64} {
  func.func @_mm_single_kernel(%arg0: i32, %arg1: memref<8x128xbf16, #tpu.memory_space<vmem>>, %arg2: memref<128x128xbf16, #tpu.memory_space<vmem>>, %arg3: memref<1x128xf32, #tpu.memory_space<vmem>>, %arg4: memref<8x128xbf16, #tpu.memory_space<vmem>>) attributes {dimension_semantics = [#tpu.dimension_semantics<parallel>], iteration_bounds = array<i64: 1>, scalar_prefetch = 0 : i64, scratch_operands = 0 : i64, tpu.core_type = #tpu.core_type<tc>, window_params = [{transform_indices = @transform_0, window_bounds = array<i64: 8, 128>}, {pipeline_mode = #tpu.pipeline_mode<synchronous>, transform_indices = @transform_1, window_bounds = array<i64: 128, 128>}, {pipeline_mode = #tpu.pipeline_mode<synchronous>, transform_indices = @transform_2, window_bounds = array<i64: 1, 128>}, {transform_indices = @transform_3, window_bounds = array<i64: 8, 128>}]} {
    %c0 = arith.constant 0 : index
    %c0_0 = arith.constant 0 : index
    %0 = vector.load %arg1[%c0, %c0_0] : memref<8x128xbf16, #tpu.memory_space<vmem>>, vector<8x128xbf16>
    %c0_1 = arith.constant 0 : index
    %c0_2 = arith.constant 0 : index
    %1 = vector.load %arg2[%c0_1, %c0_2] : memref<128x128xbf16, #tpu.memory_space<vmem>>, vector<128x128xbf16>
    %cst = arith.constant dense<0.000000e+00> : vector<8x128xf32>
    %2 = tpu.matmul %0, %1, %cst {dimension_numbers = #tpu.dot_dimension_numbers<[1], [0], [0], [1], [0, 0, 1, 1], [], []>} : vector<8x128xbf16>, vector<128x128xbf16>, vector<8x128xf32> -> vector<8x128xf32>
    %c0_3 = arith.constant 0 : index
    %c0_4 = arith.constant 0 : index
    %3 = vector.load %arg3[%c0_3, %c0_4] : memref<1x128xf32, #tpu.memory_space<vmem>>, vector<1x128xf32>
    %4 = vector.broadcast %3 : vector<1x128xf32> to vector<8x128xf32>
    %5 = arith.addf %2, %4 : vector<8x128xf32>
    %6 = arith.truncf %5 : vector<8x128xf32> to vector<8x128xbf16>
    %c0_5 = arith.constant 0 : index
    %c0_6 = arith.constant 0 : index
    %7 = vector.load %arg4[%c0_5, %c0_6] : memref<8x128xbf16, #tpu.memory_space<vmem>>, vector<8x128xbf16>
    tpu.vector_store %arg4[%c0_5, %c0_6], %6 {strides = array<i32>} : memref<8x128xbf16, #tpu.memory_space<vmem>>, vector<8x128xbf16>,
    return
  }
  func.func @transform_0(%arg0: i32) -> (i32, i32) {
    %c0_i32 = arith.constant 0 : i32
    %c0_i32_0 = arith.constant 0 : i32
    return %arg0, %c0_i32 : i32, i32
  }
  func.func @transform_1(%arg0: i32) -> (i32, i32) {
    %c0_i32 = arith.constant 0 : i32
    %c0_i32_0 = arith.constant 0 : i32
    %c0_i32_1 = arith.constant 0 : i32
    return %c0_i32, %c0_i32_0 : i32, i32
  }
  func.func @transform_2(%arg0: i32) -> (i32, i32) {
    %c0_i32 = arith.constant 0 : i32
    %c0_i32_0 = arith.constant 0 : i32
    %c0_i32_1 = arith.constant 0 : i32
    return %c0_i32, %c0_i32_0 : i32, i32
  }
  func.func @transform_3(%arg0: i32) -> (i32, i32) {
    %c0_i32 = arith.constant 0 : i32
    %c0_i32_0 = arith.constant 0 : i32
    return %arg0, %c0_i32 : i32, i32
  }
}

module attributes {stable_mosaic.version = 11 : i64} {
  func.func @_mm_single_kernel(%arg0: i32, %arg1: memref<8x896xbf16, #tpu.memory_space<vmem>>, %arg2: memref<896x128xbf16, #tpu.memory_space<vmem>>, %arg3: memref<1x128xf32, #tpu.memory_space<vmem>>, %arg4: memref<8x128xbf16, #tpu.memory_space<vmem>>, %arg5: memref<8x128xbf16, #tpu.memory_space<vmem>>) attributes {dimension_semantics = [#tpu.dimension_semantics<parallel>], iteration_bounds = array<i64: 1>, scalar_prefetch = 0 : i64, scratch_operands = 0 : i64, tpu.core_type = #tpu.core_type<tc>, window_params = [{transform_indices = @transform_0, window_bounds = array<i64: 8, 896>}, {pipeline_mode = #tpu.pipeline_mode<synchronous>, transform_indices = @transform_1, window_bounds = array<i64: 896, 128>}, {pipeline_mode = #tpu.pipeline_mode<synchronous>, transform_indices = @transform_2, window_bounds = array<i64: 1, 128>}, {transform_indices = @transform_3, window_bounds = array<i64: 8, 128>}, {transform_indices = @transform_4, window_bounds = array<i64: 8, 128>}]} {
    %c0 = arith.constant 0 : index
    %c0_0 = arith.constant 0 : index
    %0 = vector.load %arg1[%c0, %c0_0] : memref<8x896xbf16, #tpu.memory_space<vmem>>, vector<8x896xbf16>
    %c0_1 = arith.constant 0 : index
    %c0_2 = arith.constant 0 : index
    %1 = vector.load %arg2[%c0_1, %c0_2] : memref<896x128xbf16, #tpu.memory_space<vmem>>, vector<896x128xbf16>
    %cst = arith.constant dense<0.000000e+00> : vector<8x128xf32>
    %2 = tpu.matmul %0, %1, %cst {dimension_numbers = #tpu.dot_dimension_numbers<[1], [0], [0], [1], [0, 0, 1, 1], [], []>} : vector<8x896xbf16>, vector<896x128xbf16>, vector<8x128xf32> -> vector<8x128xf32>
    %c0_3 = arith.constant 0 : index
    %c0_4 = arith.constant 0 : index
    %3 = vector.load %arg3[%c0_3, %c0_4] : memref<1x128xf32, #tpu.memory_space<vmem>>, vector<1x128xf32>
    %4 = vector.broadcast %3 : vector<1x128xf32> to vector<8x128xf32>
    %5 = arith.addf %2, %4 : vector<8x128xf32>
    %c0_5 = arith.constant 0 : index
    %c0_6 = arith.constant 0 : index
    %6 = vector.load %arg4[%c0_5, %c0_6] : memref<8x128xbf16, #tpu.memory_space<vmem>>, vector<8x128xbf16>
    %7 = arith.extf %6 : vector<8x128xbf16> to vector<8x128xf32>
    %8 = arith.addf %5, %7 : vector<8x128xf32>
    %cst_7 = arith.constant 0.000000e+00 : f32
    %9 = vector.broadcast %cst_7 : f32 to vector<8x128xf32>
    %10 = arith.maximumf %8, %9 : vector<8x128xf32>
    %11 = arith.truncf %10 : vector<8x128xf32> to vector<8x128xbf16>
    %c0_8 = arith.constant 0 : index
    %c0_9 = arith.constant 0 : index
    %12 = vector.load %arg5[%c0_8, %c0_9] : memref<8x128xbf16, #tpu.memory_space<vmem>>, vector<8x128xbf16>
    tpu.vector_store %arg5[%c0_8, %c0_9], %11 {strides = array<i32>} : memref<8x128xbf16, #tpu.memory_space<vmem>>, vector<8x128xbf16>,
    return
  }
  func.func @transform_0(%arg0: i32) -> (i32, i32) {
    %c0_i32 = arith.constant 0 : i32
    %c0_i32_0 = arith.constant 0 : i32
    return %arg0, %c0_i32 : i32, i32
  }
  func.func @transform_1(%arg0: i32) -> (i32, i32) {
    %c0_i32 = arith.constant 0 : i32
    %c0_i32_0 = arith.constant 0 : i32
    %c0_i32_1 = arith.constant 0 : i32
    return %c0_i32, %c0_i32_0 : i32, i32
  }
  func.func @transform_2(%arg0: i32) -> (i32, i32) {
    %c0_i32 = arith.constant 0 : i32
    %c0_i32_0 = arith.constant 0 : i32
    %c0_i32_1 = arith.constant 0 : i32
    return %c0_i32, %c0_i32_0 : i32, i32
  }
  func.func @transform_3(%arg0: i32) -> (i32, i32) {
    %c0_i32 = arith.constant 0 : i32
    %c0_i32_0 = arith.constant 0 : i32
    return %arg0, %c0_i32 : i32, i32
  }
  func.func @transform_4(%arg0: i32) -> (i32, i32) {
    %c0_i32 = arith.constant 0 : i32
    %c0_i32_0 = arith.constant 0 : i32
    return %arg0, %c0_i32 : i32, i32
  }
}

module attributes {stable_mosaic.version = 11 : i64} {
  func.func @_mm_single_kernel(%arg0: i32, %arg1: memref<8x896xbf16, #tpu.memory_space<vmem>>, %arg2: memref<896x128xbf16, #tpu.memory_space<vmem>>, %arg3: memref<1x128xf32, #tpu.memory_space<vmem>>, %arg4: memref<8x128xbf16, #tpu.memory_space<vmem>>) attributes {dimension_semantics = [#tpu.dimension_semantics<parallel>], iteration_bounds = array<i64: 1>, scalar_prefetch = 0 : i64, scratch_operands = 0 : i64, tpu.core_type = #tpu.core_type<tc>, window_params = [{transform_indices = @transform_0, window_bounds = array<i64: 8, 896>}, {pipeline_mode = #tpu.pipeline_mode<synchronous>, transform_indices = @transform_1, window_bounds = array<i64: 896, 128>}, {pipeline_mode = #tpu.pipeline_mode<synchronous>, transform_indices = @transform_2, window_bounds = array<i64: 1, 128>}, {transform_indices = @transform_3, window_bounds = array<i64: 8, 128>}]} {
    %c0 = arith.constant 0 : index
    %c0_0 = arith.constant 0 : index
    %0 = vector.load %arg1[%c0, %c0_0] : memref<8x896xbf16, #tpu.memory_space<vmem>>, vector<8x896xbf16>
    %c0_1 = arith.constant 0 : index
    %c0_2 = arith.constant 0 : index
    %1 = vector.load %arg2[%c0_1, %c0_2] : memref<896x128xbf16, #tpu.memory_space<vmem>>, vector<896x128xbf16>
    %cst = arith.constant dense<0.000000e+00> : vector<8x128xf32>
    %2 = tpu.matmul %0, %1, %cst {dimension_numbers = #tpu.dot_dimension_numbers<[1], [0], [0], [1], [0, 0, 1, 1], [], []>} : vector<8x896xbf16>, vector<896x128xbf16>, vector<8x128xf32> -> vector<8x128xf32>
    %c0_3 = arith.constant 0 : index
    %c0_4 = arith.constant 0 : index
    %3 = vector.load %arg3[%c0_3, %c0_4] : memref<1x128xf32, #tpu.memory_space<vmem>>, vector<1x128xf32>
    %4 = vector.broadcast %3 : vector<1x128xf32> to vector<8x128xf32>
    %5 = arith.addf %2, %4 : vector<8x128xf32>
    %cst_5 = arith.constant 0.000000e+00 : f32
    %6 = vector.broadcast %cst_5 : f32 to vector<8x128xf32>
    %7 = arith.maximumf %5, %6 : vector<8x128xf32>
    %8 = arith.truncf %7 : vector<8x128xf32> to vector<8x128xbf16>
    %c0_6 = arith.constant 0 : index
    %c0_7 = arith.constant 0 : index
    %9 = vector.load %arg4[%c0_6, %c0_7] : memref<8x128xbf16, #tpu.memory_space<vmem>>, vector<8x128xbf16>
    tpu.vector_store %arg4[%c0_6, %c0_7], %8 {strides = array<i32>} : memref<8x128xbf16, #tpu.memory_space<vmem>>, vector<8x128xbf16>,
    return
  }
  func.func @transform_0(%arg0: i32) -> (i32, i32) {
    %c0_i32 = arith.constant 0 : i32
    %c0_i32_0 = arith.constant 0 : i32
    return %arg0, %c0_i32 : i32, i32
  }
  func.func @transform_1(%arg0: i32) -> (i32, i32) {
    %c0_i32 = arith.constant 0 : i32
    %c0_i32_0 = arith.constant 0 : i32
    %c0_i32_1 = arith.constant 0 : i32
    return %c0_i32, %c0_i32_0 : i32, i32
  }
  func.func @transform_2(%arg0: i32) -> (i32, i32) {
    %c0_i32 = arith.constant 0 : i32
    %c0_i32_0 = arith.constant 0 : i32
    %c0_i32_1 = arith.constant 0 : i32
    return %c0_i32, %c0_i32_0 : i32, i32
  }
  func.func @transform_3(%arg0: i32) -> (i32, i32) {
    %c0_i32 = arith.constant 0 : i32
    %c0_i32_0 = arith.constant 0 : i32
    return %arg0, %c0_i32 : i32, i32
  }
}

module attributes {stable_mosaic.version = 11 : i64} {
  func.func @_mm_single_kernel(%arg0: i32, %arg1: memref<8x1792xbf16, #tpu.memory_space<vmem>>, %arg2: memref<1792x128xbf16, #tpu.memory_space<vmem>>, %arg3: memref<1x128xf32, #tpu.memory_space<vmem>>, %arg4: memref<8x128xbf16, #tpu.memory_space<vmem>>, %arg5: memref<8x128xbf16, #tpu.memory_space<vmem>>) attributes {dimension_semantics = [#tpu.dimension_semantics<parallel>], iteration_bounds = array<i64: 1>, scalar_prefetch = 0 : i64, scratch_operands = 0 : i64, tpu.core_type = #tpu.core_type<tc>, window_params = [{transform_indices = @transform_0, window_bounds = array<i64: 8, 1792>}, {pipeline_mode = #tpu.pipeline_mode<synchronous>, transform_indices = @transform_1, window_bounds = array<i64: 1792, 128>}, {pipeline_mode = #tpu.pipeline_mode<synchronous>, transform_indices = @transform_2, window_bounds = array<i64: 1, 128>}, {transform_indices = @transform_3, window_bounds = array<i64: 8, 128>}, {transform_indices = @transform_4, window_bounds = array<i64: 8, 128>}]} {
    %c0 = arith.constant 0 : index
    %c0_0 = arith.constant 0 : index
    %0 = vector.load %arg1[%c0, %c0_0] : memref<8x1792xbf16, #tpu.memory_space<vmem>>, vector<8x1792xbf16>
    %c0_1 = arith.constant 0 : index
    %c0_2 = arith.constant 0 : index
    %1 = vector.load %arg2[%c0_1, %c0_2] : memref<1792x128xbf16, #tpu.memory_space<vmem>>, vector<1792x128xbf16>
    %cst = arith.constant dense<0.000000e+00> : vector<8x128xf32>
    %2 = tpu.matmul %0, %1, %cst {dimension_numbers = #tpu.dot_dimension_numbers<[1], [0], [0], [1], [0, 0, 1, 1], [], []>} : vector<8x1792xbf16>, vector<1792x128xbf16>, vector<8x128xf32> -> vector<8x128xf32>
    %c0_3 = arith.constant 0 : index
    %c0_4 = arith.constant 0 : index
    %3 = vector.load %arg3[%c0_3, %c0_4] : memref<1x128xf32, #tpu.memory_space<vmem>>, vector<1x128xf32>
    %4 = vector.broadcast %3 : vector<1x128xf32> to vector<8x128xf32>
    %5 = arith.addf %2, %4 : vector<8x128xf32>
    %c0_5 = arith.constant 0 : index
    %c0_6 = arith.constant 0 : index
    %6 = vector.load %arg4[%c0_5, %c0_6] : memref<8x128xbf16, #tpu.memory_space<vmem>>, vector<8x128xbf16>
    %7 = arith.extf %6 : vector<8x128xbf16> to vector<8x128xf32>
    %8 = arith.addf %5, %7 : vector<8x128xf32>
    %cst_7 = arith.constant 0.000000e+00 : f32
    %9 = vector.broadcast %cst_7 : f32 to vector<8x128xf32>
    %10 = arith.maximumf %8, %9 : vector<8x128xf32>
    %11 = arith.truncf %10 : vector<8x128xf32> to vector<8x128xbf16>
    %c0_8 = arith.constant 0 : index
    %c0_9 = arith.constant 0 : index
    %12 = vector.load %arg5[%c0_8, %c0_9] : memref<8x128xbf16, #tpu.memory_space<vmem>>, vector<8x128xbf16>
    tpu.vector_store %arg5[%c0_8, %c0_9], %11 {strides = array<i32>} : memref<8x128xbf16, #tpu.memory_space<vmem>>, vector<8x128xbf16>,
    return
  }
  func.func @transform_0(%arg0: i32) -> (i32, i32) {
    %c0_i32 = arith.constant 0 : i32
    %c0_i32_0 = arith.constant 0 : i32
    return %arg0, %c0_i32 : i32, i32
  }
  func.func @transform_1(%arg0: i32) -> (i32, i32) {
    %c0_i32 = arith.constant 0 : i32
    %c0_i32_0 = arith.constant 0 : i32
    %c0_i32_1 = arith.constant 0 : i32
    return %c0_i32, %c0_i32_0 : i32, i32
  }
  func.func @transform_2(%arg0: i32) -> (i32, i32) {
    %c0_i32 = arith.constant 0 : i32
    %c0_i32_0 = arith.constant 0 : i32
    %c0_i32_1 = arith.constant 0 : i32
    return %c0_i32, %c0_i32_0 : i32, i32
  }
  func.func @transform_3(%arg0: i32) -> (i32, i32) {
    %c0_i32 = arith.constant 0 : i32
    %c0_i32_0 = arith.constant 0 : i32
    return %arg0, %c0_i32 : i32, i32
  }
  func.func @transform_4(%arg0: i32) -> (i32, i32) {
    %c0_i32 = arith.constant 0 : i32
    %c0_i32_0 = arith.constant 0 : i32
    return %arg0, %c0_i32 : i32, i32
  }
}

module attributes {stable_mosaic.version = 11 : i64} {
  func.func @_avgpool_kernel(%arg0: i32, %arg1: memref<1x1x64xbf16, #tpu.memory_space<vmem>>, %arg2: memref<1x1x64xf32, #tpu.memory_space<vmem>>) attributes {dimension_semantics = [#tpu.dimension_semantics<parallel>], iteration_bounds = array<i64: 2>, scalar_prefetch = 0 : i64, scratch_operands = 0 : i64, tpu.core_type = #tpu.core_type<tc>, window_params = [{transform_indices = @transform_0, window_bounds = array<i64: 1, 1, 64>}, {transform_indices = @transform_1, window_bounds = array<i64: 1, 1, 64>}]} {
    %c0 = arith.constant 0 : index
    %c0_0 = arith.constant 0 : index
    %c0_1 = arith.constant 0 : index
    %0 = vector.load %arg1[%c0, %c0_0, %c0_1] : memref<1x1x64xbf16, #tpu.memory_space<vmem>>, vector<1x1x64xbf16>
    %1 = arith.extf %0 : vector<1x1x64xbf16> to vector<1x1x64xf32>
    %cst = arith.constant dense<0.000000e+00> : vector<1x64xf32>
    %2 = vector.multi_reduction <add>, %1, %cst [1] : vector<1x1x64xf32> to vector<1x64xf32>
    %3 = vector.shape_cast %2 : vector<1x64xf32> to vector<1x1x64xf32>
    %cst_2 = arith.constant 1.000000e+00 : f32
    %4 = vector.broadcast %cst_2 : f32 to vector<1x1x64xf32>
    %5 = arith.divf %3, %4 : vector<1x1x64xf32>
    %c0_3 = arith.constant 0 : index
    %c0_4 = arith.constant 0 : index
    %c0_5 = arith.constant 0 : index
    %6 = vector.load %arg2[%c0_3, %c0_4, %c0_5] : memref<1x1x64xf32, #tpu.memory_space<vmem>>, vector<1x1x64xf32>
    tpu.vector_store %arg2[%c0_3, %c0_4, %c0_5], %5 {strides = array<i32>} : memref<1x1x64xf32, #tpu.memory_space<vmem>>, vector<1x1x64xf32>,
    return
  }
  func.func @transform_0(%arg0: i32) -> (i32, i32, i32) {
    %c0_i32 = arith.constant 0 : i32
    %c0_i32_0 = arith.constant 0 : i32
    %c0_i32_1 = arith.constant 0 : i32
    return %arg0, %c0_i32, %c0_i32_0 : i32, i32, i32
  }
  func.func @transform_1(%arg0: i32) -> (i32, i32, i32) {
    %c0_i32 = arith.constant 0 : i32
    %c0_i32_0 = arith.constant 0 : i32
    %c0_i32_1 = arith.constant 0 : i32
    return %arg0, %c0_i32, %c0_i32_0 : i32, i32, i32
  }
}

module attributes {stable_mosaic.version = 11 : i64} {
  func.func @_mm_single_kernel(%arg0: i32, %arg1: memref<8x128xbf16, #tpu.memory_space<vmem>>, %arg2: memref<128x128xbf16, #tpu.memory_space<vmem>>, %arg3: memref<1x128xf32, #tpu.memory_space<vmem>>, %arg4: memref<8x128xf32, #tpu.memory_space<vmem>>) attributes {dimension_semantics = [#tpu.dimension_semantics<parallel>], iteration_bounds = array<i64: 1>, scalar_prefetch = 0 : i64, scratch_operands = 0 : i64, tpu.core_type = #tpu.core_type<tc>, window_params = [{transform_indices = @transform_0, window_bounds = array<i64: 8, 128>}, {pipeline_mode = #tpu.pipeline_mode<synchronous>, transform_indices = @transform_1, window_bounds = array<i64: 128, 128>}, {pipeline_mode = #tpu.pipeline_mode<synchronous>, transform_indices = @transform_2, window_bounds = array<i64: 1, 128>}, {transform_indices = @transform_3, window_bounds = array<i64: 8, 128>}]} {
    %c0 = arith.constant 0 : index
    %c0_0 = arith.constant 0 : index
    %0 = vector.load %arg1[%c0, %c0_0] : memref<8x128xbf16, #tpu.memory_space<vmem>>, vector<8x128xbf16>
    %c0_1 = arith.constant 0 : index
    %c0_2 = arith.constant 0 : index
    %1 = vector.load %arg2[%c0_1, %c0_2] : memref<128x128xbf16, #tpu.memory_space<vmem>>, vector<128x128xbf16>
    %cst = arith.constant dense<0.000000e+00> : vector<8x128xf32>
    %2 = tpu.matmul %0, %1, %cst {dimension_numbers = #tpu.dot_dimension_numbers<[1], [0], [0], [1], [0, 0, 1, 1], [], []>} : vector<8x128xbf16>, vector<128x128xbf16>, vector<8x128xf32> -> vector<8x128xf32>
    %c0_3 = arith.constant 0 : index
    %c0_4 = arith.constant 0 : index
    %3 = vector.load %arg3[%c0_3, %c0_4] : memref<1x128xf32, #tpu.memory_space<vmem>>, vector<1x128xf32>
    %4 = vector.broadcast %3 : vector<1x128xf32> to vector<8x128xf32>
    %5 = arith.addf %2, %4 : vector<8x128xf32>
    %c0_5 = arith.constant 0 : index
    %c0_6 = arith.constant 0 : index
    %6 = vector.load %arg4[%c0_5, %c0_6] : memref<8x128xf32, #tpu.memory_space<vmem>>, vector<8x128xf32>
    tpu.vector_store %arg4[%c0_5, %c0_6], %5 {strides = array<i32>} : memref<8x128xf32, #tpu.memory_space<vmem>>, vector<8x128xf32>,
    return
  }
  func.func @transform_0(%arg0: i32) -> (i32, i32) {
    %c0_i32 = arith.constant 0 : i32
    %c0_i32_0 = arith.constant 0 : i32
    return %arg0, %c0_i32 : i32, i32
  }
  func.func @transform_1(%arg0: i32) -> (i32, i32) {
    %c0_i32 = arith.constant 0 : i32
    %c0_i32_0 = arith.constant 0 : i32
    %c0_i32_1 = arith.constant 0 : i32
    return %c0_i32, %c0_i32_0 : i32, i32
  }
  func.func @transform_2(%arg0: i32) -> (i32, i32) {
    %c0_i32 = arith.constant 0 : i32
    %c0_i32_0 = arith.constant 0 : i32
    %c0_i32_1 = arith.constant 0 : i32
    return %c0_i32, %c0_i32_0 : i32, i32
  }
  func.func @transform_3(%arg0: i32) -> (i32, i32) {
    %c0_i32 = arith.constant 0 : i32
    %c0_i32_0 = arith.constant 0 : i32
    return %arg0, %c0_i32 : i32, i32
  }
}

</mosaic_0001>

<bundles_post_ra>
// kernel: _lambda_.18
= control target key start
LH: loop header
LB: loop body
LE: loop exit
PB: predicated region body
PF: predicated region fallthrough
CT: control target
= control target key end

     0   :  { %s74_s0 = inlined_call_operand.vmem [shape: bf16[8,512], index: 0, kind: input, shape index: {}]   ;;  %s75_s1 = inlined_call_operand.vmem [shape: bf16[8,512], index: 1, kind: input, shape index: {}]   ;;  %s76_s2 = inlined_call_operand.vmem [shape: bf16[8,512], index: 2, kind: input, shape index: {}]   ;;  %s77_s3 = inlined_call_operand.vmem [shape: bf16[8,512], index: 3, kind: output, shape index: {}]  }
   0x1   :  { %v14_v0 = vld [vmem:[%s74_s0] sm:$0xff]  ;;  %v15_v4 = vld [vmem:[%s74_s0 + $0x8] sm:$0xff] }
   0x2   :  { %v16_v1 = vld [vmem:[%s75_s1] sm:$0xff]  ;;  %v17_v5 = vld [vmem:[%s75_s1 + $0x8] sm:$0xff] }
   0x3   :  { %v20_v2 = vld [vmem:[%s76_s2] sm:$0xff]  ;;  %v18_v3 = vmax.bf16 %v16_v1, %v14_v0  ;;  %v21_v6 = vld [vmem:[%s76_s2 + $0x8] sm:$0xff]  ;;  %v19_v7 = vmax.bf16 %v17_v5, %v15_v4 }
   0x5   :  { %v22_v8 = vmax.bf16 %v20_v2, %v18_v3  ;;  %v23_v9 = vmax.bf16 %v21_v6, %v19_v7 }
   0x7   :  { %24 = vst [vmem:[%s77_s3] sm:$0xff] %v22_v8  ;;  %25 = vst [vmem:[%s77_s3 + $0x8] sm:$0xff] %v23_v9 }

// kernel: _lambda_.17
= control target key start
LH: loop header
LB: loop body
LE: loop exit
PB: predicated region body
PF: predicated region fallthrough
CT: control target
= control target key end

     0   :  { %s6193_s12 = smov 0   ;;  %s7332_s0 = inlined_call_operand.vmem [shape: bf16[1024,1152], index: 0, kind: input, shape index: {}]   ;;  %s7333_s1 = inlined_call_operand.vmem [shape: bf16[1152,128], index: 1, kind: input, shape index: {}]   ;;  %s7334_s2 = inlined_call_operand.vmem [shape: f32[1,128], index: 2, kind: input, shape index: {}]   ;;  %s7335_s3 = inlined_call_operand.vmem [shape: bf16[1024,128], index: 3, kind: output, shape index: {}]  }
   0x1 LB: > { %s4438_s13 = sadd.s32 4294967295, %s6170_s12   ;;  %p4442_p0 = scmp.ge.s32.totalorder %s6170_s12, 1  ;;  %s6170_s12 = sphi %s6193_s12, %s13_s12  }
   0x2   : > { %p139_p1 = scmp.lt.s32.totalorder %s6170_s12, 3 }
   0x4   : > { %p140_p2 = pnand %p4442_p0, %p139_p1 }
   0x6   : > { %143 = sbr.rel (%p140_p2) target bundleno = 870 (0x366), region = 32 }
   0xd   : > { %v5675_v0 = vld [vmem:[%s7333_s1] sm:$0xff]   ;;  %v6172_v1 = vmov 0   ;;  %v5677_v3 = vld [vmem:[%s7333_s1 + $0x8] sm:$0xff]   ;;  %v5679_v5 = vld [vmem:[%s7333_s1 + $0x10] sm:$0xff]   ;;  %s4443_s7 = sshll.u32 %s4438_s13, 6 }
   0xe   : > { %2553 = vmatprep.subr.bf16.mxu1 %v6172_v1  ;;  %2842 = vmatprep.subr.bf16.mxu0 %v6172_v1  ;;  %v6209_v2 = vld [vmem:[%s7333_s1 + $0x80] sm:$0xff]   ;;  %v6219_v4 = vld [vmem:[%s7333_s1 + $0x88] sm:$0xff]   ;;  %v6230_v6 = vld [vmem:[%s7333_s1 + $0x90] sm:$0xff]   ;;  %p165_p3 = scmp.lt.s32.totalorder %s4443_s7, 127 }
   0xf   : > { %2554 = vmatpush1.bf16.msra.mxu1 %v5675_v0  ;;  %2843 = vmatpush1.bf16.msra.mxu0 %v6209_v2  ;;  %v5681_v7 = vld [vmem:[%s7333_s1 + $0x18] sm:$0xff]   ;;  %v5683_v9 = vld [vmem:[%s7333_s1 + $0x20] sm:$0xff]   ;;  %v5685_v11 = vld [vmem:[%s7333_s1 + $0x28] sm:$0xff]  }
  0x10   : > { %2555 = vmatprep.subr.bf16.mxu1 %v6172_v1  ;;  %2844 = vmatprep.subr.bf16.mxu0 %v6172_v1  ;;  %v6241_v8 = vld [vmem:[%s7333_s1 + $0x98] sm:$0xff]   ;;  %v6252_v10 = vld [vmem:[%s7333_s1 + $0xa0] sm:$0xff]   ;;  %v6265_v12 = vld [vmem:[%s7333_s1 + $0xa8] sm:$0xff]   ;;  %s7371_s7 = smov (!%p165_p3, %s4443_s7), 127 }
  0x11   : > { %v5687_v13 = vld [vmem:[%s7333_s1 + $0x30] sm:$0xff]   ;;  %v5689_v15 = vld [vmem:[%s7333_s1 + $0x38] sm:$0xff]   ;;  %s5665_s19 = smul.u32 36, %s7371_s7  ;;  %v5691_v17 = vld [vmem:[%s7333_s1 + $0x40] sm:$0xff]  }
  0x12   : > { %v6278_v14 = vld [vmem:[%s7333_s1 + $0xb0] sm:$0xff]   ;;  %v6290_v16 = vld [vmem:[%s7333_s1 + $0xb8] sm:$0xff]   ;;  %v6306_v18 = vld [vmem:[%s7333_s1 + $0xc0] sm:$0xff]  }
  0x13   : > { %2556 = vmatpush1.bf16.msra.mxu1 %v5677_v3  ;;  %2845 = vmatpush1.bf16.msra.mxu0 %v6219_v4  ;;  %s6299_s26 = scalar_lea.vmem %s7332_s0, %s5665_s19  ;;  %v5693_v20 = vld [vmem:[%s7333_s1 + $0x48] sm:$0xff]   ;;  %v5695_v23 = vld [vmem:[%s7333_s1 + $0x50] sm:$0xff]   ;;  %v5697_v25 = vld [vmem:[%s7333_s1 + $0x58] sm:$0xff]  }
  0x14   : > { %2557 = vmatprep.subr.bf16.mxu1 %v6172_v1  ;;  %2846 = vmatprep.subr.bf16.mxu0 %v6172_v1  ;;  %v5709_v19 = vld [vmem:[%s6299_s26 + $0x4] ss:$36 sps:$4 sm:$0xff]   ;;  %v5712_v21 = vld [vmem:[%s6299_s26 + $0xc] ss:$36 sps:$4 sm:$0xff]   ;;  %v6341_v26 = vld [vmem:[%s7333_s1 + $0xd8] sm:$0xff]  }
  0x15   : > { %v6319_v22 = vld [vmem:[%s7333_s1 + $0xc8] sm:$0xff]   ;;  %2585 = vmatprep.mubr.bf16.mxu1 %v5709_v19  ;;  %2874 = vmatprep.mubr.bf16.mxu0 %v5712_v21  ;;  %v6330_v24 = vld [vmem:[%s7333_s1 + $0xd0] sm:$0xff]   ;;  %v5699_v27 = vld [vmem:[%s7333_s1 + $0x60] sm:$0xff]  }
  0x16   : > { %v6352_v28 = vld [vmem:[%s7333_s1 + $0xe0] sm:$0xff]   ;;  %v5701_v29 = vld [vmem:[%s7333_s1 + $0x68] sm:$0xff]   ;;  %v5703_v31 = vld [vmem:[%s7333_s1 + $0x70] sm:$0xff]  }
  0x17   : > { %2558 = vmatpush1.bf16.msra.mxu1 %v5679_v5  ;;  %2847 = vmatpush1.bf16.msra.mxu0 %v6230_v6  ;;  %v6363_v30 = vld [vmem:[%s7333_s1 + $0xe8] sm:$0xff]   ;;  %v6374_v32 = vld [vmem:[%s7333_s1 + $0xf0] sm:$0xff]   ;;  %v5705_v33 = vld [vmem:[%s7333_s1 + $0x78] sm:$0xff]  }
  0x18   : > { %2559 = vmatprep.subr.bf16.mxu1 %v6172_v1  ;;  %2848 = vmatprep.subr.bf16.mxu0 %v6172_v1  ;;  %v6385_v34 = vld [vmem:[%s7333_s1 + $0xf8] sm:$0xff]   ;;  %v5707_v35 = vld [vmem:[%s6299_s26] ss:$36 sps:$4 sm:$0xff]   ;;  %v5710_v36 = vld [vmem:[%s6299_s26 + $0x8] ss:$36 sps:$4 sm:$0xff]  }
  0x19   : > { %v5713_v37 = vld [vmem:[%s7333_s1 + $0x100] sm:$0xff]   ;;  %v5715_v38 = vld [vmem:[%s6299_s26 + $0x4c] ss:$36 sps:$4 sm:$0xff]   ;;  %v5717_v39 = vld [vmem:[%s6299_s26 + $0x54] ss:$36 sps:$4 sm:$0xff]  }
  0x1a   : > { %v5714_v40 = vld [vmem:[%s7333_s1 + $0x108] sm:$0xff]   ;;  %v5720_v42 = vld [vmem:[%s6299_s26 + $0x50] ss:$36 sps:$4 sm:$0xff]   ;;  %v5725_v45 = vld [vmem:[%s6299_s26 + $0x9c] ss:$36 sps:$4 sm:$0xff]  }
  0x1b   : > { %2560 = vmatpush1.bf16.msra.mxu1 %v5681_v7  ;;  %2849 = vmatpush1.bf16.msra.mxu0 %v6241_v8  ;;  %v5719_v41 = vld [vmem:[%s6299_s26 + $0x48] ss:$36 sps:$4 sm:$0xff]   ;;  %v5723_v43 = vld [vmem:[%s6299_s26 + $0x94] ss:$36 sps:$4 sm:$0xff]   ;;  %v5729_v49 = vld [vmem:[%s7333_s1 + $0x120] sm:$0xff]  }
  0x1c   : > { %2561 = vmatprep.subr.bf16.mxu1 %v6172_v1  ;;  %2850 = vmatprep.subr.bf16.mxu0 %v6172_v1  ;;  %v5721_v44 = vld [vmem:[%s7333_s1 + $0x110] sm:$0xff]   ;;  %v5722_v46 = vld [vmem:[%s7333_s1 + $0x118] sm:$0xff]   ;;  %v5733_v51 = vld [vmem:[%s6299_s26 + $0xe4] ss:$36 sps:$4 sm:$0xff]  }
  0x1d   : > { %v5727_v47 = vld [vmem:[%s6299_s26 + $0x90] ss:$36 sps:$4 sm:$0xff]   ;;  %v5728_v48 = vld [vmem:[%s6299_s26 + $0x98] ss:$36 sps:$4 sm:$0xff]   ;;  %v5730_v52 = vld [vmem:[%s7333_s1 + $0x128] sm:$0xff]  }
  0x1e   : > { %v5731_v50 = vld [vmem:[%s6299_s26 + $0xdc] ss:$36 sps:$4 sm:$0xff]   ;;  %v5739_v55 = vld [vmem:[%s6299_s26 + $0x124] ss:$36 sps:$4 sm:$0xff]   ;;  %v5737_v56 = vld [vmem:[%s7333_s1 + $0x130] sm:$0xff]  }
  0x1f   : > { %2562 = vmatpush1.bf16.msra.mxu1 %v5683_v9  ;;  %2851 = vmatpush1.bf16.msra.mxu0 %v6252_v10  ;;  %v5735_v53 = vld [vmem:[%s6299_s26 + $0xd8] ss:$36 sps:$4 sm:$0xff]   ;;  %v5736_v54 = vld [vmem:[%s6299_s26 + $0xe0] ss:$36 sps:$4 sm:$0xff]   ;;  %v5741_v57 = vld [vmem:[%s6299_s26 + $0x12c] ss:$36 sps:$4 sm:$0xff]  }
  0x20   : > { %2563 = vmatprep.subr.bf16.mxu1 %v6172_v1  ;;  %2852 = vmatprep.subr.bf16.mxu0 %v6172_v1  ;;  %v5738_v58 = vld [vmem:[%s7333_s1 + $0x138] sm:$0xff]   ;;  %v5743_v59 = vld [vmem:[%s6299_s26 + $0x120] ss:$36 sps:$4 sm:$0xff]   ;;  %v5744_v60 = vld [vmem:[%s6299_s26 + $0x128] ss:$36 sps:$4 sm:$0xff]  }
  0x21   : > { %v5745_v61 = vld [vmem:[%s7333_s1 + $0x140] sm:$0xff]   ;;  %v5747_v62 = vld [vmem:[%s6299_s26 + $0x16c] ss:$36 sps:$4 sm:$0xff]   ;;  %v5749_v63 = vld [vmem:[%s6299_s26 + $0x174] ss:$36 sps:$4 sm:$0xff]  }
  0x22   : > { %v5746_v0 = vld [vmem:[%s7333_s1 + $0x148] sm:$0xff]   ;;  %v5752_v3 = vld [vmem:[%s6299_s26 + $0x170] ss:$36 sps:$4 sm:$0xff]   ;;  %v5754_v7 = vld [vmem:[%s7333_s1 + $0x158] sm:$0xff]  }
  0x23   : > { %2564 = vmatpush1.bf16.msra.mxu1 %v5685_v11  ;;  %2853 = vmatpush1.bf16.msra.mxu0 %v6265_v12  ;;  %v5753_v5 = vld [vmem:[%s7333_s1 + $0x150] sm:$0xff]   ;;  %v5760_v9 = vld [vmem:[%s6299_s26 + $0x1b8] ss:$36 sps:$4 sm:$0xff]  }
  0x24   : > { %2565 = vmatprep.subr.bf16.mxu1 %v6172_v1  ;;  %2854 = vmatprep.subr.bf16.mxu0 %v6172_v1  ;;  %v5763_v11 = vld [vmem:[%s6299_s26 + $0x1fc] ss:$36 sps:$4 sm:$0xff]   ;;  %v5773_v21 = vld [vmem:[%s6299_s26 + $0x10] ss:$36 sps:$4 sm:$0xff]  }
  0x25   : > { %v5770_v19 = vld [vmem:[%s7333_s1 + $0x178] sm:$0xff]  }
  0x27   : > { %2566 = vmatpush1.bf16.msra.mxu1 %v5687_v13  ;;  %2855 = vmatpush1.bf16.msra.mxu0 %v6278_v14  ;;  %v5762_v13 = vld [vmem:[%s7333_s1 + $0x168] sm:$0xff]  }
  0x28   : > { %2567 = vmatprep.subr.bf16.mxu1 %v6172_v1  ;;  %2856 = vmatprep.subr.bf16.mxu0 %v6172_v1 }
  0x2b   : > { %2568 = vmatpush1.bf16.msra.mxu1 %v5689_v15  ;;  %2857 = vmatpush1.bf16.msra.mxu0 %v6290_v16  ;;  %v5768_v15 = vld [vmem:[%s6299_s26 + $0x200] ss:$36 sps:$4 sm:$0xff]  }
  0x2c   : > { %2569 = vmatprep.subr.bf16.mxu1 %v6172_v1  ;;  %2858 = vmatprep.subr.bf16.mxu0 %v6172_v1 }
  0x2f   : > { %2570 = vmatpush1.bf16.msra.mxu1 %v5691_v17  ;;  %2859 = vmatpush1.bf16.msra.mxu0 %v6306_v18  ;;  %v5769_v17 = vld [vmem:[%s7333_s1 + $0x170] sm:$0xff]  }
  0x30   : > { %2571 = vmatprep.subr.bf16.mxu1 %v6172_v1  ;;  %2860 = vmatprep.subr.bf16.mxu0 %v6172_v1 }
  0x33   : > { %2572 = vmatpush1.bf16.msra.mxu1 %v5693_v20  ;;  %2861 = vmatpush1.bf16.msra.mxu0 %v6319_v22  ;;  %v5776_v20 = vld [vmem:[%s6299_s26 + $0x240] ss:$36 sps:$4 sm:$0xff]  }
  0x34   : > { %2573 = vmatprep.subr.bf16.mxu1 %v6172_v1  ;;  %2862 = vmatprep.subr.bf16.mxu0 %v6172_v1 }
  0x37   : > { %2574 = vmatpush1.bf16.msra.mxu1 %v5695_v23  ;;  %2863 = vmatpush1.bf16.msra.mxu0 %v6330_v24  ;;  %v5777_v23 = vld [vmem:[%s7333_s1 + $0x180] sm:$0xff]  }
  0x38   : > { %2575 = vmatprep.subr.bf16.mxu1 %v6172_v1  ;;  %2864 = vmatprep.subr.bf16.mxu0 %v6172_v1 }
  0x3b   : > { %2576 = vmatpush1.bf16.msra.mxu1 %v5697_v25  ;;  %2865 = vmatpush1.bf16.msra.mxu0 %v6341_v26  ;;  %v5782_v25 = vld [vmem:[%s6299_s26 + $0x288] ss:$36 sps:$4 sm:$0xff]  }
  0x3c   : > { %2577 = vmatprep.subr.bf16.mxu1 %v6172_v1  ;;  %2866 = vmatprep.subr.bf16.mxu0 %v6172_v1 }
  0x3f   : > { %2578 = vmatpush1.bf16.msra.mxu1 %v5699_v27  ;;  %2867 = vmatpush1.bf16.msra.mxu0 %v6352_v28  ;;  %v5783_v27 = vld [vmem:[%s6299_s26 + $0x58] ss:$36 sps:$4 sm:$0xff]  }
  0x40   : > { %2579 = vmatprep.subr.bf16.mxu1 %v6172_v1  ;;  %2868 = vmatprep.subr.bf16.mxu0 %v6172_v1 }
  0x43   : > { %2580 = vmatpush1.bf16.msra.mxu1 %v5701_v29  ;;  %2869 = vmatpush1.bf16.msra.mxu0 %v6363_v30  ;;  %v5786_v29 = vld [vmem:[%s6299_s26 + $0xa4] ss:$36 sps:$4 sm:$0xff]  }
  0x44   : > { %2581 = vmatprep.subr.bf16.mxu1 %v6172_v1  ;;  %2870 = vmatprep.subr.bf16.mxu0 %v6172_v1 }
  0x47   : > { %2582 = vmatpush1.bf16.msra.mxu1 %v5703_v31  ;;  %2871 = vmatpush1.bf16.msra.mxu0 %v6374_v32  ;;  %v5788_v31 = vld [vmem:[%s6299_s26 + $0x2d0] ss:$36 sps:$4 sm:$0xff]  }
  0x48   : > { %2583 = vmatprep.subr.bf16.mxu1 %v6172_v1  ;;  %2872 = vmatprep.subr.bf16.mxu0 %v6172_v1 }
  0x4b   : > { %2584 = vmatpush1.bf16.msra.mxu1 %v5705_v33  ;;  %2873 = vmatpush1.bf16.msra.mxu0 %v6385_v34  ;;  %v5789_v33 = vld [vmem:[%s6299_s26 + $0xa0] ss:$36 sps:$4 sm:$0xff]  }
  0x4c   : > { %5249 = vmatprep.subr.bf16.mxu1 %v6172_v1  ;;  %3131 = vmatprep.subr.bf16.mxu0 %v6172_v1 }
  0x4e   : > { %2586 = vmatmul.mubr.bf16.vlgmr.msra.gmra.mrb[0].mxu1 %v5707_v35  ;;  %2875 = vmatmul.mubr.bf16.vlgmr.msra.gmra.mrb[0].mxu0 %v5710_v36  ;;  %v5793_v35 = vld [vmem:[%s6299_s26 + $0xec] ss:$36 sps:$4 sm:$0xff]   ;;  %v5829_v36 = vld [vmem:[%s7333_s1 + $0x1a0] sm:$0xff]  }
  0x4f   : > { %5265 = vmatpush1.bf16.msra.mxu1 %v6209_v2  ;;  %3132 = vmatpush1.bf16.msra.mxu0 %v5713_v37  ;;  %v5751_v2 = vld [vmem:[%s6299_s26 + $0x168] ss:$36 sps:$4 sm:$0xff]  }
  0x50   : > { %2593 = vmatprep.mubr.bf16.mxu1 %v5715_v38  ;;  %3133 = vmatprep.subr.bf16.mxu0 %v6172_v1  ;;  %v5842_v37 = vld [vmem:[%s7333_s1 + $0x1a8] sm:$0xff]   ;;  %v5795_v38 = vld [vmem:[%s6299_s26 + $0x318] ss:$36 sps:$4 sm:$0xff]  }
  0x51   : > { %2882 = vmatprep.mubr.bf16.mxu0 %v5717_v39  ;;  %5250 = vmatprep.subr.bf16.mxu1 %v6172_v1  ;;  %v5796_v39 = vld [vmem:[%s6299_s26 + $0xe8] ss:$36 sps:$4 sm:$0xff]  }
  0x53   : > { %5266 = vmatpush1.bf16.msra.mxu1 %v6219_v4  ;;  %3134 = vmatpush1.bf16.msra.mxu0 %v5714_v40  ;;  %v5755_v4 = vld [vmem:[%s6299_s26 + $0x1b4] ss:$36 sps:$4 sm:$0xff]   ;;  %v5797_v40 = vld [vmem:[%s6299_s26 + $0x364] ss:$36 sps:$4 sm:$0xff]  }
  0x54   : > { %5251 = vmatprep.subr.bf16.mxu1 %v6172_v1  ;;  %3135 = vmatprep.subr.bf16.mxu0 %v6172_v1 }
  0x56   : > { %2594 = vmatmul.mubr.bf16.gmra.mrb[4].mxu1 %v5719_v41  ;;  %2883 = vmatmul.mubr.bf16.gmra.mrb[4].mxu0 %v5720_v42  ;;  %v5799_v41 = vld [vmem:[%s6299_s26 + $0x134] ss:$36 sps:$4 sm:$0xff]  }
  0x57   : > { %2601 = vmatprep.mubr.bf16.mxu1 %v5723_v43  ;;  %3136 = vmatpush1.bf16.msra.mxu0 %v5721_v44  ;;  %v5855_v42 = vld [vmem:[%s7333_s1 + $0x1b0] sm:$0xff]   ;;  %v5868_v43 = vld [vmem:[%s7333_s1 + $0x1b8] sm:$0xff]   ;;  %v5801_v44 = vld [vmem:[%s6299_s26 + $0x360] ss:$36 sps:$4 sm:$0xff]  }
  0x58   : > { %2890 = vmatprep.mubr.bf16.mxu0 %v5725_v45  ;;  %3137 = vmatprep.subr.bf16.mxu0 %v6172_v1  ;;  %v5802_v45 = vld [vmem:[%s6299_s26 + $0x130] ss:$36 sps:$4 sm:$0xff]  }
  0x59   : > { %5267 = vmatpush1.bf16.msra.mxu1 %v6230_v6  ;;  %v5757_v6 = vld [vmem:[%s6299_s26 + $0x1bc] ss:$36 sps:$4 sm:$0xff]  }
  0x5a   : > { %5252 = vmatprep.subr.bf16.mxu1 %v6172_v1 }
  0x5b   : > { %3138 = vmatpush1.bf16.msra.mxu0 %v5722_v46  ;;  %v5804_v46 = vld [vmem:[%s6299_s26 + $0x3ac] ss:$36 sps:$4 sm:$0xff]  }
  0x5c   : > { %3139 = vmatprep.subr.bf16.mxu0 %v6172_v1 }
  0x5d   : > { %5268 = vmatpush1.bf16.msra.mxu1 %v6241_v8  ;;  %v5759_v8 = vld [vmem:[%s6299_s26 + $0x1b0] ss:$36 sps:$4 sm:$0xff]  }
  0x5e   : > { %2602 = vmatmul.mubr.bf16.gmra.mrb[8].mxu1 %v5727_v47  ;;  %5253 = vmatprep.subr.bf16.mxu1 %v6172_v1  ;;  %v5806_v47 = vld [vmem:[%s6299_s26 + $0x17c] ss:$36 sps:$4 sm:$0xff]  }
  0x5f   : > { %2891 = vmatmul.mubr.bf16.gmra.mrb[8].mxu0 %v5728_v48  ;;  %2609 = vmatprep.mubr.bf16.mxu1 %v5731_v50  ;;  %v5881_v48 = vld [vmem:[%s7333_s1 + $0x1c0] sm:$0xff]   ;;  %v5808_v50 = vld [vmem:[%s6299_s26 + $0x3a8] ss:$36 sps:$4 sm:$0xff]  }
  0x60   : > { %3140 = vmatpush1.bf16.msra.mxu0 %v5729_v49  ;;  %2898 = vmatprep.mubr.bf16.mxu0 %v5733_v51  ;;  %v5894_v49 = vld [vmem:[%s7333_s1 + $0x1c8] sm:$0xff]   ;;  %v5809_v51 = vld [vmem:[%s6299_s26 + $0x178] ss:$36 sps:$4 sm:$0xff]  }
  0x61   : > { %3141 = vmatprep.subr.bf16.mxu0 %v6172_v1  ;;  %5269 = vmatpush1.bf16.msra.mxu1 %v6252_v10  ;;  %v5761_v10 = vld [vmem:[%s7333_s1 + $0x160] sm:$0xff]  }
  0x62   : > { %5254 = vmatprep.subr.bf16.mxu1 %v6172_v1 }
  0x64   : > { %3142 = vmatpush1.bf16.msra.mxu0 %v5730_v52  ;;  %v5810_v52 = vld [vmem:[%s6299_s26 + $0x3f4] ss:$36 sps:$4 sm:$0xff]  }
  0x65   : > { %3143 = vmatprep.subr.bf16.mxu0 %v6172_v1  ;;  %5270 = vmatpush1.bf16.msra.mxu1 %v6265_v12  ;;  %v5765_v12 = vld [vmem:[%s6299_s26 + $0x204] ss:$36 sps:$4 sm:$0xff]  }
  0x66   : > { %2610 = vmatmul.mubr.bf16.gmra.mrb[12].mxu1 %v5735_v53  ;;  %5255 = vmatprep.subr.bf16.mxu1 %v6172_v1  ;;  %v5812_v53 = vld [vmem:[%s6299_s26 + $0x1c4] ss:$36 sps:$4 sm:$0xff]  }
  0x67   : > { %2899 = vmatmul.mubr.bf16.gmra.mrb[12].mxu0 %v5736_v54  ;;  %2617 = vmatprep.mubr.bf16.mxu1 %v5739_v55  ;;  %v5907_v54 = vld [vmem:[%s7333_s1 + $0x1d0] sm:$0xff]  }
  0x68   : > { %3144 = vmatpush1.bf16.msra.mxu0 %v5737_v56  ;;  %2906 = vmatprep.mubr.bf16.mxu0 %v5741_v57  ;;  %v5814_v55 = vld [vmem:[%s6299_s26 + $0x3f0] ss:$36 sps:$4 sm:$0xff]   ;;  %v5815_v56 = vld [vmem:[%s6299_s26 + $0x1c0] ss:$36 sps:$4 sm:$0xff]  }
  0x69   : > { %3145 = vmatprep.subr.bf16.mxu0 %v6172_v1  ;;  %5271 = vmatpush1.bf16.msra.mxu1 %v6278_v14  ;;  %v5767_v14 = vld [vmem:[%s6299_s26 + $0x1f8] ss:$36 sps:$4 sm:$0xff]  }
  0x6a   : > { %5256 = vmatprep.subr.bf16.mxu1 %v6172_v1  ;;  %v5817_v57 = vld [vmem:[%s6299_s26 + $0x43c] ss:$36 sps:$4 sm:$0xff]  }
  0x6c   : > { %3146 = vmatpush1.bf16.msra.mxu0 %v5738_v58  ;;  %v5819_v58 = vld [vmem:[%s6299_s26 + $0x20c] ss:$36 sps:$4 sm:$0xff]  }
  0x6d   : > { %3147 = vmatprep.subr.bf16.mxu0 %v6172_v1  ;;  %5272 = vmatpush1.bf16.msra.mxu1 %v6290_v16  ;;  %v5771_v16 = vld [vmem:[%s6299_s26 + $0x244] ss:$36 sps:$4 sm:$0xff]  }
  0x6e   : > { %2618 = vmatmul.mubr.bf16.gmra.mrb[16].mxu1 %v5743_v59  ;;  %5257 = vmatprep.subr.bf16.mxu1 %v6172_v1  ;;  %v5920_v59 = vld [vmem:[%s7333_s1 + $0x1d8] sm:$0xff]  }
  0x6f   : > { %2907 = vmatmul.mubr.bf16.gmra.mrb[16].mxu0 %v5744_v60  ;;  %2625 = vmatprep.mubr.bf16.mxu1 %v5747_v62  ;;  %v5821_v60 = vld [vmem:[%s6299_s26 + $0x438] ss:$36 sps:$4 sm:$0xff]   ;;  %v5823_v62 = vld [vmem:[%s6299_s26 + $0x484] ss:$36 sps:$4 sm:$0xff]  }
  0x70   : > { %3148 = vmatpush1.bf16.msra.mxu0 %v5745_v61  ;;  %2914 = vmatprep.mubr.bf16.mxu0 %v5749_v63  ;;  %v5822_v61 = vld [vmem:[%s6299_s26 + $0x208] ss:$36 sps:$4 sm:$0xff]   ;;  %v5825_v63 = vld [vmem:[%s6299_s26 + $0x254] ss:$36 sps:$4 sm:$0xff]  }
  0x71   : > { %3149 = vmatprep.subr.bf16.mxu0 %v6172_v1  ;;  %5273 = vmatpush1.bf16.msra.mxu1 %v6306_v18  ;;  %v5775_v18 = vld [vmem:[%s6299_s26 + $0x14] ss:$36 sps:$4 sm:$0xff]  }
  0x72   : > { %5258 = vmatprep.subr.bf16.mxu1 %v6172_v1 }
  0x74   : > { %3150 = vmatpush1.bf16.msra.mxu0 %v5746_v0  ;;  %v5827_v0 = vld [vmem:[%s6299_s26 + $0x480] ss:$36 sps:$4 sm:$0xff]  }
  0x75   : > { %3151 = vmatprep.subr.bf16.mxu0 %v6172_v1  ;;  %5274 = vmatpush1.bf16.msra.mxu1 %v6319_v22  ;;  %v5778_v22 = vld [vmem:[%s6299_s26 + $0x28c] ss:$36 sps:$4 sm:$0xff]  }
  0x76   : > { %2626 = vmatmul.mubr.bf16.gmra.mrb[20].mxu1 %v5751_v2  ;;  %5259 = vmatprep.subr.bf16.mxu1 %v6172_v1  ;;  %v5828_v2 = vld [vmem:[%s6299_s26 + $0x250] ss:$36 sps:$4 sm:$0xff]  }
  0x77   : > { %2915 = vmatmul.mubr.bf16.gmra.mrb[20].mxu0 %v5752_v3  ;;  %2633 = vmatprep.mubr.bf16.mxu1 %v5755_v4  ;;  %v5830_v3 = vld [vmem:[%s6299_s26 + $0x4cc] ss:$36 sps:$4 sm:$0xff]   ;;  %v5832_v4 = vld [vmem:[%s6299_s26 + $0x29c] ss:$36 sps:$4 sm:$0xff]  }
  0x78   : > { %3152 = vmatpush1.bf16.msra.mxu0 %v5753_v5  ;;  %2922 = vmatprep.mubr.bf16.mxu0 %v5757_v6  ;;  %v5933_v5 = vld [vmem:[%s7333_s1 + $0x1e0] sm:$0xff]  }
  0x79   : > { %3153 = vmatprep.subr.bf16.mxu0 %v6172_v1  ;;  %5275 = vmatpush1.bf16.msra.mxu1 %v6330_v24  ;;  %v5780_v24 = vld [vmem:[%s6299_s26 + $0x5c] ss:$36 sps:$4 sm:$0xff]  }
  0x7a   : > { %5260 = vmatprep.subr.bf16.mxu1 %v6172_v1  ;;  %v6608_v6 = vld [vmem:[%s7333_s1 + $0x200] sm:$0xff]  }
  0x7c   : > { %3154 = vmatpush1.bf16.msra.mxu0 %v5754_v7  ;;  %v5834_v7 = vld [vmem:[%s6299_s26 + $0x4c8] ss:$36 sps:$4 sm:$0xff]  }
  0x7d   : > { %3155 = vmatprep.subr.bf16.mxu0 %v6172_v1  ;;  %5276 = vmatpush1.bf16.msra.mxu1 %v6341_v26  ;;  %v5790_v26 = vld [vmem:[%s7333_s1 + $0x188] sm:$0xff]  }
  0x7e   : > { %2634 = vmatmul.mubr.bf16.gmra.mrb[24].mxu1 %v5759_v8  ;;  %5261 = vmatprep.subr.bf16.mxu1 %v6172_v1  ;;  %v5835_v8 = vld [vmem:[%s6299_s26 + $0x298] ss:$36 sps:$4 sm:$0xff]  }
  0x7f   : > { %2923 = vmatmul.mubr.bf16.gmra.mrb[24].mxu0 %v5760_v9  ;;  %2641 = vmatprep.mubr.bf16.mxu1 %v5763_v11  ;;  %v5836_v9 = vld [vmem:[%s6299_s26 + $0x514] ss:$36 sps:$4 sm:$0xff]  }
  0x80   : > { %3156 = vmatpush1.bf16.msra.mxu0 %v5761_v10  ;;  %2930 = vmatprep.mubr.bf16.mxu0 %v5765_v12  ;;  %v5838_v10 = vld [vmem:[%s6299_s26 + $0x2e4] ss:$36 sps:$4 sm:$0xff]   ;;  %v5840_v11 = vld [vmem:[%s6299_s26 + $0x510] ss:$36 sps:$4 sm:$0xff]  }
  0x81   : > { %3157 = vmatprep.subr.bf16.mxu0 %v6172_v1  ;;  %5277 = vmatpush1.bf16.msra.mxu1 %v6352_v28  ;;  %v5784_v28 = vld [vmem:[%s6299_s26 + $0x2d4] ss:$36 sps:$4 sm:$0xff]   ;;  %v5841_v12 = vld [vmem:[%s6299_s26 + $0x2e0] ss:$36 sps:$4 sm:$0xff]  }
  0x82   : > { %5262 = vmatprep.subr.bf16.mxu1 %v6172_v1 }
  0x84   : > { %3158 = vmatpush1.bf16.msra.mxu0 %v5762_v13  ;;  %v5843_v13 = vld [vmem:[%s6299_s26 + $0x55c] ss:$36 sps:$4 sm:$0xff]  }
  0x85   : > { %3159 = vmatprep.subr.bf16.mxu0 %v6172_v1  ;;  %5278 = vmatpush1.bf16.msra.mxu1 %v6363_v30  ;;  %v5803_v30 = vld [vmem:[%s7333_s1 + $0x190] sm:$0xff]  }
  0x86   : > { %2642 = vmatmul.mubr.bf16.gmra.mrb[28].mxu1 %v5767_v14  ;;  %5263 = vmatprep.subr.bf16.mxu1 %v6172_v1  ;;  %v5845_v14 = vld [vmem:[%s6299_s26 + $0x32c] ss:$36 sps:$4 sm:$0xff]  }
  0x87   : > { %2931 = vmatmul.mubr.bf16.gmra.mrb[28].mxu0 %v5768_v15  ;;  %2649 = vmatprep.mubr.bf16.mxu1 %v5771_v16  ;;  %v5947_v15 = vld [vmem:[%s7333_s1 + $0x1e8] sm:$0xff]   ;;  %v5847_v16 = vld [vmem:[%s6299_s26 + $0x558] ss:$36 sps:$4 sm:$0xff]  }
  0x88   : > { %3160 = vmatpush1.bf16.msra.mxu0 %v5769_v17  ;;  %3163 = vmatprep.mubr.bf16.mxu0 %v5775_v18  ;;  %v5848_v17 = vld [vmem:[%s6299_s26 + $0x328] ss:$36 sps:$4 sm:$0xff]  }
  0x89   : > { %3161 = vmatprep.subr.bf16.mxu0 %v6172_v1  ;;  %5279 = vmatpush1.bf16.msra.mxu1 %v6374_v32  ;;  %v5816_v32 = vld [vmem:[%s7333_s1 + $0x198] sm:$0xff]   ;;  %v5849_v18 = vld [vmem:[%s6299_s26 + $0x5a4] ss:$36 sps:$4 sm:$0xff]  }
  0x8a   : > { %5264 = vmatprep.subr.bf16.mxu1 %v6172_v1 }
  0x8c   : > { %3162 = vmatpush1.bf16.msra.mxu0 %v5770_v19  ;;  %v5851_v19 = vld [vmem:[%s6299_s26 + $0x374] ss:$36 sps:$4 sm:$0xff]  }
  0x8d   : > { %3420 = vmatprep.subr.bf16.mxu0 %v6172_v1  ;;  %5280 = vmatpush1.bf16.msra.mxu1 %v6385_v34  ;;  %v5791_v34 = vld [vmem:[%s6299_s26 + $0x31c] ss:$36 sps:$4 sm:$0xff]  }
  0x8e   : > { %2650 = vmatmul.mubr.bf16.gmra.mrb[32].mxu1 %v5776_v20  ;;  %5169 = vmatprep.subr.bf16.mxu1 %v6608_v6  ;;  %v5853_v20 = vld [vmem:[%s6299_s26 + $0x5a0] ss:$36 sps:$4 sm:$0xff]  }
  0x8f   : > { %3164 = vmatmul.mubr.bf16.vlgmr.msra.gmra.mrb[0].mxu0 %v5773_v21  ;;  %2657 = vmatprep.mubr.bf16.mxu1 %v5778_v22  ;;  %v5854_v21 = vld [vmem:[%s6299_s26 + $0x370] ss:$36 sps:$4 sm:$0xff]  }
  0x90   : > { %3421 = vmatpush1.bf16.msra.mxu0 %v5777_v23  ;;  %3171 = vmatprep.mubr.bf16.mxu0 %v5780_v24  ;;  %v5856_v22 = vld [vmem:[%s6299_s26 + $0x5ec] ss:$36 sps:$4 sm:$0xff]   ;;  %v5858_v23 = vld [vmem:[%s6299_s26 + $0x3bc] ss:$36 sps:$4 sm:$0xff]  }
  0x91   : > { %3422 = vmatprep.subr.bf16.mxu0 %v6172_v1  ;;  %v5961_v24 = vld [vmem:[%s7333_s1 + $0x1f0] sm:$0xff]  }
  0x94   : > { %3423 = vmatpush1.bf16.msra.mxu0 %v5790_v26  ;;  %v5861_v26 = vld [vmem:[%s6299_s26 + $0x3b8] ss:$36 sps:$4 sm:$0xff]  }
  0x95   : > { %3424 = vmatprep.subr.bf16.mxu0 %v6172_v1 }
  0x96   : > { %2658 = vmatmul.mubr.bf16.gmra.mrb[36].mxu1 %v5782_v25  ;;  %v5860_v25 = vld [vmem:[%s6299_s26 + $0x5e8] ss:$36 sps:$4 sm:$0xff]  }
  0x97   : > { %3172 = vmatmul.mubr.bf16.gmra.mrb[4].mxu0 %v5783_v27  ;;  %2665 = vmatprep.mubr.bf16.mxu1 %v5784_v28  ;;  %v5862_v27 = vld [vmem:[%s6299_s26 + $0x634] ss:$36 sps:$4 sm:$0xff]   ;;  %v5864_v28 = vld [vmem:[%s6299_s26 + $0x404] ss:$36 sps:$4 sm:$0xff]  }
  0x98   : > { %3179 = vmatprep.mubr.bf16.mxu0 %v5786_v29  ;;  %3425 = vmatpush1.bf16.msra.mxu0 %v5803_v30  ;;  %v5866_v29 = vld [vmem:[%s6299_s26 + $0x630] ss:$36 sps:$4 sm:$0xff]   ;;  %v5867_v30 = vld [vmem:[%s6299_s26 + $0x400] ss:$36 sps:$4 sm:$0xff]  }
  0x99   : > { %3426 = vmatprep.subr.bf16.mxu0 %v6172_v1 }
  0x9c   : > { %3427 = vmatpush1.bf16.msra.mxu0 %v5816_v32  ;;  %v5871_v32 = vld [vmem:[%s6299_s26 + $0x44c] ss:$36 sps:$4 sm:$0xff]  }
  0x9d   : > { %3428 = vmatprep.subr.bf16.mxu0 %v6172_v1 }
  0x9e   : > { %2666 = vmatmul.mubr.bf16.gmra.mrb[40].mxu1 %v5788_v31  ;;  %v5869_v31 = vld [vmem:[%s6299_s26 + $0x67c] ss:$36 sps:$4 sm:$0xff]  }
  0x9f   : > { %3180 = vmatmul.mubr.bf16.gmra.mrb[8].mxu0 %v5789_v33  ;;  %2673 = vmatprep.mubr.bf16.mxu1 %v5791_v34  ;;  %v5873_v33 = vld [vmem:[%s6299_s26 + $0x678] ss:$36 sps:$4 sm:$0xff]   ;;  %v5874_v34 = vld [vmem:[%s6299_s26 + $0x448] ss:$36 sps:$4 sm:$0xff]  }
  0xa0   : > { %3187 = vmatprep.mubr.bf16.mxu0 %v5793_v35  ;;  %3429 = vmatpush1.bf16.msra.mxu0 %v5829_v36  ;;  %v5875_v35 = vld [vmem:[%s6299_s26 + $0x6c4] ss:$36 sps:$4 sm:$0xff]   ;;  %v5877_v36 = vld [vmem:[%s6299_s26 + $0x494] ss:$36 sps:$4 sm:$0xff]  }
  0xa1   : > { %3430 = vmatprep.subr.bf16.mxu0 %v6172_v1 }
  0xa4   : > { %3431 = vmatpush1.bf16.msra.mxu0 %v5842_v37  ;;  %v5879_v37 = vld [vmem:[%s6299_s26 + $0x6c0] ss:$36 sps:$4 sm:$0xff]  }
  0xa5   : > { %3432 = vmatprep.subr.bf16.mxu0 %v6172_v1 }
  0xa6   : > { %2674 = vmatmul.mubr.bf16.gmra.mrb[44].mxu1 %v5795_v38  ;;  %v5880_v38 = vld [vmem:[%s6299_s26 + $0x490] ss:$36 sps:$4 sm:$0xff]  }
  0xa7   : > { %3188 = vmatmul.mubr.bf16.gmra.mrb[12].mxu0 %v5796_v39  ;;  %2681 = vmatprep.mubr.bf16.mxu1 %v5797_v40  ;;  %v5882_v39 = vld [vmem:[%s6299_s26 + $0x70c] ss:$36 sps:$4 sm:$0xff]   ;;  %v5884_v40 = vld [vmem:[%s6299_s26 + $0x4dc] ss:$36 sps:$4 sm:$0xff]  }
  0xa8   : > { %3195 = vmatprep.mubr.bf16.mxu0 %v5799_v41  ;;  %3433 = vmatpush1.bf16.msra.mxu0 %v5855_v42  ;;  %v5886_v41 = vld [vmem:[%s6299_s26 + $0x708] ss:$36 sps:$4 sm:$0xff]   ;;  %v5887_v42 = vld [vmem:[%s6299_s26 + $0x4d8] ss:$36 sps:$4 sm:$0xff]  }
  0xa9   : > { %3434 = vmatprep.subr.bf16.mxu0 %v6172_v1 }
  0xac   : > { %3435 = vmatpush1.bf16.msra.mxu0 %v5868_v43  ;;  %v5888_v43 = vld [vmem:[%s6299_s26 + $0x754] ss:$36 sps:$4 sm:$0xff]  }
  0xad   : > { %3436 = vmatprep.subr.bf16.mxu0 %v6172_v1 }
  0xae   : > { %2682 = vmatmul.mubr.bf16.gmra.mrb[48].mxu1 %v5801_v44  ;;  %v5890_v44 = vld [vmem:[%s6299_s26 + $0x524] ss:$36 sps:$4 sm:$0xff]  }
  0xaf   : > { %3196 = vmatmul.mubr.bf16.gmra.mrb[16].mxu0 %v5802_v45  ;;  %2689 = vmatprep.mubr.bf16.mxu1 %v5804_v46  ;;  %v5892_v45 = vld [vmem:[%s6299_s26 + $0x750] ss:$36 sps:$4 sm:$0xff]   ;;  %v5893_v46 = vld [vmem:[%s6299_s26 + $0x520] ss:$36 sps:$4 sm:$0xff]  }
  0xb0   : > { %3203 = vmatprep.mubr.bf16.mxu0 %v5806_v47  ;;  %3437 = vmatpush1.bf16.msra.mxu0 %v5881_v48  ;;  %v5895_v47 = vld [vmem:[%s6299_s26 + $0x79c] ss:$36 sps:$4 sm:$0xff]   ;;  %v5897_v48 = vld [vmem:[%s6299_s26 + $0x56c] ss:$36 sps:$4 sm:$0xff]  }
  0xb1   : > { %3438 = vmatprep.subr.bf16.mxu0 %v6172_v1 }
  0xb4   : > { %3439 = vmatpush1.bf16.msra.mxu0 %v5894_v49 }
  0xb5   : > { %3440 = vmatprep.subr.bf16.mxu0 %v6172_v1 }
  0xb6   : > { %2690 = vmatmul.mubr.bf16.gmra.mrb[52].mxu1 %v5808_v50 }
  0xb7   : > { %3204 = vmatmul.mubr.bf16.gmra.mrb[20].mxu0 %v5809_v51  ;;  %2697 = vmatprep.mubr.bf16.mxu1 %v5810_v52  ;;  %v5899_v51 = vld [vmem:[%s6299_s26 + $0x798] ss:$36 sps:$4 sm:$0xff]  }
  0xb8   : > { %3211 = vmatprep.mubr.bf16.mxu0 %v5812_v53  ;;  %3441 = vmatpush1.bf16.msra.mxu0 %v5907_v54  ;;  %v5900_v53 = vld [vmem:[%s6299_s26 + $0x568] ss:$36 sps:$4 sm:$0xff]  }
  0xb9   : > { %3442 = vmatprep.subr.bf16.mxu0 %v6172_v1  ;;  %v5901_v54 = vld [vmem:[%s6299_s26 + $0x7e4] ss:$36 sps:$4 sm:$0xff]  }
  0xbc   : > { %3443 = vmatpush1.bf16.msra.mxu0 %v5920_v59  ;;  %v5905_v59 = vld [vmem:[%s6299_s26 + $0x7e0] ss:$36 sps:$4 sm:$0xff]  }
  0xbd   : > { %3444 = vmatprep.subr.bf16.mxu0 %v6172_v1 }
  0xbe   : > { %2698 = vmatmul.mubr.bf16.gmra.mrb[56].mxu1 %v5814_v55 }
  0xbf   : > { %3212 = vmatmul.mubr.bf16.gmra.mrb[24].mxu0 %v5815_v56  ;;  %2705 = vmatprep.mubr.bf16.mxu1 %v5817_v57  ;;  %v5903_v56 = vld [vmem:[%s6299_s26 + $0x5b4] ss:$36 sps:$4 sm:$0xff]  }
  0xc0   : > { %3219 = vmatprep.mubr.bf16.mxu0 %v5819_v58  ;;  %3445 = vmatpush1.bf16.msra.mxu0 %v5933_v5 }
  0xc1   : > { %3446 = vmatprep.subr.bf16.mxu0 %v6172_v1 }
  0xc4   : > { %3447 = vmatpush1.bf16.msra.mxu0 %v5947_v15  ;;  %v5919_v15 = vld [vmem:[%s6299_s26 + $0x640] ss:$36 sps:$4 sm:$0xff]  }
  0xc5   : > { %3448 = vmatprep.subr.bf16.mxu0 %v6172_v1 }
  0xc6   : > { %2706 = vmatmul.mubr.bf16.gmra.mrb[60].mxu1 %v5821_v60 }
  0xc7   : > { %3220 = vmatmul.mubr.bf16.gmra.mrb[28].mxu0 %v5822_v61  ;;  %2713 = vmatprep.mubr.bf16.mxu1 %v5823_v62  ;;  %v5906_v61 = vld [vmem:[%s6299_s26 + $0x5b0] ss:$36 sps:$4 sm:$0xff]  }
  0xc8   : > { %3227 = vmatprep.mubr.bf16.mxu0 %v5825_v63  ;;  %3449 = vmatpush1.bf16.msra.mxu0 %v5961_v24  ;;  %v5908_v62 = vld [vmem:[%s6299_s26 + $0x82c] ss:$36 sps:$4 sm:$0xff]  }
  0xc9   : > { %3450 = vmatprep.subr.bf16.mxu0 %v6172_v1  ;;  %v5974_v1 = vld [vmem:[%s7333_s1 + $0x1f8] sm:$0xff]   ;;  %v5929_v24 = vld [vmem:[%s6299_s26 + $0x24c] ss:$36 sps:$4 sm:$0xff]  }
  0xcc   : > { %3451 = vmatpush1.bf16.msra.mxu0 %v5974_v1  ;;  %v5935_v1 = vld [vmem:[%s6299_s26 + $0x294] ss:$36 sps:$4 sm:$0xff]  }
  0xce   : > { %2714 = vmatmul.mubr.bf16.gmra.mrb[64].mxu1 %v5827_v0  ;;  %v5910_v0 = vld [vmem:[%s6299_s26 + $0x5fc] ss:$36 sps:$4 sm:$0xff]  }
  0xcf   : > { %3228 = vmatmul.mubr.bf16.gmra.mrb[32].mxu0 %v5828_v2  ;;  %2721 = vmatprep.mubr.bf16.mxu1 %v5830_v3 }
  0xd0   : > { %3235 = vmatprep.mubr.bf16.mxu0 %v5832_v4  ;;  %v5912_v4 = vld [vmem:[%s6299_s26 + $0x828] ss:$36 sps:$4 sm:$0xff]  }
  0xd6   : > { %2722 = vmatmul.mubr.bf16.gmra.mrb[68].mxu1 %v5834_v7  ;;  %v5913_v7 = vld [vmem:[%s6299_s26 + $0x5f8] ss:$36 sps:$4 sm:$0xff]  }
  0xd7   : > { %3236 = vmatmul.mubr.bf16.gmra.mrb[36].mxu0 %v5835_v8  ;;  %2729 = vmatprep.mubr.bf16.mxu1 %v5836_v9  ;;  %v5914_v8 = vld [vmem:[%s6299_s26 + $0x874] ss:$36 sps:$4 sm:$0xff]  }
  0xd8   : > { %3243 = vmatprep.mubr.bf16.mxu0 %v5838_v10  ;;  %v5916_v10 = vld [vmem:[%s6299_s26 + $0x644] ss:$36 sps:$4 sm:$0xff]  }
  0xde   : > { %2730 = vmatmul.mubr.bf16.gmra.mrb[72].mxu1 %v5840_v11 }
  0xdf   : > { %3244 = vmatmul.mubr.bf16.gmra.mrb[40].mxu0 %v5841_v12  ;;  %2737 = vmatprep.mubr.bf16.mxu1 %v5843_v13  ;;  %v5918_v13 = vld [vmem:[%s6299_s26 + $0x870] ss:$36 sps:$4 sm:$0xff]  }
  0xe0   : > { %3251 = vmatprep.mubr.bf16.mxu0 %v5845_v14 }
  0xe6   : > { %2738 = vmatmul.mubr.bf16.gmra.mrb[76].mxu1 %v5847_v16  ;;  %v5921_v16 = vld [vmem:[%s6299_s26 + $0x8bc] ss:$36 sps:$4 sm:$0xff]  }
  0xe7   : > { %3252 = vmatmul.mubr.bf16.gmra.mrb[44].mxu0 %v5848_v17  ;;  %2745 = vmatprep.mubr.bf16.mxu1 %v5849_v18  ;;  %v5923_v18 = vld [vmem:[%s6299_s26 + $0x68c] ss:$36 sps:$4 sm:$0xff]  }
  0xe8   : > { %3259 = vmatprep.mubr.bf16.mxu0 %v5851_v19 }
  0xee   : > { %2746 = vmatmul.mubr.bf16.gmra.mrb[80].mxu1 %v5853_v20 }
  0xef   : > { %3260 = vmatmul.mubr.bf16.gmra.mrb[48].mxu0 %v5854_v21  ;;  %2753 = vmatprep.mubr.bf16.mxu1 %v5856_v22  ;;  %v5925_v21 = vld [vmem:[%s6299_s26 + $0x8b8] ss:$36 sps:$4 sm:$0xff]  }
  0xf0   : > { %3267 = vmatprep.mubr.bf16.mxu0 %v5858_v23  ;;  %v5926_v23 = vld [vmem:[%s6299_s26 + $0x688] ss:$36 sps:$4 sm:$0xff]  }
  0xf6   : > { %2754 = vmatmul.mubr.bf16.gmra.mrb[84].mxu1 %v5860_v25 }
  0xf7   : > { %3268 = vmatmul.mubr.bf16.gmra.mrb[52].mxu0 %v5861_v26  ;;  %2761 = vmatprep.mubr.bf16.mxu1 %v5862_v27  ;;  %v5930_v26 = vld [vmem:[%s6299_s26 + $0x6d4] ss:$36 sps:$4 sm:$0xff]  }
  0xf8   : > { %3275 = vmatprep.mubr.bf16.mxu0 %v5864_v28 }
  0xfe   : > { %2762 = vmatmul.mubr.bf16.gmra.mrb[88].mxu1 %v5866_v29  ;;  %v5927_v29 = vld [vmem:[%s6299_s26 + $0x248] ss:$36 sps:$4 sm:$0xff]  }
  0xff   : > { %3276 = vmatmul.mubr.bf16.gmra.mrb[56].mxu0 %v5867_v30  ;;  %2769 = vmatprep.mubr.bf16.mxu1 %v5869_v31  ;;  %v5932_v31 = vld [vmem:[%s6299_s26 + $0x6d0] ss:$36 sps:$4 sm:$0xff]  }
 0x100   : > { %3283 = vmatprep.mubr.bf16.mxu0 %v5871_v32 }
 0x106   : > { %2770 = vmatmul.mubr.bf16.gmra.mrb[92].mxu1 %v5873_v33  ;;  %v5937_v33 = vld [vmem:[%s6299_s26 + $0x71c] ss:$36 sps:$4 sm:$0xff]  }
 0x107   : > { %3284 = vmatmul.mubr.bf16.gmra.mrb[60].mxu0 %v5874_v34  ;;  %2777 = vmatprep.mubr.bf16.mxu1 %v5875_v35  ;;  %v5954_v34 = vld [vmem:[%s7333_s1 + $0x208] sm:$0xff]   ;;  %v5975_v35 = vld [vmem:[%s7333_s1 + $0x210] sm:$0xff]  }
 0x108   : > { %3291 = vmatprep.mubr.bf16.mxu0 %v5877_v36 }
 0x10e   : > { %2778 = vmatmul.mubr.bf16.gmra.mrb[96].mxu1 %v5879_v37 }
 0x10f   : > { %3292 = vmatmul.mubr.bf16.gmra.mrb[64].mxu0 %v5880_v38  ;;  %2785 = vmatprep.mubr.bf16.mxu1 %v5882_v39  ;;  %v5939_v38 = vld [vmem:[%s6299_s26 + $0x290] ss:$36 sps:$4 sm:$0xff]  }
 0x110   : > { %3299 = vmatprep.mubr.bf16.mxu0 %v5884_v40  ;;  %v5940_v40 = vld [vmem:[%s6299_s26 + $0x718] ss:$36 sps:$4 sm:$0xff]  }
 0x116   : > { %2786 = vmatmul.mubr.bf16.gmra.mrb[100].mxu1 %v5886_v41  ;;  %v5941_v41 = vld [vmem:[%s6299_s26 + $0x2dc] ss:$36 sps:$4 sm:$0xff]  }
 0x117   : > { %3300 = vmatmul.mubr.bf16.gmra.mrb[68].mxu0 %v5887_v42  ;;  %2793 = vmatprep.mubr.bf16.mxu1 %v5888_v43  ;;  %v5994_v43 = vld [vmem:[%s7333_s1 + $0x218] sm:$0xff]  }
 0x118   : > { %3307 = vmatprep.mubr.bf16.mxu0 %v5890_v44 }
 0x11e   : > { %2794 = vmatmul.mubr.bf16.gmra.mrb[104].mxu1 %v5892_v45  ;;  %v6013_v45 = vld [vmem:[%s7333_s1 + $0x220] sm:$0xff]  }
 0x11f   : > { %3308 = vmatmul.mubr.bf16.gmra.mrb[72].mxu0 %v5893_v46  ;;  %2801 = vmatprep.mubr.bf16.mxu1 %v5895_v47  ;;  %v5945_v47 = vld [vmem:[%s6299_s26 + $0x2d8] ss:$36 sps:$4 sm:$0xff]  }
 0x120   : > { %3315 = vmatprep.mubr.bf16.mxu0 %v5897_v48 }
 0x121   : > { %v6663_v49 = vpop.f32.mrb[0].mxu1 }
 0x122   : > { %v2589_v50 = vpop.f32.mrb[1].mxu1 }
 0x123   : > { %v6666_v52 = vpop.f32.mrb[2].mxu1  ;;  %v5946_v50 = vld [vmem:[%s6299_s26 + $0x760] ss:$36 sps:$4 sm:$0xff]  }
 0x124   : > { %v2592_v55 = vpop.f32.mrb[3].mxu1 }
 0x125   : > { %v6032_v55 = vld [vmem:[%s7333_s1 + $0x228] sm:$0xff]  }
 0x126   : > { %2802 = vmatmul.mubr.bf16.gmra.mrb[108].mxu1 %v5899_v51  ;;  %v5948_v51 = vld [vmem:[%s6299_s26 + $0x324] ss:$36 sps:$4 sm:$0xff]  }
 0x127   : > { %3316 = vmatmul.mubr.bf16.gmra.mrb[76].mxu0 %v5900_v53  ;;  %2809 = vmatprep.mubr.bf16.mxu1 %v5901_v54  ;;  %v5950_v54 = vld [vmem:[%s6299_s26 + $0x7ac] ss:$36 sps:$4 sm:$0xff]  }
 0x128   : > { %3323 = vmatprep.mubr.bf16.mxu0 %v5903_v56  ;;  %v6051_v56 = vld [vmem:[%s7333_s1 + $0x230] sm:$0xff]  }
 0x129   : > { %v6671_v57 = vpop.f32.mrb[4].mxu1 }
 0x12a   : > { %v2597_v58 = vpop.f32.mrb[5].mxu1 }
 0x12b   : > { %v6674_v60 = vpop.f32.mrb[6].mxu1  ;;  %v5952_v58 = vld [vmem:[%s6299_s26 + $0x320] ss:$36 sps:$4 sm:$0xff]  }
 0x12c   : > { %v2600_v63 = vpop.f32.mrb[7].mxu1 }
 0x12d   : > { %v5959_v63 = vld [vmem:[%s6299_s26 + $0x368] ss:$36 sps:$4 sm:$0xff]  }
 0x12e   : > { %2810 = vmatmul.mubr.bf16.gmra.mrb[112].mxu1 %v5905_v59  ;;  %v5953_v59 = vld [vmem:[%s6299_s26 + $0x7a8] ss:$36 sps:$4 sm:$0xff]  }
 0x12f   : > { %3324 = vmatmul.mubr.bf16.gmra.mrb[80].mxu0 %v5906_v61  ;;  %2817 = vmatprep.mubr.bf16.mxu1 %v5908_v62  ;;  %v5955_v61 = vld [vmem:[%s6299_s26 + $0x36c] ss:$36 sps:$4 sm:$0xff]   ;;  %v5957_v62 = vld [vmem:[%s6299_s26 + $0x7f4] ss:$36 sps:$4 sm:$0xff]  }
 0x130   : > { %3331 = vmatprep.mubr.bf16.mxu0 %v5910_v0  ;;  %v5960_v0 = vld [vmem:[%s6299_s26 + $0x7f0] ss:$36 sps:$4 sm:$0xff]  }
 0x131   : > { %v6679_v2 = vpop.f32.mrb[8].mxu1 }
 0x132   : > { %v2605_v3 = vpop.f32.mrb[9].mxu1 }
 0x133   : > { %v6682_v5 = vpop.f32.mrb[10].mxu1  ;;  %v5962_v3 = vld [vmem:[%s6299_s26 + $0x3b4] ss:$36 sps:$4 sm:$0xff]  }
 0x134   : > { %v2608_v9 = vpop.f32.mrb[11].mxu1 }
 0x135   : > { %v5968_v9 = vld [vmem:[%s6299_s26 + $0x3fc] ss:$36 sps:$4 sm:$0xff]  }
 0x136   : > { %2818 = vmatmul.mubr.bf16.gmra.mrb[116].mxu1 %v5912_v4  ;;  %v5964_v4 = vld [vmem:[%s6299_s26 + $0x83c] ss:$36 sps:$4 sm:$0xff]  }
 0x137   : > { %3332 = vmatmul.mubr.bf16.gmra.mrb[84].mxu0 %v5913_v7  ;;  %2825 = vmatprep.mubr.bf16.mxu1 %v5914_v8  ;;  %v5966_v7 = vld [vmem:[%s6299_s26 + $0x3b0] ss:$36 sps:$4 sm:$0xff]   ;;  %v5967_v8 = vld [vmem:[%s6299_s26 + $0x838] ss:$36 sps:$4 sm:$0xff]  }
 0x138   : > { %3339 = vmatprep.mubr.bf16.mxu0 %v5916_v10  ;;  %v5970_v10 = vld [vmem:[%s6299_s26 + $0x884] ss:$36 sps:$4 sm:$0xff]  }
 0x139   : > { %v6687_v11 = vpop.f32.mrb[12].mxu1 }
 0x13a   : > { %v2613_v12 = vpop.f32.mrb[13].mxu1 }
 0x13b   : > { %v6690_v14 = vpop.f32.mrb[14].mxu1  ;;  %v6070_v12 = vld [vmem:[%s7333_s1 + $0x238] sm:$0xff]  }
 0x13c   : > { %v2616_v17 = vpop.f32.mrb[15].mxu1 }
 0x13d   : > { %v5978_v17 = vld [vmem:[%s6299_s26 + $0x8cc] ss:$36 sps:$4 sm:$0xff]  }
 0x13e   : > { %2826 = vmatmul.mubr.bf16.gmra.mrb[120].mxu1 %v5918_v13  ;;  %v5972_v13 = vld [vmem:[%s6299_s26 + $0x3f8] ss:$36 sps:$4 sm:$0xff]  }
 0x13f   : > { %3340 = vmatmul.mubr.bf16.gmra.mrb[88].mxu0 %v5919_v15  ;;  %2833 = vmatprep.mubr.bf16.mxu1 %v5921_v16  ;;  %v5973_v15 = vld [vmem:[%s6299_s26 + $0x880] ss:$36 sps:$4 sm:$0xff]  }
 0x140   : > { %3347 = vmatprep.mubr.bf16.mxu0 %v5923_v18  ;;  %v5976_v16 = vld [vmem:[%s6299_s26 + $0x444] ss:$36 sps:$4 sm:$0xff]  }
 0x141   : > { %v6695_v19 = vpop.f32.mrb[16].mxu1  ;;  %v5980_v18 = vld [vmem:[%s6299_s26 + $0x440] ss:$36 sps:$4 sm:$0xff]  }
 0x142   : > { %v2621_v20 = vpop.f32.mrb[17].mxu1 }
 0x143   : > { %v6698_v22 = vpop.f32.mrb[18].mxu1  ;;  %v5981_v20 = vld [vmem:[%s6299_s26 + $0x8c8] ss:$36 sps:$4 sm:$0xff]  }
 0x144   : > { %v2624_v25 = vpop.f32.mrb[19].mxu1 }
 0x145   : > { %v5984_v25 = vld [vmem:[%s6299_s26 + $0x18] ss:$36 sps:$4 sm:$0xff]  }
 0x146   : > { %2834 = vmatmul.mubr.bf16.gmra.mrb[124].mxu1 %v5925_v21  ;;  %v5982_v21 = vld [vmem:[%s6299_s26 + $0x48c] ss:$36 sps:$4 sm:$0xff]  }
 0x147   : > { %3348 = vmatmul.mubr.bf16.gmra.mrb[92].mxu0 %v5926_v23  ;;  %2938 = vmatprep.mubr.bf16.mxu1 %v5929_v24  ;;  %v5986_v23 = vld [vmem:[%s6299_s26 + $0x1c] ss:$36 sps:$4 sm:$0xff]   ;;  %v5987_v24 = vld [vmem:[%s6299_s26 + $0x488] ss:$36 sps:$4 sm:$0xff]  }
 0x148   : > { %3355 = vmatprep.mubr.bf16.mxu0 %v5930_v26  ;;  %v5988_v26 = vld [vmem:[%s6299_s26 + $0x4d4] ss:$36 sps:$4 sm:$0xff]  }
 0x149   : > { %v6703_v27 = vpop.f32.mrb[20].mxu1 }
 0x14a   : > { %v2629_v28 = vpop.f32.mrb[21].mxu1 }
 0x14b   : > { %v6706_v30 = vpop.f32.mrb[22].mxu1  ;;  %v5990_v28 = vld [vmem:[%s6299_s26 + $0x64] ss:$36 sps:$4 sm:$0xff]  }
 0x14c   : > { %v2632_v32 = vpop.f32.mrb[23].mxu1 }
 0x14d   : > { %v5995_v32 = vld [vmem:[%s6299_s26 + $0x51c] ss:$36 sps:$4 sm:$0xff]  }
 0x14e   : > { %2939 = vmatmul.mubr.bf16.vlgmr.msra.gmra.mrb[32].mxu1 %v5927_v29  ;;  %v5992_v29 = vld [vmem:[%s6299_s26 + $0x4d0] ss:$36 sps:$4 sm:$0xff]  }
 0x14f   : > { %3356 = vmatmul.mubr.bf16.gmra.mrb[96].mxu0 %v5932_v31  ;;  %5170 = vmatpush3.bf16.msra.mxu1 %v6608_v6  ;;  %v5943_v6 = vld [vmem:[%s6299_s26 + $0x764] ss:$36 sps:$4 sm:$0xff]  }
 0x150   : > { %2946 = vmatprep.mubr.bf16.mxu1 %v5935_v1  ;;  %3363 = vmatprep.mubr.bf16.mxu0 %v5937_v33  ;;  %v5993_v31 = vld [vmem:[%s6299_s26 + $0x60] ss:$36 sps:$4 sm:$0xff]   ;;  %v5997_v1 = vld [vmem:[%s6299_s26 + $0xac] ss:$36 sps:$4 sm:$0xff]   ;;  %v5999_v33 = vld [vmem:[%s6299_s26 + $0x518] ss:$36 sps:$4 sm:$0xff]  }
 0x151   : > { %v6718_v36 = vpop.f32.mrb[24].mxu1  ;;  %5171 = vmatprep.subr.bf16.mxu1 %v5954_v34 }
 0x152   : > { %v2637_v37 = vpop.f32.mrb[25].mxu1 }
 0x153   : > { %v6721_v39 = vpop.f32.mrb[26].mxu1  ;;  %5172 = vmatpush3.bf16.msra.mxu1 %v5954_v34  ;;  %v6000_v34 = vld [vmem:[%s6299_s26 + $0xa8] ss:$36 sps:$4 sm:$0xff]   ;;  %v6003_v37 = vld [vmem:[%s6299_s26 + $0xf4] ss:$36 sps:$4 sm:$0xff]  }
 0x154   : > { %v2640_v42 = vpop.f32.mrb[27].mxu1  ;;  %5173 = vmatprep.subr.bf16.mxu1 %v5975_v35 }
 0x155   : > { %v6009_v42 = vld [vmem:[%s6299_s26 + $0x13c] ss:$36 sps:$4 sm:$0xff]  }
 0x156   : > { %2947 = vmatmul.mubr.bf16.gmra.mrb[36].mxu1 %v5939_v38  ;;  %v6005_v38 = vld [vmem:[%s6299_s26 + $0x560] ss:$36 sps:$4 sm:$0xff]  }
 0x157   : > { %3364 = vmatmul.mubr.bf16.gmra.mrb[100].mxu0 %v5940_v40  ;;  %2954 = vmatprep.mubr.bf16.mxu1 %v5941_v41  ;;  %v6006_v40 = vld [vmem:[%s6299_s26 + $0xf0] ss:$36 sps:$4 sm:$0xff]  }
 0x158   : > { %3371 = vmatprep.mubr.bf16.mxu0 %v5943_v6  ;;  %5174 = vmatpush3.bf16.msra.mxu1 %v5975_v35  ;;  %v6001_v35 = vld [vmem:[%s6299_s26 + $0x564] ss:$36 sps:$4 sm:$0xff]   ;;  %v6007_v41 = vld [vmem:[%s6299_s26 + $0x5ac] ss:$36 sps:$4 sm:$0xff]  }
 0x159   : > { %v6729_v44 = vpop.f32.mrb[28].mxu1  ;;  %5175 = vmatprep.subr.bf16.mxu1 %v5994_v43  ;;  %v6011_v6 = vld [vmem:[%s6299_s26 + $0x5a8] ss:$36 sps:$4 sm:$0xff]  }
 0x15a   : > { %v2645_v46 = vpop.f32.mrb[29].mxu1 }
 0x15b   : > { %v6735_v48 = vpop.f32.mrb[30].mxu1  ;;  %v6016_v46 = vld [vmem:[%s6299_s26 + $0x184] ss:$36 sps:$4 sm:$0xff]  }
 0x15c   : > { %v2648_v53 = vpop.f32.mrb[31].mxu1  ;;  %5176 = vmatpush3.bf16.msra.mxu1 %v5994_v43  ;;  %v6012_v43 = vld [vmem:[%s6299_s26 + $0x138] ss:$36 sps:$4 sm:$0xff]  }
 0x15d   : > { %5177 = vmatprep.subr.bf16.mxu1 %v6013_v45  ;;  %v6022_v53 = vld [vmem:[%s6299_s26 + $0x1cc] ss:$36 sps:$4 sm:$0xff]  }
 0x15e   : > { %2955 = vmatmul.mubr.bf16.gmra.mrb[40].mxu1 %v5945_v47  ;;  %v6018_v47 = vld [vmem:[%s6299_s26 + $0x5f0] ss:$36 sps:$4 sm:$0xff]  }
 0x15f   : > { %3372 = vmatmul.mubr.bf16.gmra.mrb[104].mxu0 %v5946_v50  ;;  %2962 = vmatprep.mubr.bf16.mxu1 %v5948_v51  ;;  %v6019_v50 = vld [vmem:[%s6299_s26 + $0x180] ss:$36 sps:$4 sm:$0xff]  }
 0x160   : > { %3379 = vmatprep.mubr.bf16.mxu0 %v5950_v54  ;;  %5178 = vmatpush3.bf16.msra.mxu1 %v6013_v45  ;;  %v6014_v45 = vld [vmem:[%s6299_s26 + $0x5f4] ss:$36 sps:$4 sm:$0xff]   ;;  %v6020_v51 = vld [vmem:[%s6299_s26 + $0x63c] ss:$36 sps:$4 sm:$0xff]  }
 0x161   : > { %5179 = vmatprep.subr.bf16.mxu1 %v6032_v55  ;;  %v6024_v54 = vld [vmem:[%s6299_s26 + $0x638] ss:$36 sps:$4 sm:$0xff]  }
 0x164   : > { %5180 = vmatpush3.bf16.msra.mxu1 %v6032_v55  ;;  %v6025_v55 = vld [vmem:[%s6299_s26 + $0x1c8] ss:$36 sps:$4 sm:$0xff]  }
 0x165   : > { %5181 = vmatprep.subr.bf16.mxu1 %v6051_v56 }
 0x166   : > { %2963 = vmatmul.mubr.bf16.gmra.mrb[44].mxu1 %v5952_v58  ;;  %v6028_v58 = vld [vmem:[%s6299_s26 + $0x214] ss:$36 sps:$4 sm:$0xff]  }
 0x167   : > { %3380 = vmatmul.mubr.bf16.gmra.mrb[108].mxu0 %v5953_v59  ;;  %2970 = vmatprep.mubr.bf16.mxu1 %v5955_v61  ;;  %v6030_v59 = vld [vmem:[%s6299_s26 + $0x680] ss:$36 sps:$4 sm:$0xff]   ;;  %v6031_v61 = vld [vmem:[%s6299_s26 + $0x210] ss:$36 sps:$4 sm:$0xff]  }
 0x168   : > { %3387 = vmatprep.mubr.bf16.mxu0 %v5957_v62  ;;  %5182 = vmatpush3.bf16.msra.mxu1 %v6051_v56  ;;  %v6026_v56 = vld [vmem:[%s6299_s26 + $0x684] ss:$36 sps:$4 sm:$0xff]   ;;  %v6033_v62 = vld [vmem:[%s6299_s26 + $0x6cc] ss:$36 sps:$4 sm:$0xff]  }
 0x169   : > { %5183 = vmatprep.subr.bf16.mxu1 %v6070_v12 }
 0x16c   : > { %5184 = vmatpush3.bf16.msra.mxu1 %v6070_v12  ;;  %v6047_v12 = vld [vmem:[%s6299_s26 + $0x2ec] ss:$36 sps:$4 sm:$0xff]  }
 0x16e   : > { %2971 = vmatmul.mubr.bf16.gmra.mrb[48].mxu1 %v5959_v63  ;;  %v6035_v63 = vld [vmem:[%s6299_s26 + $0x25c] ss:$36 sps:$4 sm:$0xff]  }
 0x16f   : > { %3388 = vmatmul.mubr.bf16.gmra.mrb[112].mxu0 %v5960_v0  ;;  %2978 = vmatprep.mubr.bf16.mxu1 %v5962_v3  ;;  %v6037_v0 = vld [vmem:[%s6299_s26 + $0x6c8] ss:$36 sps:$4 sm:$0xff]   ;;  %v6038_v3 = vld [vmem:[%s6299_s26 + $0x258] ss:$36 sps:$4 sm:$0xff]  }
 0x170   : > { %3395 = vmatprep.mubr.bf16.mxu0 %v5964_v4  ;;  %v6039_v4 = vld [vmem:[%s6299_s26 + $0x714] ss:$36 sps:$4 sm:$0xff]  }
 0x176   : > { %2979 = vmatmul.mubr.bf16.gmra.mrb[52].mxu1 %v5966_v7  ;;  %v6041_v7 = vld [vmem:[%s6299_s26 + $0x2a4] ss:$36 sps:$4 sm:$0xff]  }
 0x177   : > { %3396 = vmatmul.mubr.bf16.gmra.mrb[116].mxu0 %v5967_v8  ;;  %2986 = vmatprep.mubr.bf16.mxu1 %v5968_v9  ;;  %v6043_v8 = vld [vmem:[%s6299_s26 + $0x710] ss:$36 sps:$4 sm:$0xff]   ;;  %v6044_v9 = vld [vmem:[%s6299_s26 + $0x2a0] ss:$36 sps:$4 sm:$0xff]  }
 0x178   : > { %3403 = vmatprep.mubr.bf16.mxu0 %v5970_v10  ;;  %v6045_v10 = vld [vmem:[%s6299_s26 + $0x75c] ss:$36 sps:$4 sm:$0xff]  }
 0x17e   : > { %2987 = vmatmul.mubr.bf16.gmra.mrb[56].mxu1 %v5972_v13  ;;  %v6049_v13 = vld [vmem:[%s6299_s26 + $0x758] ss:$36 sps:$4 sm:$0xff]  }
 0x17f   : > { %3404 = vmatmul.mubr.bf16.gmra.mrb[120].mxu0 %v5973_v15  ;;  %2994 = vmatprep.mubr.bf16.mxu1 %v5976_v16  ;;  %v6050_v15 = vld [vmem:[%s6299_s26 + $0x2e8] ss:$36 sps:$4 sm:$0xff]  }
 0x180   : > { %3411 = vmatprep.mubr.bf16.mxu0 %v5978_v17  ;;  %v6052_v16 = vld [vmem:[%s6299_s26 + $0x7a4] ss:$36 sps:$4 sm:$0xff]   ;;  %v6054_v17 = vld [vmem:[%s6299_s26 + $0x334] ss:$36 sps:$4 sm:$0xff]  }
 0x186   : > { %2995 = vmatmul.mubr.bf16.gmra.mrb[60].mxu1 %v5980_v18  ;;  %v6056_v18 = vld [vmem:[%s6299_s26 + $0x7a0] ss:$36 sps:$4 sm:$0xff]  }
 0x187   : > { %3412 = vmatmul.mubr.bf16.gmra.mrb[124].mxu0 %v5981_v20  ;;  %3002 = vmatprep.mubr.bf16.mxu1 %v5982_v21  ;;  %v6057_v20 = vld [vmem:[%s6299_s26 + $0x330] ss:$36 sps:$4 sm:$0xff]  }
 0x188   : > { %3452 = vmatprep.mubr.bf16.mxu0 %v5986_v23  ;;  %v6058_v21 = vld [vmem:[%s6299_s26 + $0x7ec] ss:$36 sps:$4 sm:$0xff]   ;;  %v6060_v23 = vld [vmem:[%s6299_s26 + $0x37c] ss:$36 sps:$4 sm:$0xff]  }
 0x18e   : > { %3003 = vmatmul.mubr.bf16.gmra.mrb[64].mxu1 %v5987_v24  ;;  %v6062_v24 = vld [vmem:[%s6299_s26 + $0x7e8] ss:$36 sps:$4 sm:$0xff]  }
 0x18f   : > { %3453 = vmatmul.mubr.bf16.vlgmr.msra.gmra.mrb[0].mxu0 %v5984_v25  ;;  %3010 = vmatprep.mubr.bf16.mxu1 %v5988_v26  ;;  %v6063_v25 = vld [vmem:[%s6299_s26 + $0x378] ss:$36 sps:$4 sm:$0xff]  }
 0x190   : > { %3460 = vmatprep.mubr.bf16.mxu0 %v5990_v28  ;;  %v6064_v26 = vld [vmem:[%s6299_s26 + $0x834] ss:$36 sps:$4 sm:$0xff]   ;;  %v6066_v28 = vld [vmem:[%s6299_s26 + $0x3c4] ss:$36 sps:$4 sm:$0xff]  }
 0x196   : > { %3011 = vmatmul.mubr.bf16.gmra.mrb[68].mxu1 %v5992_v29  ;;  %v6068_v29 = vld [vmem:[%s6299_s26 + $0x830] ss:$36 sps:$4 sm:$0xff]  }
 0x197   : > { %3461 = vmatmul.mubr.bf16.gmra.mrb[4].mxu0 %v5993_v31  ;;  %3018 = vmatprep.mubr.bf16.mxu1 %v5995_v32  ;;  %v6069_v31 = vld [vmem:[%s6299_s26 + $0x3c0] ss:$36 sps:$4 sm:$0xff]  }
 0x198   : > { %3468 = vmatprep.mubr.bf16.mxu0 %v5997_v1  ;;  %v6071_v32 = vld [vmem:[%s6299_s26 + $0x87c] ss:$36 sps:$4 sm:$0xff]   ;;  %v6073_v1 = vld [vmem:[%s6299_s26 + $0x40c] ss:$36 sps:$4 sm:$0xff]  }
 0x19e   : > { %3019 = vmatmul.mubr.bf16.gmra.mrb[72].mxu1 %v5999_v33  ;;  %v6075_v33 = vld [vmem:[%s6299_s26 + $0x878] ss:$36 sps:$4 sm:$0xff]  }
 0x19f   : > { %3469 = vmatmul.mubr.bf16.gmra.mrb[8].mxu0 %v6000_v34  ;;  %3026 = vmatprep.mubr.bf16.mxu1 %v6001_v35  ;;  %v6076_v34 = vld [vmem:[%s6299_s26 + $0x408] ss:$36 sps:$4 sm:$0xff]  }
 0x1a0   : > { %3476 = vmatprep.mubr.bf16.mxu0 %v6003_v37  ;;  %v6077_v35 = vld [vmem:[%s6299_s26 + $0x8c4] ss:$36 sps:$4 sm:$0xff]   ;;  %v6079_v37 = vld [vmem:[%s6299_s26 + $0x454] ss:$36 sps:$4 sm:$0xff]  }
 0x1a6   : > { %3027 = vmatmul.mubr.bf16.gmra.mrb[76].mxu1 %v6005_v38  ;;  %v6081_v38 = vld [vmem:[%s6299_s26 + $0x8c0] ss:$36 sps:$4 sm:$0xff]  }
 0x1a7   : > { %3477 = vmatmul.mubr.bf16.gmra.mrb[12].mxu0 %v6006_v40  ;;  %3034 = vmatprep.mubr.bf16.mxu1 %v6007_v41  ;;  %v6082_v40 = vld [vmem:[%s6299_s26 + $0x450] ss:$36 sps:$4 sm:$0xff]   ;;  %v6085_v41 = vld [vmem:[%s6299_s26 + $0x20] ss:$36 sps:$4 sm:$0xff]  }
 0x1a8   : > { %3484 = vmatprep.mubr.bf16.mxu0 %v6009_v42  ;;  %v6083_v42 = vld [vmem:[%s6299_s26 + $0x49c] ss:$36 sps:$4 sm:$0xff]  }
 0x1ae   : > { %3035 = vmatmul.mubr.bf16.gmra.mrb[80].mxu1 %v6011_v6  ;;  %v6087_v6 = vld [vmem:[%s6299_s26 + $0x68] ss:$36 sps:$4 sm:$0xff]  }
 0x1af   : > { %3485 = vmatmul.mubr.bf16.gmra.mrb[16].mxu0 %v6012_v43  ;;  %3042 = vmatprep.mubr.bf16.mxu1 %v6014_v45  ;;  %v6086_v43 = vld [vmem:[%s6299_s26 + $0x498] ss:$36 sps:$4 sm:$0xff]   ;;  %v6090_v45 = vld [vmem:[%s6299_s26 + $0xb0] ss:$36 sps:$4 sm:$0xff]  }
 0x1b0   : > { %3492 = vmatprep.mubr.bf16.mxu0 %v6016_v46  ;;  %v6088_v46 = vld [vmem:[%s6299_s26 + $0x4e4] ss:$36 sps:$4 sm:$0xff]  }
 0x1b6   : > { %3043 = vmatmul.mubr.bf16.gmra.mrb[84].mxu1 %v6018_v47  ;;  %v6092_v47 = vld [vmem:[%s6299_s26 + $0xf8] ss:$36 sps:$4 sm:$0xff]  }
 0x1b7   : > { %3493 = vmatmul.mubr.bf16.gmra.mrb[20].mxu0 %v6019_v50  ;;  %3050 = vmatprep.mubr.bf16.mxu1 %v6020_v51  ;;  %v6091_v50 = vld [vmem:[%s6299_s26 + $0x4e0] ss:$36 sps:$4 sm:$0xff]  }
 0x1b8   : > { %3500 = vmatprep.mubr.bf16.mxu0 %v6022_v53  ;;  %v6095_v51 = vld [vmem:[%s6299_s26 + $0x140] ss:$36 sps:$4 sm:$0xff]   ;;  %v6093_v53 = vld [vmem:[%s6299_s26 + $0x52c] ss:$36 sps:$4 sm:$0xff]  }
 0x1be   : > { %3051 = vmatmul.mubr.bf16.gmra.mrb[88].mxu1 %v6024_v54  ;;  %v6097_v54 = vld [vmem:[%s6299_s26 + $0x188] ss:$36 sps:$4 sm:$0xff]  }
 0x1bf   : > { %3501 = vmatmul.mubr.bf16.gmra.mrb[24].mxu0 %v6025_v55  ;;  %3058 = vmatprep.mubr.bf16.mxu1 %v6026_v56  ;;  %v6096_v55 = vld [vmem:[%s6299_s26 + $0x528] ss:$36 sps:$4 sm:$0xff]   ;;  %v6100_v56 = vld [vmem:[%s6299_s26 + $0x1d0] ss:$36 sps:$4 sm:$0xff]  }
 0x1c0   : > { %3508 = vmatprep.mubr.bf16.mxu0 %v6028_v58  ;;  %v6098_v58 = vld [vmem:[%s6299_s26 + $0x574] ss:$36 sps:$4 sm:$0xff]  }
 0x1c6   : > { %3059 = vmatmul.mubr.bf16.gmra.mrb[92].mxu1 %v6030_v59 }
 0x1c7   : > { %3509 = vmatmul.mubr.bf16.gmra.mrb[28].mxu0 %v6031_v61  ;;  %3066 = vmatprep.mubr.bf16.mxu1 %v6033_v62  ;;  %v6102_v62 = vld [vmem:[%s6299_s26 + $0x218] ss:$36 sps:$4 sm:$0xff]  }
 0x1c8   : > { %3516 = vmatprep.mubr.bf16.mxu0 %v6035_v63 }
 0x1ce   : > { %3067 = vmatmul.mubr.bf16.gmra.mrb[96].mxu1 %v6037_v0  ;;  %v6101_v0 = vld [vmem:[%s6299_s26 + $0x570] ss:$36 sps:$4 sm:$0xff]  }
 0x1cf   : > { %3517 = vmatmul.mubr.bf16.gmra.mrb[32].mxu0 %v6038_v3  ;;  %3074 = vmatprep.mubr.bf16.mxu1 %v6039_v4  ;;  %v6105_v3 = vld [vmem:[%s6299_s26 + $0x260] ss:$36 sps:$4 sm:$0xff]  }
 0x1d0   : > { %3524 = vmatprep.mubr.bf16.mxu0 %v6041_v7  ;;  %v6103_v7 = vld [vmem:[%s6299_s26 + $0x5bc] ss:$36 sps:$4 sm:$0xff]  }
 0x1d6   : > { %3075 = vmatmul.mubr.bf16.gmra.mrb[100].mxu1 %v6043_v8 }
 0x1d7   : > { %3525 = vmatmul.mubr.bf16.gmra.mrb[36].mxu0 %v6044_v9  ;;  %3082 = vmatprep.mubr.bf16.mxu1 %v6045_v10  ;;  %v6107_v10 = vld [vmem:[%s6299_s26 + $0x2a8] ss:$36 sps:$4 sm:$0xff]  }
 0x1d8   : > { %3532 = vmatprep.mubr.bf16.mxu0 %v6047_v12 }
 0x1de   : > { %3083 = vmatmul.mubr.bf16.gmra.mrb[104].mxu1 %v6049_v13  ;;  %v6106_v13 = vld [vmem:[%s6299_s26 + $0x5b8] ss:$36 sps:$4 sm:$0xff]  }
 0x1df   : > { %3533 = vmatmul.mubr.bf16.gmra.mrb[40].mxu0 %v6050_v15  ;;  %3090 = vmatprep.mubr.bf16.mxu1 %v6052_v16  ;;  %v6110_v15 = vld [vmem:[%s6299_s26 + $0x2f0] ss:$36 sps:$4 sm:$0xff]  }
 0x1e0   : > { %3540 = vmatprep.mubr.bf16.mxu0 %v6054_v17  ;;  %v6108_v17 = vld [vmem:[%s6299_s26 + $0x604] ss:$36 sps:$4 sm:$0xff]  }
 0x1e6   : > { %3091 = vmatmul.mubr.bf16.gmra.mrb[108].mxu1 %v6056_v18 }
 0x1e7   : > { %3541 = vmatmul.mubr.bf16.gmra.mrb[44].mxu0 %v6057_v20  ;;  %3098 = vmatprep.mubr.bf16.mxu1 %v6058_v21  ;;  %v6112_v21 = vld [vmem:[%s6299_s26 + $0x338] ss:$36 sps:$4 sm:$0xff]  }
 0x1e8   : > { %3548 = vmatprep.mubr.bf16.mxu0 %v6060_v23 }
 0x1ee   : > { %3099 = vmatmul.mubr.bf16.gmra.mrb[112].mxu1 %v6062_v24  ;;  %v6111_v24 = vld [vmem:[%s6299_s26 + $0x600] ss:$36 sps:$4 sm:$0xff]  }
 0x1ef   : > { %3549 = vmatmul.mubr.bf16.gmra.mrb[48].mxu0 %v6063_v25  ;;  %3106 = vmatprep.mubr.bf16.mxu1 %v6064_v26  ;;  %v6115_v25 = vld [vmem:[%s6299_s26 + $0x380] ss:$36 sps:$4 sm:$0xff]  }
 0x1f0   : > { %3556 = vmatprep.mubr.bf16.mxu0 %v6066_v28  ;;  %v6113_v28 = vld [vmem:[%s6299_s26 + $0x64c] ss:$36 sps:$4 sm:$0xff]  }
 0x1f6   : > { %3107 = vmatmul.mubr.bf16.gmra.mrb[116].mxu1 %v6068_v29 }
 0x1f7   : > { %3557 = vmatmul.mubr.bf16.gmra.mrb[52].mxu0 %v6069_v31  ;;  %3114 = vmatprep.mubr.bf16.mxu1 %v6071_v32  ;;  %v6117_v32 = vld [vmem:[%s6299_s26 + $0x3c8] ss:$36 sps:$4 sm:$0xff]  }
 0x1f8   : > { %3564 = vmatprep.mubr.bf16.mxu0 %v6073_v1 }
 0x1fe   : > { %3115 = vmatmul.mubr.bf16.gmra.mrb[120].mxu1 %v6075_v33  ;;  %v6116_v33 = vld [vmem:[%s6299_s26 + $0x648] ss:$36 sps:$4 sm:$0xff]  }
 0x1ff   : > { %3565 = vmatmul.mubr.bf16.gmra.mrb[56].mxu0 %v6076_v34  ;;  %3122 = vmatprep.mubr.bf16.mxu1 %v6077_v35  ;;  %v6120_v34 = vld [vmem:[%s6299_s26 + $0x410] ss:$36 sps:$4 sm:$0xff]  }
 0x200   : > { %3572 = vmatprep.mubr.bf16.mxu0 %v6079_v37  ;;  %v6118_v37 = vld [vmem:[%s6299_s26 + $0x694] ss:$36 sps:$4 sm:$0xff]  }
 0x206   : > { %3123 = vmatmul.mubr.bf16.gmra.mrb[124].mxu1 %v6081_v38 }
 0x207   : > { %3573 = vmatmul.mubr.bf16.gmra.mrb[60].mxu0 %v6082_v40  ;;  %5185 = vmatprep.mubr.bf16.mxu1 %v6085_v41  ;;  %v6122_v41 = vld [vmem:[%s6299_s26 + $0x458] ss:$36 sps:$4 sm:$0xff]  }
 0x208   : > { %3580 = vmatprep.mubr.bf16.mxu0 %v6083_v42 }
 0x20e   : > { %5186 = vmatmul.mubr.bf16.vlgmr.msra.gmra.mrb[128].mxu1 %v6087_v6  ;;  %v6121_v6 = vld [vmem:[%s6299_s26 + $0x690] ss:$36 sps:$4 sm:$0xff]  }
 0x20f   : > { %3581 = vmatmul.mubr.bf16.gmra.mrb[64].mxu0 %v6086_v43  ;;  %5189 = vmatprep.mubr.bf16.mxu1 %v6090_v45  ;;  %v6125_v43 = vld [vmem:[%s6299_s26 + $0x4a0] ss:$36 sps:$4 sm:$0xff]  }
 0x210   : > { %3588 = vmatprep.mubr.bf16.mxu0 %v6088_v46  ;;  %v6123_v46 = vld [vmem:[%s6299_s26 + $0x6dc] ss:$36 sps:$4 sm:$0xff]  }
 0x216   : > { %5190 = vmatmul.mubr.bf16.gmra.mrb[132].mxu1 %v6092_v47 }
 0x217   : > { %3589 = vmatmul.mubr.bf16.gmra.mrb[68].mxu0 %v6091_v50  ;;  %5193 = vmatprep.mubr.bf16.mxu1 %v6095_v51  ;;  %v6127_v51 = vld [vmem:[%s6299_s26 + $0x4e8] ss:$36 sps:$4 sm:$0xff]  }
 0x218   : > { %3596 = vmatprep.mubr.bf16.mxu0 %v6093_v53 }
 0x21e   : > { %5194 = vmatmul.mubr.bf16.gmra.mrb[136].mxu1 %v6097_v54  ;;  %v6126_v54 = vld [vmem:[%s6299_s26 + $0x6d8] ss:$36 sps:$4 sm:$0xff]  }
 0x21f   : > { %3597 = vmatmul.mubr.bf16.gmra.mrb[72].mxu0 %v6096_v55  ;;  %5197 = vmatprep.mubr.bf16.mxu1 %v6100_v56  ;;  %v6130_v55 = vld [vmem:[%s6299_s26 + $0x530] ss:$36 sps:$4 sm:$0xff]  }
 0x220   : > { %3604 = vmatprep.mubr.bf16.mxu0 %v6098_v58  ;;  %v6128_v58 = vld [vmem:[%s6299_s26 + $0x724] ss:$36 sps:$4 sm:$0xff]  }
 0x221   : > { %v6845_v59 = vpop.f32.mrb[32].mxu1 }
 0x222   : > { %v2942_v61 = vpop.f32.mrb[33].mxu1 }
 0x223   : > { %v6848_v63 = vpop.f32.mrb[34].mxu1 }
 0x224   : > { %v2945_v4 = vpop.f32.mrb[35].mxu1 }
 0x225   : > { %v6131_v4 = vld [vmem:[%s6299_s26 + $0x720] ss:$36 sps:$4 sm:$0xff]  }
 0x226   : > { %5198 = vmatmul.mubr.bf16.gmra.mrb[140].mxu1 %v6102_v62 }
 0x227   : > { %3605 = vmatmul.mubr.bf16.gmra.mrb[76].mxu0 %v6101_v0  ;;  %5201 = vmatprep.mubr.bf16.mxu1 %v6105_v3  ;;  %v6132_v0 = vld [vmem:[%s6299_s26 + $0x578] ss:$36 sps:$4 sm:$0xff]  }
 0x228   : > { %3612 = vmatprep.mubr.bf16.mxu0 %v6103_v7  ;;  %v6135_v7 = vld [vmem:[%s6299_s26 + $0x5c0] ss:$36 sps:$4 sm:$0xff]  }
 0x229   : > { %v6853_v8 = vpop.f32.mrb[36].mxu1 }
 0x22a   : > { %v2950_v9 = vpop.f32.mrb[37].mxu1 }
 0x22b   : > { %v6856_v12 = vpop.f32.mrb[38].mxu1 }
 0x22c   : > { %v2953_v16 = vpop.f32.mrb[39].mxu1 }
 0x22d   : > { %v6137_v16 = vld [vmem:[%s6299_s26 + $0x608] ss:$36 sps:$4 sm:$0xff]  }
 0x22e   : > { %5202 = vmatmul.mubr.bf16.gmra.mrb[144].mxu1 %v6107_v10  ;;  %v6133_v10 = vld [vmem:[%s6299_s26 + $0x76c] ss:$36 sps:$4 sm:$0xff]  }
 0x22f   : > { %3613 = vmatmul.mubr.bf16.gmra.mrb[80].mxu0 %v6106_v13  ;;  %5205 = vmatprep.mubr.bf16.mxu1 %v6110_v15 }
 0x230   : > { %3620 = vmatprep.mubr.bf16.mxu0 %v6108_v17 }
 0x231   : > { %v6861_v18 = vpop.f32.mrb[40].mxu1 }
 0x232   : > { %v2958_v20 = vpop.f32.mrb[41].mxu1 }
 0x233   : > { %v6864_v23 = vpop.f32.mrb[42].mxu1  ;;  %v6136_v20 = vld [vmem:[%s6299_s26 + $0x768] ss:$36 sps:$4 sm:$0xff]  }
 0x234   : > { %v2961_v26 = vpop.f32.mrb[43].mxu1 }
 0x235   : > { %v6912_v26 = vld [vmem:[%s7334_s2] ss:$0 sm:$0xff] }
 0x236   : > { %5206 = vmatmul.mubr.bf16.gmra.mrb[148].mxu1 %v6112_v21  ;;  %v6140_v21 = vld [vmem:[%s6299_s26 + $0x650] ss:$36 sps:$4 sm:$0xff]  }
 0x237   : > { %3621 = vmatmul.mubr.bf16.gmra.mrb[84].mxu0 %v6111_v24  ;;  %5209 = vmatprep.mubr.bf16.mxu1 %v6115_v25  ;;  %v6138_v25 = vld [vmem:[%s6299_s26 + $0x7b4] ss:$36 sps:$4 sm:$0xff]  }
 0x238   : > { %3628 = vmatprep.mubr.bf16.mxu0 %v6113_v28  ;;  %v2588_v28 = vadd.f32 %v6912_v26, %v6663_v49 }
 0x239   : > { %v6869_v29 = vpop.f32.mrb[44].mxu1 }
 0x23a   : > { %v2966_v31 = vpop.f32.mrb[45].mxu1 }
 0x23b   : > { %v6872_v1 = vpop.f32.mrb[46].mxu1 }
 0x23c   : > { %v2969_v35 = vpop.f32.mrb[47].mxu1 }
 0x23d   : > { %v2591_v35 = vadd.f32 %v6912_v26, %v6666_v52  ;;  %v2596_v52 = vadd.f32 %v6912_v26, %v6671_v57 }
 0x23e   : > { %5210 = vmatmul.mubr.bf16.gmra.mrb[152].mxu1 %v6117_v32 }
 0x23f   : > { %3629 = vmatmul.mubr.bf16.gmra.mrb[88].mxu0 %v6116_v33  ;;  %5213 = vmatprep.mubr.bf16.mxu1 %v6120_v34  ;;  %v6142_v34 = vld [vmem:[%s6299_s26 + $0x698] ss:$36 sps:$4 sm:$0xff]  }
 0x240   : > { %3636 = vmatprep.mubr.bf16.mxu0 %v6118_v37 }
 0x241   : > { %v6877_v38 = vpop.f32.mrb[48].mxu1 }
 0x242   : > { %v2974_v40 = vpop.f32.mrb[49].mxu1 }
 0x243   : > { %v6880_v42 = vpop.f32.mrb[50].mxu1 }
 0x244   : > { %v2977_v45 = vpop.f32.mrb[51].mxu1 }
 0x246   : > { %5214 = vmatmul.mubr.bf16.gmra.mrb[156].mxu1 %v6122_v41 }
 0x247   : > { %3637 = vmatmul.mubr.bf16.gmra.mrb[92].mxu0 %v6121_v6  ;;  %5217 = vmatprep.mubr.bf16.mxu1 %v6125_v43  ;;  %v6141_v6 = vld [vmem:[%s6299_s26 + $0x7b0] ss:$36 sps:$4 sm:$0xff]   ;;  %v6145_v43 = vld [vmem:[%s6299_s26 + $0x6e0] ss:$36 sps:$4 sm:$0xff]  }
 0x248   : > { %3644 = vmatprep.mubr.bf16.mxu0 %v6123_v46 }
 0x249   : > { %v6885_v47 = vpop.f32.mrb[52].mxu1 }
 0x24a   : > { %v2982_v50 = vpop.f32.mrb[53].mxu1 }
 0x24b   : > { %v6888_v53 = vpop.f32.mrb[54].mxu1  ;;  %v6143_v50 = vld [vmem:[%s6299_s26 + $0x7fc] ss:$36 sps:$4 sm:$0xff]  }
 0x24c   : > { %v2985_v56 = vpop.f32.mrb[55].mxu1 }
 0x24e   : > { %5218 = vmatmul.mubr.bf16.gmra.mrb[160].mxu1 %v6127_v51 }
 0x24f   : > { %3645 = vmatmul.mubr.bf16.gmra.mrb[96].mxu0 %v6126_v54  ;;  %5221 = vmatprep.mubr.bf16.mxu1 %v6130_v55 }
 0x250   : > { %3652 = vmatprep.mubr.bf16.mxu0 %v6128_v58  ;;  %v6147_v58 = vld [vmem:[%s6299_s26 + $0x728] ss:$36 sps:$4 sm:$0xff]  }
 0x251   : > { %v6893_v61 = vpop.f32.mrb[56].mxu1 }
 0x252   : > { %v2990_v62 = vpop.f32.mrb[57].mxu1 }
 0x253   : > { %v6896_v3 = vpop.f32.mrb[58].mxu1  ;;  %v2599_v62 = vadd.f32 %v6912_v26, %v6674_v60  ;;  %v2604_v60 = vadd.f32 %v6912_v26, %v6679_v2 }
 0x254   : > { %v2993_v9 = vpop.f32.mrb[59].mxu1 }
 0x255   : > { %v6146_v9 = vld [vmem:[%s6299_s26 + $0x7f8] ss:$36 sps:$4 sm:$0xff]  }
 0x256   : > { %5222 = vmatmul.mubr.bf16.gmra.mrb[164].mxu1 %v6132_v0 }
 0x257   : > { %3653 = vmatmul.mubr.bf16.gmra.mrb[100].mxu0 %v6131_v4  ;;  %5225 = vmatprep.mubr.bf16.mxu1 %v6135_v7 }
 0x258   : > { %3660 = vmatprep.mubr.bf16.mxu0 %v6133_v10  ;;  %v6150_v10 = vld [vmem:[%s6299_s26 + $0x770] ss:$36 sps:$4 sm:$0xff]  }
 0x259   : > { %v6901_v13 = vpop.f32.mrb[60].mxu1 }
 0x25a   : > { %v2998_v15 = vpop.f32.mrb[61].mxu1 }
 0x25b   : > { %v6904_v17 = vpop.f32.mrb[62].mxu1 }
 0x25c   : > { %v3001_v24 = vpop.f32.mrb[63].mxu1 }
 0x25e   : > { %5226 = vmatmul.mubr.bf16.gmra.mrb[168].mxu1 %v6137_v16 }
 0x25f   : > { %3661 = vmatmul.mubr.bf16.gmra.mrb[104].mxu0 %v6136_v20  ;;  %5229 = vmatprep.mubr.bf16.mxu1 %v6140_v21  ;;  %v6148_v20 = vld [vmem:[%s6299_s26 + $0x844] ss:$36 sps:$4 sm:$0xff]  }
 0x260   : > { %3668 = vmatprep.mubr.bf16.mxu0 %v6138_v25 }
 0x261   : > { %v6916_v31 = vpop.f32.mrb[64].mxu1 }
 0x262   : > { %v3454_v32 = vpop.f32.mrb[0].mxu0  ;;  %v3006_v33 = vpop.f32.mrb[65].mxu1 }
 0x263   : > { %v6921_v37 = vadd.f32 %v3454_v32, %v2588_v28  ;;  %v3456_v40 = vpop.f32.mrb[1].mxu0  ;;  %v6923_v41 = vpop.f32.mrb[66].mxu1  ;;  %v6152_v32 = vld [vmem:[%s6299_s26 + $0x7b8] ss:$36 sps:$4 sm:$0xff]   ;;  %v2607_v33 = vadd.f32 %v6912_v26, %v6682_v5  ;;  %v2612_v5 = vadd.f32 %v6912_v26, %v6687_v11 }
 0x264   : > { %v3457_v45 = vpop.f32.mrb[2].mxu0  ;;  %v3009_v46 = vpop.f32.mrb[67].mxu1 }
 0x265   : > { %v6928_v49 = vadd.f32 %v3457_v45, %v2591_v35  ;;  %v3459_v51 = vpop.f32.mrb[3].mxu0 }
 0x266   : > { %5230 = vmatmul.mubr.bf16.gmra.mrb[172].mxu1 %v6142_v34 }
 0x267   : > { %3669 = vmatmul.mubr.bf16.gmra.mrb[108].mxu0 %v6141_v6  ;;  %5233 = vmatprep.mubr.bf16.mxu1 %v6145_v43  ;;  %v6151_v6 = vld [vmem:[%s6299_s26 + $0x840] ss:$36 sps:$4 sm:$0xff]  }
 0x268   : > { %3676 = vmatprep.mubr.bf16.mxu0 %v6143_v50  ;;  %v6155_v43 = vld [vmem:[%s6299_s26 + $0x800] ss:$36 sps:$4 sm:$0xff]   ;;  %v6153_v50 = vld [vmem:[%s6299_s26 + $0x88c] ss:$36 sps:$4 sm:$0xff]  }
 0x269   : > { %v6932_v54 = vpop.f32.mrb[68].mxu1 }
 0x26a   : > { %v3462_v55 = vpop.f32.mrb[4].mxu0  ;;  %v3014_v56 = vpop.f32.mrb[69].mxu1 }
 0x26b   : > { %v6937_v0 = vadd.f32 %v3462_v55, %v2596_v52  ;;  %v3464_v4 = vpop.f32.mrb[5].mxu0  ;;  %v6939_v7 = vpop.f32.mrb[70].mxu1 }
 0x26c   : > { %v3465_v15 = vpop.f32.mrb[6].mxu0  ;;  %v3017_v16 = vpop.f32.mrb[71].mxu1 }
 0x26d   : > { %v6944_v57 = vadd.f32 %v3465_v15, %v2599_v62  ;;  %v3467_v21 = vpop.f32.mrb[7].mxu0  ;;  %v2615_v62 = vadd.f32 %v6912_v26, %v6690_v14  ;;  %v6156_v15 = vld [vmem:[%s6299_s26 + $0x888] ss:$36 sps:$4 sm:$0xff]   ;;  %v6160_v16 = vld [vmem:[%s6299_s26 + $0x890] ss:$36 sps:$4 sm:$0xff]   ;;  %v2620_v14 = vadd.f32 %v6912_v26, %v6695_v19  ;;  %v2628_v19 = vadd.f32 %v6912_v26, %v6703_v27 }
 0x26e   : > { %5234 = vmatmul.mubr.bf16.gmra.mrb[176].mxu1 %v6147_v58  ;;  %v6157_v58 = vld [vmem:[%s6299_s26 + $0x848] ss:$36 sps:$4 sm:$0xff]   ;;  %v2636_v27 = vadd.f32 %v6912_v26, %v6718_v36  ;;  %v2644_v36 = vadd.f32 %v6912_v26, %v6729_v44  ;;  %v5313_v44 = vadd.f32 %v6912_v26, %v6845_v59  ;;  %v5317_v59 = vadd.f32 %v6912_v26, %v6853_v8 }
 0x26f   : > { %3677 = vmatmul.mubr.bf16.gmra.mrb[112].mxu0 %v6146_v9  ;;  %5237 = vmatprep.mubr.bf16.mxu1 %v6150_v10  ;;  %v5321_v8 = vadd.f32 %v6912_v26, %v6861_v18  ;;  %v5325_v18 = vadd.f32 %v6912_v26, %v6869_v29  ;;  %v5329_v29 = vadd.f32 %v6912_v26, %v6877_v38 }
 0x270   : > { %3684 = vmatprep.mubr.bf16.mxu0 %v6148_v20  ;;  %v5333_v38 = vadd.f32 %v6912_v26, %v6885_v47  ;;  %v5337_v47 = vadd.f32 %v6912_v26, %v6893_v61  ;;  %v5341_v61 = vadd.f32 %v6912_v26, %v6901_v13  ;;  %v5345_v13 = vadd.f32 %v6912_v26, %v6916_v31 }
 0x271   : > { %v6948_v24 = vpop.f32.mrb[72].mxu1 }
 0x272   : > { %v3470_v25 = vpop.f32.mrb[8].mxu0  ;;  %v3022_v28 = vpop.f32.mrb[73].mxu1 }
 0x273   : > { %v6953_v34 = vadd.f32 %v3470_v25, %v2604_v60  ;;  %v3472_v35 = vpop.f32.mrb[9].mxu0  ;;  %v6955_v40 = vpop.f32.mrb[74].mxu1  ;;  %v6158_v60 = vld [vmem:[%s6299_s26 + $0x8d4] ss:$36 sps:$4 sm:$0xff]  }
 0x274   : > { %v3473_v45 = vpop.f32.mrb[10].mxu0  ;;  %v3025_v46 = vpop.f32.mrb[75].mxu1  ;;  %v6162_v35 = vld [vmem:[%s6299_s26 + $0x8d8] ss:$36 sps:$4 sm:$0xff]  }
 0x275   : > { %v6960_v2 = vadd.f32 %v3473_v45, %v2607_v33  ;;  %v3475_v51 = vpop.f32.mrb[11].mxu0 }
 0x276   : > { %5238 = vmatmul.mubr.bf16.gmra.mrb[180].mxu1 %v6152_v32 }
 0x277   : > { %3685 = vmatmul.mubr.bf16.gmra.mrb[116].mxu0 %v6151_v6  ;;  %5241 = vmatprep.mubr.bf16.mxu1 %v6155_v43  ;;  %v2623_v6 = vadd.f32 %v6912_v26, %v6698_v22 }
 0x278   : > { %3692 = vmatprep.mubr.bf16.mxu0 %v6153_v50  ;;  %v6161_v50 = vld [vmem:[%s6299_s26 + $0x8d0] ss:$36 sps:$4 sm:$0xff]   ;;  %s4446_s26 = sshll.u32 %s7371_s7, 2 }
 0x279   : > { %v6964_v52 = vpop.f32.mrb[76].mxu1  ;;  %s7140_s20 = scalar_lea.vmem %s7335_s3, %s4446_s26 }
 0x27a   : > { %v3478_v55 = vpop.f32.mrb[12].mxu0  ;;  %v3030_v56 = vpop.f32.mrb[77].mxu1 }
 0x27b   : > { %v6969_v4 = vadd.f32 %v3478_v55, %v2612_v5  ;;  %v3480_v9 = vpop.f32.mrb[13].mxu0  ;;  %v6971_v10 = vpop.f32.mrb[78].mxu1 }
 0x27c   : > { %v3481_v20 = vpop.f32.mrb[14].mxu0  ;;  %v3033_v21 = vpop.f32.mrb[79].mxu1  ;;  %v2631_v9 = vadd.f32 %v6912_v26, %v6706_v30  ;;  %v2639_v30 = vadd.f32 %v6912_v26, %v6721_v39  ;;  %v2647_v39 = vadd.f32 %v6912_v26, %v6735_v48  ;;  %v5315_v48 = vadd.f32 %v6912_v26, %v6848_v63 }
 0x27d   : > { %v6976_v11 = vadd.f32 %v3481_v20, %v2615_v62  ;;  %v3483_v25 = vpop.f32.mrb[15].mxu0  ;;  %v5319_v63 = vadd.f32 %v6912_v26, %v6856_v12  ;;  %v5323_v12 = vadd.f32 %v6912_v26, %v6864_v23  ;;  %v5327_v23 = vadd.f32 %v6912_v26, %v6872_v1 }
 0x27e   : > { %5242 = vmatmul.mubr.bf16.gmra.mrb[184].mxu1 %v6157_v58  ;;  %v5331_v1 = vadd.f32 %v6912_v26, %v6880_v42  ;;  %v5335_v42 = vadd.f32 %v6912_v26, %v6888_v53  ;;  %v5339_v53 = vadd.f32 %v6912_v26, %v6896_v3  ;;  %v5343_v3 = vadd.f32 %v6912_v26, %v6904_v17 }
 0x27f   : > { %3693 = vmatmul.mubr.bf16.gmra.mrb[120].mxu0 %v6156_v15  ;;  %5245 = vmatprep.mubr.bf16.mxu1 %v6160_v16  ;;  %v5347_v17 = vadd.f32 %v6912_v26, %v6923_v41 }
 0x280   : > { %3700 = vmatprep.mubr.bf16.mxu0 %v6158_v60 }
 0x281   : > { %v6980_v28 = vpop.f32.mrb[80].mxu1 }
 0x282   : > { %v3486_v32 = vpop.f32.mrb[16].mxu0  ;;  %v3038_v33 = vpop.f32.mrb[81].mxu1 }
 0x283   : > { %v6985_v43 = vadd.f32 %v3486_v32, %v2620_v14  ;;  %v3488_v45 = vpop.f32.mrb[17].mxu0  ;;  %v6987_v46 = vpop.f32.mrb[82].mxu1 }
 0x284   : > { %v3489_v51 = vpop.f32.mrb[18].mxu0  ;;  %v3041_v5 = vpop.f32.mrb[83].mxu1 }
 0x285   : > { %v6990_v55 = vadd.f32 %v3489_v51, %v2623_v6  ;;  %v3491_v56 = vpop.f32.mrb[19].mxu0 }
 0x286   : > { %5246 = vmatmul.mubr.bf16.gmra.mrb[188].mxu1 %v6162_v35 }
 0x287   : > { %3701 = vmatmul.mubr.bf16.gmra.mrb[124].mxu0 %v6161_v50 }
 0x289   : > { %v6994_v58 = vpop.f32.mrb[84].mxu1 }
 0x28a   : > { %v3494_v62 = vpop.f32.mrb[20].mxu0  ;;  %v3046_v22 = vpop.f32.mrb[85].mxu1 }
 0x28b   : > { %v6998_v15 = vadd.f32 %v3494_v62, %v2628_v19  ;;  %v3496_v16 = vpop.f32.mrb[21].mxu0  ;;  %v7000_v20 = vpop.f32.mrb[86].mxu1 }
 0x28c   : > { %v3497_v21 = vpop.f32.mrb[22].mxu0  ;;  %v3049_v60 = vpop.f32.mrb[87].mxu1 }
 0x28d   : > { %v7002_v25 = vadd.f32 %v3497_v21, %v2631_v9  ;;  %v3499_v14 = vpop.f32.mrb[23].mxu0 }
 0x291   : > { %v7006_v32 = vpop.f32.mrb[88].mxu1 }
 0x292   : > { %v3502_v33 = vpop.f32.mrb[24].mxu0  ;;  %v3054_v35 = vpop.f32.mrb[89].mxu1 }
 0x293   : > { %v7010_v6 = vadd.f32 %v3502_v33, %v2636_v27  ;;  %v3504_v45 = vpop.f32.mrb[25].mxu0  ;;  %v7012_v50 = vpop.f32.mrb[90].mxu1 }
 0x294   : > { %v3505_v51 = vpop.f32.mrb[26].mxu0  ;;  %v3057_v5 = vpop.f32.mrb[91].mxu1 }
 0x295   : > { %v7014_v56 = vadd.f32 %v3505_v51, %v2639_v30  ;;  %v3507_v19 = vpop.f32.mrb[27].mxu0 }
 0x299   : > { %v7018_v62 = vpop.f32.mrb[92].mxu1 }
 0x29a   : > { %v3510_v22 = vpop.f32.mrb[28].mxu0  ;;  %v3062_v9 = vpop.f32.mrb[93].mxu1 }
 0x29b   : > { %v7022_v16 = vadd.f32 %v3510_v22, %v2644_v36  ;;  %v3512_v21 = vpop.f32.mrb[29].mxu0  ;;  %v7024_v60 = vpop.f32.mrb[94].mxu1 }
 0x29c   : > { %v3513_v14 = vpop.f32.mrb[30].mxu0  ;;  %v3065_v27 = vpop.f32.mrb[95].mxu1 }
 0x29d   : > { %v7026_v33 = vadd.f32 %v3513_v14, %v2647_v39  ;;  %v3515_v35 = vpop.f32.mrb[31].mxu0 }
 0x2a1   : > { %v7030_v30 = vpop.f32.mrb[96].mxu1 }
 0x2a2   : > { %7336 = vst [vmem:[#allocation2_spill] sm:$0xff] %v7030_v30  ;;  %v3518_v45 = vpop.f32.mrb[32].mxu0  ;;  %v3070_v51 = vpop.f32.mrb[97].mxu1 }
 0x2a3   : > { %v7034_v5 = vadd.f32 %v5313_v44, %v3518_v45  ;;  %v3520_v19 = vpop.f32.mrb[33].mxu0  ;;  %v7036_v36 = vpop.f32.mrb[98].mxu1 }
 0x2a4   : > { %7337 = vst [vmem:[#allocation3_spill] sm:$0xff] %v7036_v36  ;;  %v3521_v22 = vpop.f32.mrb[34].mxu0  ;;  %v3073_v9 = vpop.f32.mrb[99].mxu1 }
 0x2a5   : > { %v7038_v39 = vadd.f32 %v5315_v48, %v3521_v22  ;;  %v3523_v21 = vpop.f32.mrb[35].mxu0 }
 0x2a9   : > { %v7042_v14 = vpop.f32.mrb[100].mxu1 }
 0x2aa   : > { %7338 = vst [vmem:[#allocation4_spill] sm:$0xff] %v7042_v14  ;;  %v3526_v27 = vpop.f32.mrb[36].mxu0  ;;  %v3078_v35 = vpop.f32.mrb[101].mxu1 }
 0x2ab   : > { %v7046_v44 = vadd.f32 %v5317_v59, %v3526_v27  ;;  %v3528_v45 = vpop.f32.mrb[37].mxu0  ;;  %v7048_v51 = vpop.f32.mrb[102].mxu1 }
 0x2ac   : > { %7339 = vst [vmem:[#allocation5_spill] sm:$0xff] %v7048_v51  ;;  %v3529_v19 = vpop.f32.mrb[38].mxu0  ;;  %v3081_v9 = vpop.f32.mrb[103].mxu1 }
 0x2ad   : > { %v7050_v48 = vadd.f32 %v5319_v63, %v3529_v19  ;;  %v3531_v22 = vpop.f32.mrb[39].mxu0 }
 0x2b1   : > { %v7054_v21 = vpop.f32.mrb[104].mxu1 }
 0x2b2   : > { %7340 = vst [vmem:[#allocation6_spill] sm:$0xff] %v7054_v21  ;;  %v3534_v14 = vpop.f32.mrb[40].mxu0  ;;  %v3086_v35 = vpop.f32.mrb[105].mxu1 }
 0x2b3   : > { %v7058_v59 = vadd.f32 %v5321_v8, %v3534_v14  ;;  %v3536_v27 = vpop.f32.mrb[41].mxu0  ;;  %v7060_v45 = vpop.f32.mrb[106].mxu1 }
 0x2b4   : > { %7341 = vst [vmem:[#allocation7_spill] sm:$0xff] %v7060_v45  ;;  %v3537_v51 = vpop.f32.mrb[42].mxu0  ;;  %v3089_v9 = vpop.f32.mrb[107].mxu1 }
 0x2b5   : > { %v7062_v63 = vadd.f32 %v5323_v12, %v3537_v51  ;;  %v3539_v19 = vpop.f32.mrb[43].mxu0 }
 0x2b9   : > { %v7066_v22 = vpop.f32.mrb[108].mxu1 }
 0x2ba   : > { %7342 = vst [vmem:[#allocation8_spill] sm:$0xff] %v7066_v22  ;;  %v3542_v21 = vpop.f32.mrb[44].mxu0  ;;  %v3094_v35 = vpop.f32.mrb[109].mxu1 }
 0x2bb   : > { %v7070_v14 = vadd.f32 %v5325_v18, %v3542_v21  ;;  %v3544_v8 = vpop.f32.mrb[45].mxu0  ;;  %v7072_v27 = vpop.f32.mrb[110].mxu1 }
 0x2bc   : > { %7343 = vst [vmem:[#allocation9_spill] sm:$0xff] %v7072_v27  ;;  %v3545_v45 = vpop.f32.mrb[46].mxu0  ;;  %v3097_v9 = vpop.f32.mrb[111].mxu1 }
 0x2bd   : > { %v7074_v51 = vadd.f32 %v5327_v23, %v3545_v45  ;;  %v3547_v12 = vpop.f32.mrb[47].mxu0 }
 0x2c1   : > { %v7078_v19 = vpop.f32.mrb[112].mxu1 }
 0x2c2   : > { %7344 = vst [vmem:[#allocation10_spill] sm:$0xff] %v7078_v19  ;;  %v3550_v22 = vpop.f32.mrb[48].mxu0  ;;  %v3102_v35 = vpop.f32.mrb[113].mxu1 }
 0x2c3   : > { %v7082_v21 = vadd.f32 %v5329_v29, %v3550_v22  ;;  %v3552_v18 = vpop.f32.mrb[49].mxu0  ;;  %v7084_v8 = vpop.f32.mrb[114].mxu1 }
 0x2c4   : > { %7345 = vst [vmem:[#allocation11_spill] sm:$0xff] %v7084_v8  ;;  %v3553_v27 = vpop.f32.mrb[50].mxu0  ;;  %v3105_v9 = vpop.f32.mrb[115].mxu1 }
 0x2c5   : > { %v7086_v45 = vadd.f32 %v5331_v1, %v3553_v27  ;;  %v3555_v23 = vpop.f32.mrb[51].mxu0 }
 0x2c9   : > { %v7090_v12 = vpop.f32.mrb[116].mxu1 }
 0x2ca   : > { %7346 = vst [vmem:[#allocation12_spill] sm:$0xff] %v7090_v12  ;;  %v3558_v19 = vpop.f32.mrb[52].mxu0  ;;  %v3110_v35 = vpop.f32.mrb[117].mxu1 }
 0x2cb   : > { %v7094_v22 = vadd.f32 %v5333_v38, %v3558_v19  ;;  %v3560_v29 = vpop.f32.mrb[53].mxu0  ;;  %v7096_v18 = vpop.f32.mrb[118].mxu1 }
 0x2cc   : > { %7347 = vst [vmem:[#allocation13_spill] sm:$0xff] %v7096_v18  ;;  %v3561_v8 = vpop.f32.mrb[54].mxu0  ;;  %v3113_v9 = vpop.f32.mrb[119].mxu1 }
 0x2cd   : > { %v7098_v27 = vadd.f32 %v5335_v42, %v3561_v8  ;;  %v3563_v1 = vpop.f32.mrb[55].mxu0 }
 0x2d1   : > { %v7102_v23 = vpop.f32.mrb[120].mxu1 }
 0x2d2   : > { %7348 = vst [vmem:[#allocation14_spill] sm:$0xff] %v7102_v23  ;;  %v3566_v12 = vpop.f32.mrb[56].mxu0  ;;  %v3118_v35 = vpop.f32.mrb[121].mxu1 }
 0x2d3   : > { %v7106_v19 = vadd.f32 %v5337_v47, %v3566_v12  ;;  %v3568_v38 = vpop.f32.mrb[57].mxu0  ;;  %v7108_v29 = vpop.f32.mrb[122].mxu1 }
 0x2d4   : > { %7349 = vst [vmem:[#allocation15_spill] sm:$0xff] %v7108_v29  ;;  %v3569_v18 = vpop.f32.mrb[58].mxu0  ;;  %v3121_v9 = vpop.f32.mrb[123].mxu1 }
 0x2d5   : > { %v7110_v8 = vadd.f32 %v5339_v53, %v3569_v18  ;;  %v3571_v42 = vpop.f32.mrb[59].mxu0 }
 0x2d7   : > { %7350 = vst [vmem:[#allocation16_spill] sm:$0xff] %v7110_v8 }
 0x2d9   : > { %v7114_v1 = vpop.f32.mrb[124].mxu1 }
 0x2da   : > { %7351 = vst [vmem:[#allocation17_spill] sm:$0xff] %v7114_v1  ;;  %v3574_v23 = vpop.f32.mrb[60].mxu0  ;;  %v3126_v35 = vpop.f32.mrb[125].mxu1 }
 0x2db   : > { %v7118_v12 = vadd.f32 %v5341_v61, %v3574_v23  ;;  %v3576_v47 = vpop.f32.mrb[61].mxu0  ;;  %v7120_v38 = vpop.f32.mrb[126].mxu1 }
 0x2dc   : > { %7352 = vst [vmem:[#allocation18_spill] sm:$0xff] %v7120_v38  ;;  %v3577_v9 = vpop.f32.mrb[62].mxu0  ;;  %v3129_v18 = vpop.f32.mrb[127].mxu1 }
 0x2dd   : > { %v7122_v53 = vadd.f32 %v5343_v3, %v3577_v9  ;;  %v3579_v42 = vpop.f32.mrb[63].mxu0 }
 0x2e1   : > { %v5187_v1 = vpop.f32.mrb[128].mxu1 }
 0x2e2   : > { %v3582_v29 = vpop.f32.mrb[64].mxu0  ;;  %v3752_v35 = vadd.f32 %v6937_v0, %v5187_v1  ;;  %v3743_v36 = vpop.f32.mrb[129].mxu1 }
 0x2e3   : > { %v7129_v23 = vadd.f32 %v5345_v13, %v3582_v29  ;;  %v3584_v61 = vpop.f32.mrb[65].mxu0  ;;  %v3744_v47 = vadd.f32 %v6921_v37, %v3743_v36  ;;  %v5188_v18 = vpop.f32.mrb[130].mxu1 }
 0x2e4   : > { %v3585_v3 = vpop.f32.mrb[66].mxu0  ;;  %v3755_v9 = vadd.f32 %v6944_v57, %v5188_v18  ;;  %v3746_v42 = vpop.f32.mrb[131].mxu1  ;;  %v4000_v1 = vmax.f32 %v3752_v35, 0.0  ;;  %v5349_v57 = vadd.f32 %v6912_v26, %v6932_v54  ;;  %v5351_v35 = vadd.f32 %v6912_v26, %v6939_v7 }
 0x2e5   : > { %v7134_v31 = vadd.f32 %v5347_v17, %v3585_v3  ;;  %v3587_v38 = vpop.f32.mrb[67].mxu0  ;;  %v3747_v0 = vadd.f32 %v6928_v49, %v3746_v42  ;;  %v3998_v8 = vmax.f32 %v3744_v47, 0.0 }
 0x2e6   : > { %v4001_v30 = vmax.f32 %v3755_v9, 0.0 }
 0x2e7   : > { %v3999_v37 = vmax.f32 %v3747_v0, 0.0 }
 0x2e8   : > { %v4946_v41 = vpack.c.bf16 %v4001_v30, %v4000_v1 }
 0x2e9   : > { %v4941_v36 = vpack.c.bf16 %v3999_v37, %v3998_v8  ;;  %v5191_v29 = vpop.f32.mrb[132].mxu1 }
 0x2ea   : > { %5098 = vst [vmem:[%s7140_s20 + $0x8] sm:$0xff] %v4946_v41   ;;  %v3590_v38 = vpop.f32.mrb[68].mxu0  ;;  %v3768_v49 = vadd.f32 %v6969_v4, %v5191_v29  ;;  %v3759_v13 = vpop.f32.mrb[133].mxu1 }
 0x2eb   : > { %4942 = vst [vmem:[%s7140_s20] sm:$0xff] %v4941_v36   ;;  %v7149_v17 = vadd.f32 %v5349_v57, %v3590_v38  ;;  %v3592_v61 = vpop.f32.mrb[69].mxu0  ;;  %v3760_v47 = vadd.f32 %v6953_v34, %v3759_v13  ;;  %v5192_v30 = vpop.f32.mrb[134].mxu1  ;;  %v5353_v34 = vadd.f32 %v6912_v26, %v6948_v24  ;;  %v5355_v38 = vadd.f32 %v6912_v26, %v6955_v40 }
 0x2ec   : > { %v3593_v18 = vpop.f32.mrb[70].mxu0  ;;  %v3771_v54 = vadd.f32 %v6976_v11, %v5192_v30  ;;  %v3762_v8 = vpop.f32.mrb[135].mxu1  ;;  %v4004_v42 = vmax.f32 %v3768_v49, 0.0 }
 0x2ed   : > { %v7153_v3 = vadd.f32 %v5351_v35, %v3593_v18  ;;  %v3595_v4 = vpop.f32.mrb[71].mxu0  ;;  %v3763_v9 = vadd.f32 %v6960_v2, %v3762_v8  ;;  %v4002_v0 = vmax.f32 %v3760_v47, 0.0 }
 0x2ee   : > { %v4005_v7 = vmax.f32 %v3771_v54, 0.0 }
 0x2ef   : > { %v4003_v1 = vmax.f32 %v3763_v9, 0.0 }
 0x2f0   : > { %v4956_v37 = vpack.c.bf16 %v4005_v7, %v4004_v42 }
 0x2f1   : > { %v4951_v41 = vpack.c.bf16 %v4003_v1, %v4002_v0  ;;  %v5195_v57 = vpop.f32.mrb[136].mxu1 }
 0x2f2   : > { %5100 = vst [vmem:[%s7140_s20 + $0x18] sm:$0xff] %v4956_v37   ;;  %v3598_v36 = vpop.f32.mrb[72].mxu0  ;;  %v3784_v11 = vadd.f32 %v6998_v15, %v5195_v57  ;;  %v3775_v29 = vpop.f32.mrb[137].mxu1  ;;  %v5359_v37 = vadd.f32 %v6912_v26, %v6971_v10 }
 0x2f3   : > { %5099 = vst [vmem:[%s7140_s20 + $0x10] sm:$0xff] %v4951_v41   ;;  %v7163_v2 = vadd.f32 %v5353_v34, %v3598_v36  ;;  %v3600_v49 = vpop.f32.mrb[73].mxu0  ;;  %v3776_v13 = vadd.f32 %v6985_v43, %v3775_v29  ;;  %v5196_v35 = vpop.f32.mrb[138].mxu1  ;;  %v5357_v43 = vadd.f32 %v6912_v26, %v6964_v52 }
 0x2f4   : > { %v3601_v61 = vpop.f32.mrb[74].mxu0  ;;  %v3787_v24 = vadd.f32 %v7002_v25, %v5196_v35  ;;  %v3778_v47 = vpop.f32.mrb[139].mxu1  ;;  %v4008_v54 = vmax.f32 %v3784_v11, 0.0 }
 0x2f5   : > { %v7167_v30 = vadd.f32 %v5355_v38, %v3601_v61  ;;  %v3603_v15 = vpop.f32.mrb[75].mxu0  ;;  %v3779_v18 = vadd.f32 %v6990_v55, %v3778_v47  ;;  %v4006_v8 = vmax.f32 %v3776_v13, 0.0 }
 0x2f6   : > { %v4009_v40 = vmax.f32 %v3787_v24, 0.0 }
 0x2f7   : > { %v4007_v4 = vmax.f32 %v3779_v18, 0.0 }
 0x2f8   : > { %v4966_v9 = vpack.c.bf16 %v4009_v40, %v4008_v54  ;;  %v5363_v54 = vadd.f32 %v6912_v26, %v6987_v46 }
 0x2f9   : > { %v4961_v42 = vpack.c.bf16 %v4007_v4, %v4006_v8  ;;  %v5199_v7 = vpop.f32.mrb[140].mxu1 }
 0x2fa   : > { %5102 = vst [vmem:[%s7140_s20 + $0x28] sm:$0xff] %v4966_v9   ;;  %v3606_v0 = vpop.f32.mrb[76].mxu0  ;;  %v3800_v25 = vadd.f32 %v7022_v16, %v5199_v7  ;;  %v3791_v1 = vpop.f32.mrb[141].mxu1 }
 0x2fb   : > { %5101 = vst [vmem:[%s7140_s20 + $0x20] sm:$0xff] %v4961_v42   ;;  %v7177_v55 = vadd.f32 %v5357_v43, %v3606_v0  ;;  %v3608_v34 = vpop.f32.mrb[77].mxu0  ;;  %v3792_v41 = vadd.f32 %v7010_v6, %v3791_v1  ;;  %v5200_v57 = vpop.f32.mrb[142].mxu1  ;;  %v5361_v6 = vadd.f32 %v6912_v26, %v6980_v28 }
 0x2fc   : > { %v3609_v36 = vpop.f32.mrb[78].mxu0  ;;  %v3803_v52 = vadd.f32 %v7026_v33, %v5200_v57  ;;  %v3794_v11 = vpop.f32.mrb[143].mxu1  ;;  %v4012_v49 = vmax.f32 %v3800_v25, 0.0 }
 0x2fd   : > { %v7181_v29 = vadd.f32 %v5359_v37, %v3609_v36  ;;  %v3611_v16 = vpop.f32.mrb[79].mxu0  ;;  %v3795_v38 = vadd.f32 %v7014_v56, %v3794_v11  ;;  %v4010_v13 = vmax.f32 %v3792_v41, 0.0 }
 0x2fe   : > { %v4013_v10 = vmax.f32 %v3803_v52, 0.0  ;;  %v5367_v52 = vadd.f32 %v6912_v26, %v7000_v20 }
 0x2ff   : > { %v4011_v35 = vmax.f32 %v3795_v38, 0.0 }
 0x300   : > { %v4976_v61 = vpack.c.bf16 %v4013_v10, %v4012_v49 }
 0x301   : > { %v4971_v24 = vpack.c.bf16 %v4011_v35, %v4010_v13  ;;  %v5203_v47 = vpop.f32.mrb[144].mxu1 }
 0x302   : > { %5104 = vst [vmem:[%s7140_s20 + $0x38] sm:$0xff] %v4976_v61   ;;  %v3614_v15 = vpop.f32.mrb[80].mxu0  ;;  %v3816_v33 = vadd.f32 %v7046_v44, %v5203_v47  ;;  %v3807_v18 = vpop.f32.mrb[145].mxu1 }
 0x303   : > { %5103 = vst [vmem:[%s7140_s20 + $0x30] sm:$0xff] %v4971_v24   ;;  %v7191_v56 = vadd.f32 %v5361_v6, %v3614_v15  ;;  %v3616_v40 = vpop.f32.mrb[81].mxu0  ;;  %v3808_v8 = vadd.f32 %v7034_v5, %v3807_v18  ;;  %v5204_v4 = vpop.f32.mrb[146].mxu1  ;;  %v5365_v5 = vadd.f32 %v6912_v26, %v6994_v58 }
 0x304   : > { %v3617_v9 = vpop.f32.mrb[82].mxu0  ;;  %v3819_v28 = vadd.f32 %v7050_v48, %v5204_v4  ;;  %v3810_v43 = vpop.f32.mrb[147].mxu1  ;;  %v4016_v0 = vmax.f32 %v3816_v33, 0.0  ;;  %v5371_v40 = vadd.f32 %v6912_v26, %v7012_v50 }
 0x305   : > { %v7195_v42 = vadd.f32 %v5363_v54, %v3617_v9  ;;  %v3619_v44 = vpop.f32.mrb[83].mxu0  ;;  %v3811_v7 = vadd.f32 %v7038_v39, %v3810_v43  ;;  %v4014_v25 = vmax.f32 %v3808_v8, 0.0 }
 0x306   : > { %v4017_v46 = vmax.f32 %v3819_v28, 0.0 }
 0x307   : > { %v4015_v1 = vmax.f32 %v3811_v7, 0.0 }
 0x308   : > { %v4986_v37 = vpack.c.bf16 %v4017_v46, %v4016_v0 }
 0x309   : > { %v4981_v34 = vpack.c.bf16 %v4015_v1, %v4014_v25  ;;  %v5207_v41 = vpop.f32.mrb[148].mxu1 }
 0x30a   : > { %5106 = vst [vmem:[%s7140_s20 + $0x48] sm:$0xff] %v4986_v37   ;;  %v3622_v57 = vpop.f32.mrb[84].mxu0  ;;  %v3832_v48 = vadd.f32 %v7070_v14, %v5207_v41  ;;  %v3823_v36 = vpop.f32.mrb[149].mxu1 }
 0x30b   : > { %5105 = vst [vmem:[%s7140_s20 + $0x40] sm:$0xff] %v4981_v34   ;;  %v7205_v39 = vadd.f32 %v5365_v5, %v3622_v57  ;;  %v3624_v11 = vpop.f32.mrb[85].mxu0  ;;  %v3824_v16 = vadd.f32 %v7058_v59, %v3823_v36  ;;  %v5208_v38 = vpop.f32.mrb[150].mxu1  ;;  %v5369_v59 = vadd.f32 %v6912_v26, %v7006_v32  ;;  %v5375_v57 = vadd.f32 %v6912_v26, %v7024_v60 }
 0x30c   : > { %v3625_v49 = vpop.f32.mrb[86].mxu0  ;;  %v3835_v58 = vadd.f32 %v7074_v51, %v5208_v38  ;;  %v3826_v10 = vpop.f32.mrb[151].mxu1  ;;  %v4020_v61 = vmax.f32 %v3832_v48, 0.0 }
 0x30d   : > { %v7209_v13 = vadd.f32 %v5367_v52, %v3625_v49  ;;  %v3627_v14 = vpop.f32.mrb[87].mxu0  ;;  %v3827_v35 = vadd.f32 %v7062_v63, %v3826_v10  ;;  %v4018_v6 = vmax.f32 %v3824_v16, 0.0  ;;  %v7353_v49 = vld [vmem:[#allocation16_spill] sm:$0xff] }
 0x30e   : > { %v4021_v20 = vmax.f32 %v3835_v58, 0.0 }
 0x30f   : > { %v4019_v24 = vmax.f32 %v3827_v35, 0.0 }
 0x310   : > { %v4996_v47 = vpack.c.bf16 %v4021_v20, %v4020_v61  ;;  %v7354_v20 = vld [vmem:[#allocation2_spill] sm:$0xff] }
 0x311   : > { %v4991_v15 = vpack.c.bf16 %v4019_v24, %v4018_v6  ;;  %v5211_v33 = vpop.f32.mrb[152].mxu1 }
 0x312   : > { %5108 = vst [vmem:[%s7140_s20 + $0x58] sm:$0xff] %v4996_v47   ;;  %v3630_v18 = vpop.f32.mrb[88].mxu0  ;;  %v3848_v51 = vadd.f32 %v7094_v22, %v5211_v33  ;;  %v3839_v54 = vpop.f32.mrb[153].mxu1 }
 0x313   : > { %5107 = vst [vmem:[%s7140_s20 + $0x50] sm:$0xff] %v4991_v15   ;;  %v7219_v63 = vadd.f32 %v5369_v59, %v3630_v18  ;;  %v3632_v8 = vpop.f32.mrb[89].mxu0  ;;  %v3840_v4 = vadd.f32 %v7082_v21, %v3839_v54  ;;  %v5212_v9 = vpop.f32.mrb[154].mxu1  ;;  %v5373_v21 = vadd.f32 %v6912_v26, %v7018_v62  ;;  %v7355_v15 = vld [vmem:[#allocation3_spill] sm:$0xff] }
 0x314   : > { %v3633_v28 = vpop.f32.mrb[90].mxu0  ;;  %v3851_v32 = vadd.f32 %v7098_v27, %v5212_v9  ;;  %v3842_v43 = vpop.f32.mrb[155].mxu1  ;;  %v4024_v0 = vmax.f32 %v3848_v51, 0.0  ;;  %v5379_v33 = vadd.f32 %v6912_v26, %v7355_v15 }
 0x315   : > { %v7223_v44 = vadd.f32 %v5371_v40, %v3633_v28  ;;  %v3635_v22 = vpop.f32.mrb[91].mxu0  ;;  %v3843_v7 = vadd.f32 %v7086_v45, %v3842_v43  ;;  %v4022_v46 = vmax.f32 %v3840_v4, 0.0 }
 0x316   : > { %v4025_v50 = vmax.f32 %v3851_v32, 0.0 }
 0x317   : > { %v4023_v25 = vmax.f32 %v3843_v7, 0.0 }
 0x318   : > { %v5006_v1 = vpack.c.bf16 %v4025_v50, %v4024_v0 }
 0x319   : > { %v5001_v37 = vpack.c.bf16 %v4023_v25, %v4022_v46  ;;  %v5215_v5 = vpop.f32.mrb[156].mxu1  ;;  %v7356_v46 = vld [vmem:[#allocation4_spill] sm:$0xff] }
 0x31a   : > { %5110 = vst [vmem:[%s7140_s20 + $0x68] sm:$0xff] %v5006_v1   ;;  %v3638_v34 = vpop.f32.mrb[92].mxu0  ;;  %v3864_v27 = vadd.f32 %v7118_v12, %v5215_v5  ;;  %v3855_v41 = vpop.f32.mrb[157].mxu1  ;;  %v7357_v5 = vld [vmem:[#allocation5_spill] sm:$0xff] }
 0x31b   : > { %5109 = vst [vmem:[%s7140_s20 + $0x60] sm:$0xff] %v5001_v37   ;;  %v7233_v45 = vadd.f32 %v5373_v21, %v3638_v34  ;;  %v3640_v48 = vpop.f32.mrb[93].mxu0  ;;  %v3856_v36 = vadd.f32 %v7106_v19, %v3855_v41  ;;  %v5216_v52 = vpop.f32.mrb[158].mxu1  ;;  %v5377_v19 = vadd.f32 %v6912_v26, %v7354_v20  ;;  %v5383_v34 = vadd.f32 %v6912_v26, %v7357_v5 }
 0x31c   : > { %v3641_v11 = vpop.f32.mrb[94].mxu0  ;;  %v3867_v62 = vadd.f32 %v7122_v53, %v5216_v52  ;;  %v3858_v16 = vpop.f32.mrb[159].mxu1  ;;  %v4028_v10 = vmax.f32 %v3864_v27, 0.0 }
 0x31d   : > { %v7237_v38 = vadd.f32 %v5375_v57, %v3641_v11  ;;  %v3643_v12 = vpop.f32.mrb[95].mxu0  ;;  %v3859_v58 = vadd.f32 %v7353_v49, %v3858_v16  ;;  %v4026_v14 = vmax.f32 %v3856_v36, 0.0 }
 0x31e   : > { %v4029_v60 = vmax.f32 %v3867_v62, 0.0 }
 0x31f   : > { %v4027_v35 = vmax.f32 %v3859_v58, 0.0 }
 0x320   : > { %v5016_v61 = vpack.c.bf16 %v4029_v60, %v4028_v10  ;;  %v7358_v60 = vld [vmem:[#allocation6_spill] sm:$0xff] }
 0x321   : > { %v5011_v6 = vpack.c.bf16 %v4027_v35, %v4026_v14  ;;  %v5219_v24 = vpop.f32.mrb[160].mxu1 }
 0x322   : > { %5112 = vst [vmem:[%s7140_s20 + $0x78] sm:$0xff] %v5016_v61   ;;  %v3646_v47 = vpop.f32.mrb[96].mxu0  ;;  %v3880_v53 = vadd.f32 %v7149_v17, %v5219_v24  ;;  %v3871_v59 = vpop.f32.mrb[161].mxu1 }
 0x323   : > { %5111 = vst [vmem:[%s7140_s20 + $0x70] sm:$0xff] %v5011_v6   ;;  %v7247_v18 = vadd.f32 %v5377_v19, %v3646_v47  ;;  %v3648_v51 = vpop.f32.mrb[97].mxu0  ;;  %v3872_v54 = vadd.f32 %v7129_v23, %v3871_v59  ;;  %v5220_v40 = vpop.f32.mrb[162].mxu1  ;;  %v5381_v23 = vadd.f32 %v6912_v26, %v7356_v46  ;;  %v7359_v19 = vld [vmem:[#allocation7_spill] sm:$0xff] }
 0x324   : > { %v3649_v8 = vpop.f32.mrb[98].mxu0  ;;  %v3883_v4 = vadd.f32 %v7153_v3, %v5220_v40  ;;  %v3874_v9 = vpop.f32.mrb[163].mxu1  ;;  %v4032_v43 = vmax.f32 %v3880_v53, 0.0  ;;  %v5387_v6 = vadd.f32 %v6912_v26, %v7359_v19 }
 0x325   : > { %v7251_v28 = vadd.f32 %v5379_v33, %v3649_v8  ;;  %v3651_v17 = vpop.f32.mrb[99].mxu0  ;;  %v3875_v32 = vadd.f32 %v7134_v31, %v3874_v9  ;;  %v4030_v7 = vmax.f32 %v3872_v54, 0.0 }
 0x326   : > { %v4033_v22 = vmax.f32 %v3883_v4, 0.0 }
 0x327   : > { %v4031_v0 = vmax.f32 %v3875_v32, 0.0  ;;  %v7360_v32 = vld [vmem:[#allocation8_spill] sm:$0xff] }
 0x328   : > { %v5026_v50 = vpack.c.bf16 %v4033_v22, %v4032_v43 }
 0x329   : > { %v5021_v25 = vpack.c.bf16 %v4031_v0, %v4030_v7  ;;  %v5223_v1 = vpop.f32.mrb[164].mxu1 }
 0x32a   : > { %5114 = vst [vmem:[%s7140_s20 + $0x88] sm:$0xff] %v5026_v50   ;;  %v3654_v21 = vpop.f32.mrb[100].mxu0  ;;  %v3896_v3 = vadd.f32 %v7177_v55, %v5223_v1  ;;  %v3887_v37 = vpop.f32.mrb[165].mxu1  ;;  %v7361_v50 = vld [vmem:[#allocation9_spill] sm:$0xff] }
 0x32b   : > { %5113 = vst [vmem:[%s7140_s20 + $0x80] sm:$0xff] %v5021_v25   ;;  %v7261_v31 = vadd.f32 %v5381_v23, %v3654_v21  ;;  %v3656_v27 = vpop.f32.mrb[101].mxu0  ;;  %v3888_v41 = vadd.f32 %v7163_v2, %v3887_v37  ;;  %v5224_v57 = vpop.f32.mrb[166].mxu1  ;;  %v5385_v2 = vadd.f32 %v6912_v26, %v7358_v60  ;;  %v5391_v46 = vadd.f32 %v6912_v26, %v7361_v50 }
 0x32c   : > { %v3657_v48 = vpop.f32.mrb[102].mxu0  ;;  %v3899_v36 = vadd.f32 %v7181_v29, %v5224_v57  ;;  %v3890_v52 = vpop.f32.mrb[167].mxu1  ;;  %v4036_v16 = vmax.f32 %v3896_v3, 0.0 }
 0x32d   : > { %v7265_v11 = vadd.f32 %v5383_v34, %v3657_v48  ;;  %v3659_v55 = vpop.f32.mrb[103].mxu0  ;;  %v3891_v62 = vadd.f32 %v7167_v30, %v3890_v52  ;;  %v4034_v49 = vmax.f32 %v3888_v41, 0.0 }
 0x32e   : > { %v4037_v12 = vmax.f32 %v3899_v36, 0.0  ;;  %v7362_v36 = vld [vmem:[#allocation10_spill] sm:$0xff] }
 0x32f   : > { %v4035_v58 = vmax.f32 %v3891_v62, 0.0 }
 0x330   : > { %v5036_v10 = vpack.c.bf16 %v4037_v12, %v4036_v16  ;;  %v7363_v12 = vld [vmem:[#allocation11_spill] sm:$0xff] }
 0x331   : > { %v5031_v14 = vpack.c.bf16 %v4035_v58, %v4034_v49  ;;  %v5227_v35 = vpop.f32.mrb[168].mxu1 }
 0x332   : > { %5116 = vst [vmem:[%s7140_s20 + $0x98] sm:$0xff] %v5036_v10   ;;  %v3662_v61 = vpop.f32.mrb[104].mxu0  ;;  %v3912_v29 = vadd.f32 %v7205_v39, %v5227_v35  ;;  %v3903_v20 = vpop.f32.mrb[169].mxu1 }
 0x333   : > { %5115 = vst [vmem:[%s7140_s20 + $0x90] sm:$0xff] %v5031_v14   ;;  %v7275_v30 = vadd.f32 %v5385_v2, %v3662_v61  ;;  %v3664_v24 = vpop.f32.mrb[105].mxu0  ;;  %v3904_v47 = vadd.f32 %v7191_v56, %v3903_v20  ;;  %v5228_v53 = vpop.f32.mrb[170].mxu1  ;;  %v5389_v56 = vadd.f32 %v6912_v26, %v7360_v32 }
 0x334   : > { %v3665_v59 = vpop.f32.mrb[106].mxu0  ;;  %v3915_v15 = vadd.f32 %v7209_v13, %v5228_v53  ;;  %v3906_v33 = vpop.f32.mrb[171].mxu1  ;;  %v4040_v40 = vmax.f32 %v3912_v29, 0.0 }
 0x335   : > { %v7279_v51 = vadd.f32 %v5387_v6, %v3665_v59  ;;  %v3667_v39 = vpop.f32.mrb[107].mxu0  ;;  %v3907_v54 = vadd.f32 %v7195_v42, %v3906_v33  ;;  %v4038_v4 = vmax.f32 %v3904_v47, 0.0  ;;  %v7364_v59 = vld [vmem:[#allocation12_spill] sm:$0xff] }
 0x336   : > { %v4041_v8 = vmax.f32 %v3915_v15, 0.0 }
 0x337   : > { %v4039_v9 = vmax.f32 %v3907_v54, 0.0 }
 0x338   : > { %v5046_v17 = vpack.c.bf16 %v4041_v8, %v4040_v40  ;;  %v7365_v40 = vld [vmem:[#allocation13_spill] sm:$0xff] }
 0x339   : > { %v5041_v43 = vpack.c.bf16 %v4039_v9, %v4038_v4  ;;  %v5231_v22 = vpop.f32.mrb[172].mxu1 }
 0x33a   : > { %5118 = vst [vmem:[%s7140_s20 + $0xa8] sm:$0xff] %v5046_v17   ;;  %v3670_v7 = vpop.f32.mrb[108].mxu0  ;;  %v3928_v13 = vadd.f32 %v7233_v45, %v5231_v22  ;;  %v3919_v0 = vpop.f32.mrb[173].mxu1 }
 0x33b   : > { %5117 = vst [vmem:[%s7140_s20 + $0xa0] sm:$0xff] %v5041_v43   ;;  %v5390_v42 = vadd.f32 %v5389_v56, %v3670_v7  ;;  %v3672_v23 = vpop.f32.mrb[109].mxu0  ;;  %v3920_v25 = vadd.f32 %v7219_v63, %v3919_v0  ;;  %v5232_v1 = vpop.f32.mrb[174].mxu1  ;;  %v7295_v63 = vld [vmem:[%s7334_s2] ss:$0 sm:$0xff] }
 0x33c   : > { %v3673_v21 = vpop.f32.mrb[110].mxu0  ;;  %v3931_v3 = vadd.f32 %v7237_v38, %v5232_v1  ;;  %v3922_v37 = vpop.f32.mrb[175].mxu1  ;;  %v4044_v27 = vmax.f32 %v3928_v13, 0.0  ;;  %v5393_v52 = vadd.f32 %v7295_v63, %v7362_v36  ;;  %v5395_v49 = vadd.f32 %v7295_v63, %v7363_v12 }
 0x33d   : > { %v5392_v5 = vadd.f32 %v5391_v46, %v3673_v21  ;;  %v3675_v34 = vpop.f32.mrb[111].mxu0  ;;  %v3923_v45 = vadd.f32 %v7223_v44, %v3922_v37  ;;  %v4042_v57 = vmax.f32 %v3920_v25, 0.0  ;;  %v5397_v15 = vadd.f32 %v7295_v63, %v7364_v59  ;;  %v7366_v25 = vld [vmem:[#allocation14_spill] sm:$0xff] }
 0x33e   : > { %v4045_v41 = vmax.f32 %v3931_v3, 0.0  ;;  %v5399_v8 = vadd.f32 %v7295_v63, %v7365_v40  ;;  %v5401_v1 = vadd.f32 %v7295_v63, %v7366_v25  ;;  %v7367_v34 = vld [vmem:[#allocation15_spill] sm:$0xff] }
 0x33f   : > { %v4043_v26 = vmax.f32 %v3923_v45, 0.0  ;;  %v5403_v45 = vadd.f32 %v7295_v63, %v7367_v34 }
 0x340   : > { %v5056_v48 = vpack.c.bf16 %v4045_v41, %v4044_v27 }
 0x341   : > { %v5051_v38 = vpack.c.bf16 %v4043_v26, %v4042_v57  ;;  %v5235_v55 = vpop.f32.mrb[176].mxu1 }
 0x342   : > { %5120 = vst [vmem:[%s7140_s20 + $0xb8] sm:$0xff] %v5056_v48   ;;  %v3678_v62 = vpop.f32.mrb[112].mxu0  ;;  %v3944_v16 = vadd.f32 %v7261_v31, %v5235_v55  ;;  %v3935_v44 = vpop.f32.mrb[177].mxu1 }
 0x343   : > { %5119 = vst [vmem:[%s7140_s20 + $0xb0] sm:$0xff] %v5051_v38   ;;  %v5394_v58 = vadd.f32 %v5393_v52, %v3678_v62  ;;  %v3680_v10 = vpop.f32.mrb[113].mxu0  ;;  %v3936_v60 = vadd.f32 %v7247_v18, %v3935_v44  ;;  %v5236_v2 = vpop.f32.mrb[178].mxu1 }
 0x344   : > { %v3681_v14 = vpop.f32.mrb[114].mxu0  ;;  %v3947_v35 = vadd.f32 %v7265_v11, %v5236_v2  ;;  %v3938_v61 = vpop.f32.mrb[179].mxu1  ;;  %v4048_v19 = vmax.f32 %v3944_v16, 0.0  ;;  %v7368_v10 = vld [vmem:[#allocation17_spill] sm:$0xff] }
 0x345   : > { %v5396_v29 = vadd.f32 %v5395_v49, %v3681_v14  ;;  %v3683_v20 = vpop.f32.mrb[115].mxu0  ;;  %v3939_v31 = vadd.f32 %v7251_v28, %v3938_v61  ;;  %v4046_v24 = vmax.f32 %v3936_v60, 0.0  ;;  %v5405_v60 = vadd.f32 %v7295_v63, %v7368_v10  ;;  %v7369_v61 = vld [vmem:[#allocation18_spill] sm:$0xff] }
 0x346   : > { %v4049_v6 = vmax.f32 %v3947_v35, 0.0  ;;  %v5407_v20 = vadd.f32 %v7295_v63, %v7369_v61 }
 0x347   : > { %v4047_v47 = vmax.f32 %v3939_v31, 0.0 }
 0x348   : > { %v5066_v53 = vpack.c.bf16 %v4049_v6, %v4048_v19 }
 0x349   : > { %v5061_v18 = vpack.c.bf16 %v4047_v47, %v4046_v24  ;;  %v5239_v33 = vpop.f32.mrb[180].mxu1 }
 0x34a   : > { %5122 = vst [vmem:[%s7140_s20 + $0xc8] sm:$0xff] %v5066_v53   ;;  %v3686_v39 = vpop.f32.mrb[116].mxu0  ;;  %v3960_v54 = vadd.f32 %v5390_v42, %v5239_v33  ;;  %v3951_v11 = vpop.f32.mrb[181].mxu1 }
 0x34b   : > { %5121 = vst [vmem:[%s7140_s20 + $0xc0] sm:$0xff] %v5061_v18   ;;  %v5398_v4 = vadd.f32 %v5397_v15, %v3686_v39  ;;  %v3688_v28 = vpop.f32.mrb[117].mxu0  ;;  %v3952_v9 = vadd.f32 %v7275_v30, %v3951_v11  ;;  %v5240_v17 = vpop.f32.mrb[182].mxu1 }
 0x34c   : > { %v3689_v32 = vpop.f32.mrb[118].mxu0  ;;  %v3963_v56 = vadd.f32 %v5392_v5, %v5240_v17  ;;  %v3954_v43 = vpop.f32.mrb[183].mxu1  ;;  %v4052_v0 = vmax.f32 %v3960_v54, 0.0 }
 0x34d   : > { %v5400_v22 = vadd.f32 %v5399_v8, %v3689_v32  ;;  %v3691_v7 = vpop.f32.mrb[119].mxu0  ;;  %v3955_v13 = vadd.f32 %v7279_v51, %v3954_v43  ;;  %v4050_v46 = vmax.f32 %v3952_v9, 0.0 }
 0x34e   : > { %v4053_v50 = vmax.f32 %v3963_v56, 0.0 }
 0x34f   : > { %v4051_v42 = vmax.f32 %v3955_v13, 0.0 }
 0x350   : > { %v5076_v23 = vpack.c.bf16 %v4053_v50, %v4052_v0 }
 0x351   : > { %v5071_v21 = vpack.c.bf16 %v4051_v42, %v4050_v46  ;;  %v5243_v30 = vpop.f32.mrb[184].mxu1 }
 0x352   : > { %5124 = vst [vmem:[%s7140_s20 + $0xd8] sm:$0xff] %v5076_v23   ;;  %v3694_v3 = vpop.f32.mrb[120].mxu0  ;;  %v3976_v37 = vadd.f32 %v5398_v4, %v5243_v30  ;;  %v3967_v5 = vpop.f32.mrb[185].mxu1 }
 0x353   : > { %5123 = vst [vmem:[%s7140_s20 + $0xd0] sm:$0xff] %v5071_v21   ;;  %v5402_v27 = vadd.f32 %v5401_v1, %v3694_v3  ;;  %v3696_v51 = vpop.f32.mrb[121].mxu0  ;;  %v3968_v41 = vadd.f32 %v5394_v58, %v3967_v5  ;;  %v5244_v57 = vpop.f32.mrb[186].mxu1 }
 0x354   : > { %v3697_v26 = vpop.f32.mrb[122].mxu0  ;;  %v3979_v48 = vadd.f32 %v5400_v22, %v5244_v57  ;;  %v3970_v36 = vpop.f32.mrb[187].mxu1  ;;  %v4056_v62 = vmax.f32 %v3976_v37, 0.0 }
 0x355   : > { %v5404_v52 = vadd.f32 %v5403_v45, %v3697_v26  ;;  %v3699_v38 = vpop.f32.mrb[123].mxu0  ;;  %v3971_v55 = vadd.f32 %v5396_v29, %v3970_v36  ;;  %v4054_v44 = vmax.f32 %v3968_v41, 0.0 }
 0x356   : > { %v4057_v16 = vmax.f32 %v3979_v48, 0.0 }
 0x357   : > { %v4055_v12 = vmax.f32 %v3971_v55, 0.0 }
 0x358   : > { %v5086_v49 = vpack.c.bf16 %v4057_v16, %v4056_v62 }
 0x359   : > { %v5081_v2 = vpack.c.bf16 %v4055_v12, %v4054_v44  ;;  %v5247_v14 = vpop.f32.mrb[188].mxu1 }
 0x35a   : > { %5126 = vst [vmem:[%s7140_s20 + $0xe8] sm:$0xff] %v5086_v49   ;;  %v3702_v58 = vpop.f32.mrb[124].mxu0  ;;  %v3983_v35 = vpop.f32.mrb[189].mxu1 }
 0x35b   : > { %5125 = vst [vmem:[%s7140_s20 + $0xe0] sm:$0xff] %v5081_v2   ;;  %v5406_v31 = vadd.f32 %v5405_v60, %v3702_v58  ;;  %v3704_v19 = vpop.f32.mrb[125].mxu0  ;;  %v3984_v29 = vadd.f32 %v5402_v27, %v3983_v35  ;;  %v5248_v6 = vpop.f32.mrb[190].mxu1 }
 0x35c   : > { %v3705_v24 = vpop.f32.mrb[126].mxu0  ;;  %v3986_v47 = vpop.f32.mrb[191].mxu1 }
 0x35d   : > { %v3992_v53 = vadd.f32 %v5406_v31, %v5247_v14  ;;  %v5408_v59 = vadd.f32 %v5407_v20, %v3705_v24  ;;  %v3707_v15 = vpop.f32.mrb[127].mxu0  ;;  %v3987_v18 = vadd.f32 %v5404_v52, %v3986_v47  ;;  %v4058_v33 = vmax.f32 %v3984_v29, 0.0 }
 0x35f   : > { %v3995_v39 = vadd.f32 %v5408_v59, %v5248_v6  ;;  %v4059_v54 = vmax.f32 %v3987_v18, 0.0  ;;  %v4060_v11 = vmax.f32 %v3992_v53, 0.0 }
 0x361   : > { %v4061_v40 = vmax.f32 %v3995_v39, 0.0  ;;  %v5091_v8 = vpack.c.bf16 %v4059_v54, %v4058_v33 }
 0x363   : > { %v5096_v63 = vpack.c.bf16 %v4061_v40, %v4060_v11  ;;  %5127 = vst [vmem:[%s7140_s20 + $0xf0] sm:$0xff] %v5091_v8  }
 0x365   : > { %5128 = vst [vmem:[%s7140_s20 + $0xf8] sm:$0xff] %v5096_v63  }
 0x366 PF: > { %s13_s12 = sadd.s32 1, %s6170_s12  }
 0x367   : > { %p10_p4 = scmp.ge.s32.totalorder %s13_s12, 4  }
 0x369   :  { %12 = sbr.rel (!%p10_p4) target bundleno = 1 (0x1), region = 62 }

// kernel: _lambda_.21
= control target key start
LH: loop header
LB: loop body
LE: loop exit
PB: predicated region body
PF: predicated region fallthrough
CT: control target
= control target key end

     0   :  { %s727_s12 = smov 0   ;;  %s809_s0 = inlined_call_operand.vmem [shape: bf16[128,256], index: 0, kind: input, shape index: {}]   ;;  %s810_s1 = inlined_call_operand.vmem [shape: bf16[256,128], index: 1, kind: input, shape index: {}]   ;;  %s811_s2 = inlined_call_operand.vmem [shape: f32[1,128], index: 2, kind: input, shape index: {}]   ;;  %s812_s3 = inlined_call_operand.vmem [shape: bf16[128,128], index: 3, kind: output, shape index: {}]  }
   0x1 LB: > { %s530_s13 = sadd.s32 4294967295, %s705_s12   ;;  %p534_p0 = scmp.ge.s32.totalorder %s705_s12, 1  ;;  %s705_s12 = sphi %s727_s12, %s13_s12  }
   0x2   : > { %p139_p1 = scmp.lt.s32.totalorder %s705_s12, 3 }
   0x4   : > { %p140_p2 = pnand %p534_p0, %p139_p1 }
   0x5   : > { %v671_v0 = vld [vmem:[%s810_s1 + $0x40] sm:$0xff] (!%p140_p2)   ;;  %s535_s16 = sshll.u32 (!%p140_p2), %s530_s13, 3  ;;  %v673_v2 = vld [vmem:[%s810_s1 + $0x48] sm:$0xff] (!%p140_p2)   ;;  %v675_v4 = vld [vmem:[%s810_s1 + $0x50] sm:$0xff] (!%p140_p2)  }
   0x6   : > { %143 = sbr.rel (%p140_p2) target bundleno = 271 (0x10f), region = 32  ;;  %v672_v1 = vld [vmem:[%s810_s1] sm:$0xff] (!%p140_p2)   ;;  %607 = vmatprep.subr.bf16.mxu0 (!%p140_p2), %v671_v0  ;;  %647 = vmatprep.subr.bf16.mxu1 (!%p140_p2), %v671_v0  ;;  %v674_v3 = vld [vmem:[%s810_s1 + $0x8] sm:$0xff] (!%p140_p2)   ;;  %p165_p3 = scmp.lt.s32.totalorder (!%p140_p2), %s535_s16, 15  ;;  %v676_v5 = vld [vmem:[%s810_s1 + $0x10] sm:$0xff] (!%p140_p2)  }
   0x7   : > { %608 = vmatpush3.bf16.msra.mxu0 (!%p140_p2), %v672_v1  ;;  %655 = vmatpush3.bf16.msra.mxu1 (!%p140_p2), %v672_v1  ;;  %v677_v6 = vld [vmem:[%s810_s1 + $0x58] sm:$0xff] (!%p140_p2)   ;;  %v679_v8 = vld [vmem:[%s810_s1 + $0x60] sm:$0xff] (!%p140_p2)   ;;  %v681_v10 = vld [vmem:[%s810_s1 + $0x68] sm:$0xff] (!%p140_p2)  }
   0x8   : > { %609 = vmatprep.subr.bf16.mxu0 (!%p140_p2), %v673_v2  ;;  %648 = vmatprep.subr.bf16.mxu1 (!%p140_p2), %v673_v2  ;;  %v678_v7 = vld [vmem:[%s810_s1 + $0x18] sm:$0xff] (!%p140_p2)   ;;  %v680_v9 = vld [vmem:[%s810_s1 + $0x20] sm:$0xff] (!%p140_p2)   ;;  %v682_v13 = vld [vmem:[%s810_s1 + $0x28] sm:$0xff] (!%p140_p2)  }
   0x9   : > { %v683_v14 = vld [vmem:[%s810_s1 + $0x70] sm:$0xff] (!%p140_p2)   ;;  %v685_v16 = vld [vmem:[%s810_s1 + $0x78] sm:$0xff] (!%p140_p2)   ;;  %v540_v26 = vld [vmem:[%s811_s2] ss:$0 sm:$0xff] (!%p140_p2) }
   0xa   : > { %v684_v15 = vld [vmem:[%s810_s1 + $0x30] sm:$0xff] (!%p140_p2)   ;;  %v686_v17 = vld [vmem:[%s810_s1 + $0x38] sm:$0xff] (!%p140_p2)  }
   0xb   : > { %610 = vmatpush3.bf16.msra.mxu0 (!%p140_p2), %v674_v3  ;;  %656 = vmatpush3.bf16.msra.mxu1 (!%p140_p2), %v674_v3 }
   0xc   : > { %611 = vmatprep.subr.bf16.mxu0 (!%p140_p2), %v675_v4  ;;  %649 = vmatprep.subr.bf16.mxu1 (!%p140_p2), %v675_v4 }
   0xd   : > { %s814_s16 = smov (!%p165_p3, %s535_s16), 15 }
   0xe   : > { %s575_s4 = sshll.u32 %s814_s16, 3  ;;  %s539_s28 = sshll.u32 %s814_s16, 2 }
   0xf   : > { %612 = vmatpush3.bf16.msra.mxu0 %v676_v5  ;;  %657 = vmatpush3.bf16.msra.mxu1 %v676_v5  ;;  %s768_s9 = scalar_lea.vmem %s809_s0, %s575_s4  ;;  %s175_s4 = scalar_lea.vmem %s812_s3, %s539_s28 }
  0x10   : > { %613 = vmatprep.subr.bf16.mxu0 %v677_v6  ;;  %650 = vmatprep.subr.bf16.mxu1 %v677_v6  ;;  %v689_v11 = vld [vmem:[%s768_s9 + $0x4] ss:$8 sps:$4 sm:$0xff]   ;;  %v687_v18 = vld [vmem:[%s768_s9] ss:$8 sps:$4 sm:$0xff]   ;;  %v693_v20 = vld [vmem:[%s768_s9 + $0x14] ss:$8 sps:$4 sm:$0xff]  }
  0x11   : > { %v692_v12 = vld [vmem:[%s768_s9 + $0x24] ss:$8 sps:$4 sm:$0xff]   ;;  %393 = vmatprep.mubr.bf16.mxu0 %v689_v11  ;;  %v690_v19 = vld [vmem:[%s768_s9 + $0x20] ss:$8 sps:$4 sm:$0xff]   ;;  %v695_v21 = vld [vmem:[%s768_s9 + $0x34] ss:$8 sps:$4 sm:$0xff]  }
  0x12   : > { %409 = vmatprep.mubr.bf16.mxu1 %v692_v12  ;;  %v697_v22 = vld [vmem:[%s768_s9 + $0x10] ss:$8 sps:$4 sm:$0xff]  }
  0x13   : > { %614 = vmatpush3.bf16.msra.mxu0 %v678_v7  ;;  %658 = vmatpush3.bf16.msra.mxu1 %v678_v7  ;;  %v698_v23 = vld [vmem:[%s768_s9 + $0x30] ss:$8 sps:$4 sm:$0xff]  }
  0x14   : > { %615 = vmatprep.subr.bf16.mxu0 %v679_v8  ;;  %651 = vmatprep.subr.bf16.mxu1 %v679_v8 }
  0x17   : > { %616 = vmatpush3.bf16.msra.mxu0 %v680_v9  ;;  %659 = vmatpush3.bf16.msra.mxu1 %v680_v9 }
  0x18   : > { %617 = vmatprep.subr.bf16.mxu0 %v681_v10  ;;  %652 = vmatprep.subr.bf16.mxu1 %v681_v10 }
  0x1b   : > { %618 = vmatpush3.bf16.msra.mxu0 %v682_v13  ;;  %660 = vmatpush3.bf16.msra.mxu1 %v682_v13 }
  0x1c   : > { %619 = vmatprep.subr.bf16.mxu0 %v683_v14  ;;  %653 = vmatprep.subr.bf16.mxu1 %v683_v14 }
  0x1f   : > { %620 = vmatpush3.bf16.msra.mxu0 %v684_v15  ;;  %661 = vmatpush3.bf16.msra.mxu1 %v684_v15 }
  0x20   : > { %621 = vmatprep.subr.bf16.mxu0 %v685_v16  ;;  %654 = vmatprep.subr.bf16.mxu1 %v685_v16 }
  0x23   : > { %622 = vmatpush3.bf16.msra.mxu0 %v686_v17  ;;  %662 = vmatpush3.bf16.msra.mxu1 %v686_v17 }
  0x26   : > { %394 = vmatmul.mubr.bf16.vlgmr.msra.gmra.mrb[0].mxu0 %v687_v18  ;;  %410 = vmatmul.mubr.bf16.vlgmr.msra.gmra.mrb[0].mxu1 %v690_v19 }
  0x27   : > { %401 = vmatprep.mubr.bf16.mxu0 %v693_v20  ;;  %417 = vmatprep.mubr.bf16.mxu1 %v695_v21 }
  0x2e   : > { %402 = vmatmul.mubr.bf16.gmra.mrb[4].mxu0 %v697_v22  ;;  %418 = vmatmul.mubr.bf16.gmra.mrb[4].mxu1 %v698_v23 }
  0xf9   : > { %v623_v24 = vpop.f32.mrb[0].mxu0  ;;  %v635_v25 = vpop.f32.mrb[0].mxu1 }
  0xfa   : > { %v624_v27 = vpop.f32.mrb[1].mxu0  ;;  %v636_v28 = vpop.f32.mrb[1].mxu1 }
  0xfb   : > { %v625_v29 = vadd.f32 %v624_v27, %v623_v24  ;;  %v637_v30 = vadd.f32 %v636_v28, %v635_v25  ;;  %v626_v31 = vpop.f32.mrb[2].mxu0  ;;  %v638_v32 = vpop.f32.mrb[2].mxu1 }
  0xfc   : > { %v627_v33 = vpop.f32.mrb[3].mxu0  ;;  %v639_v34 = vpop.f32.mrb[3].mxu1 }
  0xfd   : > { %v396_v35 = vadd.f32 %v625_v29, %v540_v26  ;;  %v412_v36 = vadd.f32 %v637_v30, %v540_v26  ;;  %v628_v37 = vadd.f32 %v627_v33, %v626_v31  ;;  %v640_v38 = vadd.f32 %v639_v34, %v638_v32 }
  0xff   : > { %v399_v39 = vadd.f32 %v628_v37, %v540_v26  ;;  %v415_v40 = vadd.f32 %v640_v38, %v540_v26  ;;  %v426_v41 = vmax.f32 %v396_v35, 0.0  ;;  %v430_v42 = vmax.f32 %v412_v36, 0.0 }
 0x101   : > { %v427_v43 = vmax.f32 %v399_v39, 0.0  ;;  %v431_v44 = vmax.f32 %v415_v40, 0.0  ;;  %v629_v45 = vpop.f32.mrb[4].mxu0  ;;  %v641_v46 = vpop.f32.mrb[4].mxu1 }
 0x102   : > { %v630_v47 = vpop.f32.mrb[5].mxu0  ;;  %v642_v48 = vpop.f32.mrb[5].mxu1 }
 0x103   : > { %v587_v49 = vpack.c.bf16 %v427_v43, %v426_v41  ;;  %v597_v50 = vpack.c.bf16 %v431_v44, %v430_v42  ;;  %v631_v51 = vadd.f32 %v630_v47, %v629_v45  ;;  %v643_v52 = vadd.f32 %v642_v48, %v641_v46  ;;  %v632_v53 = vpop.f32.mrb[6].mxu0  ;;  %v644_v54 = vpop.f32.mrb[6].mxu1 }
 0x104   : > { %v633_v55 = vpop.f32.mrb[7].mxu0  ;;  %v645_v56 = vpop.f32.mrb[7].mxu1 }
 0x105   : > { %588 = vst [vmem:[%s175_s4] sm:$0xff] %v587_v49   ;;  %605 = vst [vmem:[%s175_s4 + $0x10] sm:$0xff] %v597_v50   ;;  %v404_v57 = vadd.f32 %v631_v51, %v540_v26  ;;  %v420_v58 = vadd.f32 %v643_v52, %v540_v26  ;;  %v634_v59 = vadd.f32 %v633_v55, %v632_v53 }
 0x106   : > { %v646_v60 = vadd.f32 %v645_v56, %v644_v54 }
 0x107   : > { %v407_v61 = vadd.f32 %v634_v59, %v540_v26  ;;  %v428_v63 = vmax.f32 %v404_v57, 0.0  ;;  %v432_v0 = vmax.f32 %v420_v58, 0.0 }
 0x108   : > { %v423_v62 = vadd.f32 %v646_v60, %v540_v26 }
 0x109   : > { %v429_v1 = vmax.f32 %v407_v61, 0.0 }
 0x10a   : > { %v433_v2 = vmax.f32 %v423_v62, 0.0 }
 0x10b   : > { %v592_v3 = vpack.c.bf16 %v429_v1, %v428_v63 }
 0x10c   : > { %v602_v4 = vpack.c.bf16 %v433_v2, %v432_v0 }
 0x10d   : > { %604 = vst [vmem:[%s175_s4 + $0x8] sm:$0xff] %v592_v3  }
 0x10e   : > { %606 = vst [vmem:[%s175_s4 + $0x18] sm:$0xff] %v602_v4  }
 0x10f PF: > { %s13_s12 = sadd.s32 1, %s705_s12  }
 0x110   : > { %p10_p4 = scmp.ge.s32.totalorder %s13_s12, 4  }
 0x112   :  { %12 = sbr.rel (!%p10_p4) target bundleno = 1 (0x1), region = 62 }

// kernel: _lambda_.22
= control target key start
LH: loop header
LB: loop body
LE: loop exit
PB: predicated region body
PF: predicated region fallthrough
CT: control target
= control target key end

     0   :  { %s838_s15 = smov 0   ;;  %s933_s0 = inlined_call_operand.vmem [shape: bf16[128,256], index: 0, kind: input, shape index: {}]   ;;  %s934_s1 = inlined_call_operand.vmem [shape: bf16[256,128], index: 1, kind: input, shape index: {}]   ;;  %s935_s2 = inlined_call_operand.vmem [shape: f32[1,128], index: 2, kind: input, shape index: {}]   ;;  %s936_s3 = inlined_call_operand.vmem [shape: bf16[128,128], index: 3, kind: input, shape index: {}]   ;;  %s937_s4 = inlined_call_operand.vmem [shape: bf16[128,128], index: 4, kind: output, shape index: {}]  }
   0x1 LB: > { %s615_s16 = sadd.s32 4294967295, %s811_s15   ;;  %p619_p0 = scmp.ge.s32.totalorder %s811_s15, 1  ;;  %s811_s15 = sphi %s838_s15, %s14_s15  }
   0x2   : > { %p175_p1 = scmp.lt.s32.totalorder %s811_s15, 3 }
   0x4   : > { %p176_p2 = pnand %p619_p0, %p175_p1 }
   0x5   : > { %v777_v0 = vld [vmem:[%s934_s1 + $0x40] sm:$0xff] (!%p176_p2)   ;;  %s620_s19 = sshll.u32 (!%p176_p2), %s615_s16, 3  ;;  %v779_v2 = vld [vmem:[%s934_s1 + $0x48] sm:$0xff] (!%p176_p2)   ;;  %v781_v4 = vld [vmem:[%s934_s1 + $0x50] sm:$0xff] (!%p176_p2)  }
   0x6   : > { %179 = sbr.rel (%p176_p2) target bundleno = 273 (0x111), region = 36  ;;  %v778_v1 = vld [vmem:[%s934_s1] sm:$0xff] (!%p176_p2)   ;;  %713 = vmatprep.subr.bf16.mxu0 (!%p176_p2), %v777_v0  ;;  %753 = vmatprep.subr.bf16.mxu1 (!%p176_p2), %v777_v0  ;;  %v780_v3 = vld [vmem:[%s934_s1 + $0x8] sm:$0xff] (!%p176_p2)   ;;  %p208_p3 = scmp.lt.s32.totalorder (!%p176_p2), %s620_s19, 15  ;;  %v782_v5 = vld [vmem:[%s934_s1 + $0x10] sm:$0xff] (!%p176_p2)  }
   0x7   : > { %714 = vmatpush3.bf16.msra.mxu0 (!%p176_p2), %v778_v1  ;;  %761 = vmatpush3.bf16.msra.mxu1 (!%p176_p2), %v778_v1  ;;  %v783_v6 = vld [vmem:[%s934_s1 + $0x58] sm:$0xff] (!%p176_p2)   ;;  %v785_v8 = vld [vmem:[%s934_s1 + $0x60] sm:$0xff] (!%p176_p2)   ;;  %v787_v10 = vld [vmem:[%s934_s1 + $0x68] sm:$0xff] (!%p176_p2)  }
   0x8   : > { %715 = vmatprep.subr.bf16.mxu0 (!%p176_p2), %v779_v2  ;;  %754 = vmatprep.subr.bf16.mxu1 (!%p176_p2), %v779_v2  ;;  %v784_v7 = vld [vmem:[%s934_s1 + $0x18] sm:$0xff] (!%p176_p2)   ;;  %v786_v9 = vld [vmem:[%s934_s1 + $0x20] sm:$0xff] (!%p176_p2)   ;;  %v788_v13 = vld [vmem:[%s934_s1 + $0x28] sm:$0xff] (!%p176_p2)  }
   0x9   : > { %v789_v14 = vld [vmem:[%s934_s1 + $0x70] sm:$0xff] (!%p176_p2)   ;;  %v791_v16 = vld [vmem:[%s934_s1 + $0x78] sm:$0xff] (!%p176_p2)   ;;  %v627_v28 = vld [vmem:[%s935_s2] ss:$0 sm:$0xff] (!%p176_p2) }
   0xa   : > { %v790_v15 = vld [vmem:[%s934_s1 + $0x30] sm:$0xff] (!%p176_p2)   ;;  %v792_v17 = vld [vmem:[%s934_s1 + $0x38] sm:$0xff] (!%p176_p2)  }
   0xb   : > { %716 = vmatpush3.bf16.msra.mxu0 (!%p176_p2), %v780_v3  ;;  %762 = vmatpush3.bf16.msra.mxu1 (!%p176_p2), %v780_v3 }
   0xc   : > { %717 = vmatprep.subr.bf16.mxu0 (!%p176_p2), %v781_v4  ;;  %755 = vmatprep.subr.bf16.mxu1 (!%p176_p2), %v781_v4 }
   0xd   : > { %s939_s19 = smov (!%p208_p3, %s620_s19), 15 }
   0xe   : > { %s662_s8 = sshll.u32 %s939_s19, 3  ;;  %s624_s30 = sshll.u32 %s939_s19, 2 }
   0xf   : > { %718 = vmatpush3.bf16.msra.mxu0 %v782_v5  ;;  %763 = vmatpush3.bf16.msra.mxu1 %v782_v5  ;;  %s879_s13 = scalar_lea.vmem %s933_s0, %s662_s8  ;;  %s916_s7 = scalar_lea.vmem %s936_s3, %s624_s30 }
  0x10   : > { %719 = vmatprep.subr.bf16.mxu0 %v783_v6  ;;  %756 = vmatprep.subr.bf16.mxu1 %v783_v6  ;;  %v795_v11 = vld [vmem:[%s879_s13 + $0x4] ss:$8 sps:$4 sm:$0xff]   ;;  %v793_v18 = vld [vmem:[%s879_s13] ss:$8 sps:$4 sm:$0xff]   ;;  %v799_v20 = vld [vmem:[%s879_s13 + $0x14] ss:$8 sps:$4 sm:$0xff]   ;;  %s224_s12 = scalar_lea.vmem %s937_s4, %s624_s30 }
  0x11   : > { %v798_v12 = vld [vmem:[%s879_s13 + $0x24] ss:$8 sps:$4 sm:$0xff]   ;;  %442 = vmatprep.mubr.bf16.mxu0 %v795_v11  ;;  %v796_v19 = vld [vmem:[%s879_s13 + $0x20] ss:$8 sps:$4 sm:$0xff]   ;;  %v801_v21 = vld [vmem:[%s879_s13 + $0x34] ss:$8 sps:$4 sm:$0xff]  }
  0x12   : > { %458 = vmatprep.mubr.bf16.mxu1 %v798_v12  ;;  %v803_v22 = vld [vmem:[%s879_s13 + $0x10] ss:$8 sps:$4 sm:$0xff]   ;;  %v672_v24 = vld [vmem:[%s916_s7] sm:$0xff]   ;;  %v707_v53 = vld [vmem:[%s916_s7 + $0x8] sm:$0xff]  }
  0x13   : > { %720 = vmatpush3.bf16.msra.mxu0 %v784_v7  ;;  %764 = vmatpush3.bf16.msra.mxu1 %v784_v7  ;;  %v804_v23 = vld [vmem:[%s879_s13 + $0x30] ss:$8 sps:$4 sm:$0xff]   ;;  %v673_v32 = vunpack.c.l.bf16 %v672_v24  ;;  %v674_v38 = vunpack.c.h.bf16 %v672_v24  ;;  %v677_v1 = vunpack.c.l.bf16 %v707_v53 }
  0x14   : > { %721 = vmatprep.subr.bf16.mxu0 %v785_v8  ;;  %757 = vmatprep.subr.bf16.mxu1 %v785_v8  ;;  %v708_v25 = vld [vmem:[%s916_s7 + $0x10] sm:$0xff]   ;;  %v709_v54 = vld [vmem:[%s916_s7 + $0x18] sm:$0xff]  }
  0x15   : > { %v681_v34 = vunpack.c.l.bf16 %v708_v25  ;;  %v682_v40 = vunpack.c.h.bf16 %v708_v25  ;;  %v685_v2 = vunpack.c.l.bf16 %v709_v54  ;;  %v686_v12 = vunpack.c.h.bf16 %v709_v54 }
  0x17   : > { %722 = vmatpush3.bf16.msra.mxu0 %v786_v9  ;;  %765 = vmatpush3.bf16.msra.mxu1 %v786_v9 }
  0x18   : > { %723 = vmatprep.subr.bf16.mxu0 %v787_v10  ;;  %758 = vmatprep.subr.bf16.mxu1 %v787_v10  ;;  %v678_v10 = vunpack.c.h.bf16 %v707_v53 }
  0x1b   : > { %724 = vmatpush3.bf16.msra.mxu0 %v788_v13  ;;  %766 = vmatpush3.bf16.msra.mxu1 %v788_v13 }
  0x1c   : > { %725 = vmatprep.subr.bf16.mxu0 %v789_v14  ;;  %759 = vmatprep.subr.bf16.mxu1 %v789_v14 }
  0x1f   : > { %726 = vmatpush3.bf16.msra.mxu0 %v790_v15  ;;  %767 = vmatpush3.bf16.msra.mxu1 %v790_v15 }
  0x20   : > { %727 = vmatprep.subr.bf16.mxu0 %v791_v16  ;;  %760 = vmatprep.subr.bf16.mxu1 %v791_v16 }
  0x23   : > { %728 = vmatpush3.bf16.msra.mxu0 %v792_v17  ;;  %768 = vmatpush3.bf16.msra.mxu1 %v792_v17 }
  0x26   : > { %443 = vmatmul.mubr.bf16.vlgmr.msra.gmra.mrb[0].mxu0 %v793_v18  ;;  %459 = vmatmul.mubr.bf16.vlgmr.msra.gmra.mrb[0].mxu1 %v796_v19 }
  0x27   : > { %450 = vmatprep.mubr.bf16.mxu0 %v799_v20  ;;  %466 = vmatprep.mubr.bf16.mxu1 %v801_v21 }
  0x2e   : > { %451 = vmatmul.mubr.bf16.gmra.mrb[4].mxu0 %v803_v22  ;;  %467 = vmatmul.mubr.bf16.gmra.mrb[4].mxu1 %v804_v23 }
  0xf9   : > { %v729_v26 = vpop.f32.mrb[0].mxu0  ;;  %v741_v27 = vpop.f32.mrb[0].mxu1 }
  0xfa   : > { %v730_v29 = vpop.f32.mrb[1].mxu0  ;;  %v742_v30 = vpop.f32.mrb[1].mxu1 }
  0xfb   : > { %v731_v31 = vadd.f32 %v730_v29, %v729_v26  ;;  %v743_v33 = vadd.f32 %v742_v30, %v741_v27  ;;  %v732_v35 = vpop.f32.mrb[2].mxu0  ;;  %v744_v36 = vpop.f32.mrb[2].mxu1 }
  0xfc   : > { %v733_v37 = vpop.f32.mrb[3].mxu0  ;;  %v745_v39 = vpop.f32.mrb[3].mxu1 }
  0xfd   : > { %v445_v41 = vadd.f32 %v731_v31, %v627_v28  ;;  %v461_v42 = vadd.f32 %v743_v33, %v627_v28  ;;  %v734_v43 = vadd.f32 %v733_v37, %v732_v35  ;;  %v746_v44 = vadd.f32 %v745_v39, %v744_v36 }
  0xff   : > { %v491_v45 = vadd.f32 %v673_v32, %v445_v41  ;;  %v495_v46 = vadd.f32 %v681_v34, %v461_v42  ;;  %v448_v47 = vadd.f32 %v734_v43, %v627_v28  ;;  %v464_v48 = vadd.f32 %v746_v44, %v627_v28 }
 0x101   : > { %v492_v49 = vadd.f32 %v674_v38, %v448_v47  ;;  %v496_v50 = vadd.f32 %v682_v40, %v464_v48  ;;  %v735_v51 = vpop.f32.mrb[4].mxu0  ;;  %v747_v52 = vpop.f32.mrb[4].mxu1  ;;  %v499_v55 = vmax.f32 %v491_v45, 0.0  ;;  %v503_v56 = vmax.f32 %v495_v46, 0.0 }
 0x102   : > { %v736_v57 = vpop.f32.mrb[5].mxu0  ;;  %v748_v58 = vpop.f32.mrb[5].mxu1 }
 0x103   : > { %v500_v59 = vmax.f32 %v492_v49, 0.0  ;;  %v504_v60 = vmax.f32 %v496_v50, 0.0  ;;  %v737_v61 = vadd.f32 %v736_v57, %v735_v51  ;;  %v749_v62 = vadd.f32 %v748_v58, %v747_v52  ;;  %v738_v63 = vpop.f32.mrb[6].mxu0  ;;  %v750_v0 = vpop.f32.mrb[6].mxu1 }
 0x104   : > { %v739_v3 = vpop.f32.mrb[7].mxu0  ;;  %v751_v4 = vpop.f32.mrb[7].mxu1 }
 0x105   : > { %v690_v5 = vpack.c.bf16 %v500_v59, %v499_v55  ;;  %v700_v6 = vpack.c.bf16 %v504_v60, %v503_v56  ;;  %v453_v7 = vadd.f32 %v737_v61, %v627_v28  ;;  %v469_v8 = vadd.f32 %v749_v62, %v627_v28 }
 0x106   : > { %v740_v9 = vadd.f32 %v739_v3, %v738_v63  ;;  %v752_v11 = vadd.f32 %v751_v4, %v750_v0 }
 0x107   : > { %691 = vst [vmem:[%s224_s12] sm:$0xff] %v690_v5   ;;  %711 = vst [vmem:[%s224_s12 + $0x10] sm:$0xff] %v700_v6   ;;  %v493_v13 = vadd.f32 %v677_v1, %v453_v7  ;;  %v497_v14 = vadd.f32 %v685_v2, %v469_v8 }
 0x108   : > { %v456_v15 = vadd.f32 %v740_v9, %v627_v28  ;;  %v472_v16 = vadd.f32 %v752_v11, %v627_v28 }
 0x109   : > { %v501_v19 = vmax.f32 %v493_v13, 0.0  ;;  %v505_v20 = vmax.f32 %v497_v14, 0.0 }
 0x10a   : > { %v494_v17 = vadd.f32 %v678_v10, %v456_v15  ;;  %v498_v18 = vadd.f32 %v686_v12, %v472_v16 }
 0x10c   : > { %v502_v21 = vmax.f32 %v494_v17, 0.0  ;;  %v506_v22 = vmax.f32 %v498_v18, 0.0 }
 0x10e   : > { %v695_v23 = vpack.c.bf16 %v502_v21, %v501_v19  ;;  %v705_v24 = vpack.c.bf16 %v506_v22, %v505_v20 }
 0x110   : > { %710 = vst [vmem:[%s224_s12 + $0x8] sm:$0xff] %v695_v23   ;;  %712 = vst [vmem:[%s224_s12 + $0x18] sm:$0xff] %v705_v24  }
 0x111 PF: > { %s14_s15 = sadd.s32 1, %s811_s15  }
 0x112   : > { %p11_p4 = scmp.ge.s32.totalorder %s14_s15, 4  }
 0x114   :  { %13 = sbr.rel (!%p11_p4) target bundleno = 1 (0x1), region = 69 }

// kernel: _lambda_.23
= control target key start
LH: loop header
LB: loop body
LE: loop exit
PB: predicated region body
PF: predicated region fallthrough
CT: control target
= control target key end

     0   :  { %s515_s12 = smov 0   ;;  %s587_s0 = inlined_call_operand.vmem [shape: bf16[16,256], index: 0, kind: input, shape index: {}]   ;;  %s588_s1 = inlined_call_operand.vmem [shape: bf16[256,128], index: 1, kind: input, shape index: {}]   ;;  %s589_s2 = inlined_call_operand.vmem [shape: f32[1,128], index: 2, kind: input, shape index: {}]   ;;  %s590_s3 = inlined_call_operand.vmem [shape: bf16[16,128], index: 3, kind: output, shape index: {}]  }
   0x1 LB: > { %s409_s13 = sadd.s32 4294967295, %s493_s12   ;;  %p413_p0 = scmp.ge.s32.totalorder %s493_s12, 1  ;;  %s493_s12 = sphi %s515_s12, %s13_s12  }
   0x2   : > { %p137_p1 = scmp.lt.s32.totalorder %s493_s12, 3 }
   0x4   : > { %p138_p2 = pnand %p413_p0, %p137_p1 }
   0x5   : > { %v469_v0 = vld [vmem:[%s588_s1 + $0x40] sm:$0xff] (!%p138_p2)   ;;  %v471_v2 = vld [vmem:[%s588_s1 + $0x48] sm:$0xff] (!%p138_p2)   ;;  %p160_p3 = scmp.lt.s32.totalorder (!%p138_p2), %s409_s13, 1  ;;  %v473_v4 = vld [vmem:[%s588_s1 + $0x50] sm:$0xff] (!%p138_p2)  }
   0x6   : > { %141 = sbr.rel (%p138_p2) target bundleno = 260 (0x104), region = 32  ;;  %v470_v1 = vld [vmem:[%s588_s1] sm:$0xff] (!%p138_p2)   ;;  %439 = vmatprep.subr.bf16.mxu0 (!%p138_p2), %v469_v0  ;;  %v472_v3 = vld [vmem:[%s588_s1 + $0x8] sm:$0xff] (!%p138_p2)   ;;  %v474_v5 = vld [vmem:[%s588_s1 + $0x10] sm:$0xff] (!%p138_p2)  }
   0x7   : > { %440 = vmatpush3.bf16.msra.mxu0 (!%p138_p2), %v470_v1  ;;  %v475_v6 = vld [vmem:[%s588_s1 + $0x58] sm:$0xff] (!%p138_p2)   ;;  %v477_v8 = vld [vmem:[%s588_s1 + $0x60] sm:$0xff] (!%p138_p2)   ;;  %v479_v10 = vld [vmem:[%s588_s1 + $0x68] sm:$0xff] (!%p138_p2)  }
   0x8   : > { %441 = vmatprep.subr.bf16.mxu0 (!%p138_p2), %v471_v2  ;;  %v476_v7 = vld [vmem:[%s588_s1 + $0x18] sm:$0xff] (!%p138_p2)   ;;  %v478_v9 = vld [vmem:[%s588_s1 + $0x20] sm:$0xff] (!%p138_p2)   ;;  %v480_v13 = vld [vmem:[%s588_s1 + $0x28] sm:$0xff] (!%p138_p2)  }
   0x9   : > { %v481_v14 = vld [vmem:[%s588_s1 + $0x70] sm:$0xff] (!%p138_p2)   ;;  %v483_v16 = vld [vmem:[%s588_s1 + $0x78] sm:$0xff] (!%p138_p2)   ;;  %v417_v20 = vld [vmem:[%s589_s2] ss:$0 sm:$0xff] (!%p138_p2) }
   0xa   : > { %v482_v15 = vld [vmem:[%s588_s1 + $0x30] sm:$0xff] (!%p138_p2)   ;;  %v484_v17 = vld [vmem:[%s588_s1 + $0x38] sm:$0xff] (!%p138_p2)  }
   0xb   : > { %442 = vmatpush3.bf16.msra.mxu0 (!%p138_p2), %v472_v3 }
   0xc   : > { %443 = vmatprep.subr.bf16.mxu0 (!%p138_p2), %v473_v4 }
   0xd   : > { %s592_s13 = smov (!%p160_p3, %s409_s13), 1 }
   0xe   : > { %s438_s28 = sshll.u32 %s592_s13, 3  ;;  %s416_s27 = sshll.u32 %s592_s13, 2 }
   0xf   : > { %444 = vmatpush3.bf16.msra.mxu0 %v474_v5  ;;  %s164_s8 = scalar_lea.vmem %s587_s0, %s438_s28  ;;  %s168_s30 = scalar_lea.vmem %s590_s3, %s416_s27 }
  0x10   : > { %445 = vmatprep.subr.bf16.mxu0 %v475_v6  ;;  %v170_v11 = vld [vmem:[%s164_s8] sm:$0xff] }
  0x11   : > { %v419_v12 = vcombine.high %v170_v11, %v170_v11  ;;  %v418_v18 = vcombine.low %v170_v11, %v170_v11 }
  0x13   : > { %446 = vmatpush3.bf16.msra.mxu0 %v476_v7  ;;  %345 = vmatprep.mubr.bf16.mxu0 %v419_v12 }
  0x14   : > { %447 = vmatprep.subr.bf16.mxu0 %v477_v8 }
  0x17   : > { %448 = vmatpush3.bf16.msra.mxu0 %v478_v9 }
  0x18   : > { %449 = vmatprep.subr.bf16.mxu0 %v479_v10 }
  0x1b   : > { %450 = vmatpush3.bf16.msra.mxu0 %v480_v13 }
  0x1c   : > { %451 = vmatprep.subr.bf16.mxu0 %v481_v14 }
  0x1f   : > { %452 = vmatpush3.bf16.msra.mxu0 %v482_v15 }
  0x20   : > { %453 = vmatprep.subr.bf16.mxu0 %v483_v16 }
  0x23   : > { %454 = vmatpush3.bf16.msra.mxu0 %v484_v17 }
  0x26   : > { %346 = vmatmul.mubr.bf16.vlgmr.msra.gmra.mrb[0].mxu0 %v418_v18 }
  0xf9   : > { %v455_v19 = vpop.f32.mrb[0].mxu0 }
  0xfa   : > { %v456_v21 = vpop.f32.mrb[1].mxu0 }
  0xfb   : > { %v457_v22 = vadd.f32 %v456_v21, %v455_v19  ;;  %v458_v23 = vpop.f32.mrb[2].mxu0 }
  0xfc   : > { %v459_v24 = vpop.f32.mrb[3].mxu0 }
  0xfd   : > { %v348_v25 = vadd.f32 %v457_v22, %v417_v20 }
  0xff   : > { %v353_v26 = vmax.f32 %v348_v25, 0.0 }
 0x101   : > { %v354_v27 = vpack.c.bf16 %v353_v26, %v353_v26 }
 0x103   : > { %355 = vst [vmem:[%s168_s30] sm:$0xf] %v354_v27 }
 0x104 PF: > { %s13_s12 = sadd.s32 1, %s493_s12  }
 0x105   : > { %p10_p4 = scmp.ge.s32.totalorder %s13_s12, 4  }
 0x107   :  { %12 = sbr.rel (!%p10_p4) target bundleno = 1 (0x1), region = 62 }

// kernel: _lambda_.25
= control target key start
LH: loop header
LB: loop body
LE: loop exit
PB: predicated region body
PF: predicated region fallthrough
CT: control target
= control target key end

     0   :  { %s814_s15 = smov 0   ;;  %s941_s0 = inlined_call_operand.vmem [shape: bf16[16,512], index: 0, kind: input, shape index: {}]   ;;  %s942_s1 = inlined_call_operand.vmem [shape: bf16[512,128], index: 1, kind: input, shape index: {}]   ;;  %s943_s2 = inlined_call_operand.vmem [shape: f32[1,128], index: 2, kind: input, shape index: {}]   ;;  %s944_s3 = inlined_call_operand.vmem [shape: bf16[16,128], index: 3, kind: input, shape index: {}]   ;;  %s945_s4 = inlined_call_operand.vmem [shape: bf16[16,128], index: 4, kind: output, shape index: {}]  }
   0x1 LB: > { %s644_s16 = sadd.s32 4294967295, %s787_s15   ;;  %p648_p0 = scmp.ge.s32.totalorder %s787_s15, 1  ;;  %s787_s15 = sphi %s814_s15, %s14_s15  }
   0x2   : > { %p171_p1 = scmp.lt.s32.totalorder %s787_s15, 3 }
   0x4   : > { %p172_p2 = pnand %p648_p0, %p171_p1 }
   0x5   : > { %v745_v0 = vld [vmem:[%s942_s1 + $0x40] sm:$0xff] (!%p172_p2)   ;;  %v749_v4 = vld [vmem:[%s942_s1 + $0x48] sm:$0xff] (!%p172_p2)   ;;  %v753_v8 = vld [vmem:[%s942_s1 + $0x50] sm:$0xff] (!%p172_p2)   ;;  %p200_p3 = scmp.lt.s32.totalorder (!%p172_p2), %s644_s16, 1 }
   0x6   : > { %175 = sbr.rel (%p172_p2) target bundleno = 265 (0x109), region = 36  ;;  %v746_v1 = vld [vmem:[%s942_s1 + $0xc0] sm:$0xff] (!%p172_p2)   ;;  %693 = vmatprep.subr.bf16.mxu0 (!%p172_p2), %v745_v0  ;;  %v750_v5 = vld [vmem:[%s942_s1 + $0xc8] sm:$0xff] (!%p172_p2)   ;;  %v754_v9 = vld [vmem:[%s942_s1 + $0xd0] sm:$0xff] (!%p172_p2)  }
   0x7   : > { %v747_v2 = vld [vmem:[%s942_s1] sm:$0xff] (!%p172_p2)   ;;  %715 = vmatprep.subr.bf16.mxu1 (!%p172_p2), %v746_v1  ;;  %v751_v6 = vld [vmem:[%s942_s1 + $0x8] sm:$0xff] (!%p172_p2)   ;;  %v755_v10 = vld [vmem:[%s942_s1 + $0x10] sm:$0xff] (!%p172_p2)  }
   0x8   : > { %v748_v3 = vld [vmem:[%s942_s1 + $0x80] sm:$0xff] (!%p172_p2)   ;;  %694 = vmatpush3.bf16.msra.mxu0 (!%p172_p2), %v747_v2  ;;  %v752_v7 = vld [vmem:[%s942_s1 + $0x88] sm:$0xff] (!%p172_p2)   ;;  %v756_v11 = vld [vmem:[%s942_s1 + $0x90] sm:$0xff] (!%p172_p2)  }
   0x9   : > { %716 = vmatpush3.bf16.msra.mxu1 (!%p172_p2), %v748_v3  ;;  %695 = vmatprep.subr.bf16.mxu0 (!%p172_p2), %v749_v4  ;;  %v757_v12 = vld [vmem:[%s942_s1 + $0x58] sm:$0xff] (!%p172_p2)   ;;  %v761_v16 = vld [vmem:[%s942_s1 + $0x60] sm:$0xff] (!%p172_p2)   ;;  %v765_v20 = vld [vmem:[%s942_s1 + $0x68] sm:$0xff] (!%p172_p2)  }
   0xa   : > { %717 = vmatprep.subr.bf16.mxu1 (!%p172_p2), %v750_v5  ;;  %v758_v13 = vld [vmem:[%s942_s1 + $0xd8] sm:$0xff] (!%p172_p2)   ;;  %v762_v17 = vld [vmem:[%s942_s1 + $0xe0] sm:$0xff] (!%p172_p2)   ;;  %v766_v21 = vld [vmem:[%s942_s1 + $0xe8] sm:$0xff] (!%p172_p2)  }
   0xb   : > { %v759_v14 = vld [vmem:[%s942_s1 + $0x18] sm:$0xff] (!%p172_p2)   ;;  %v763_v18 = vld [vmem:[%s942_s1 + $0x20] sm:$0xff] (!%p172_p2)   ;;  %v767_v22 = vld [vmem:[%s942_s1 + $0x28] sm:$0xff] (!%p172_p2)  }
   0xc   : > { %696 = vmatpush3.bf16.msra.mxu0 (!%p172_p2), %v751_v6  ;;  %v760_v15 = vld [vmem:[%s942_s1 + $0x98] sm:$0xff] (!%p172_p2)   ;;  %v764_v19 = vld [vmem:[%s942_s1 + $0xa0] sm:$0xff] (!%p172_p2)   ;;  %v768_v23 = vld [vmem:[%s942_s1 + $0xa8] sm:$0xff] (!%p172_p2)  }
   0xd   : > { %718 = vmatpush3.bf16.msra.mxu1 %v752_v7  ;;  %697 = vmatprep.subr.bf16.mxu0 %v753_v8  ;;  %s947_s16 = smov (!%p200_p3, %s644_s16), 1  ;;  %v769_v24 = vld [vmem:[%s942_s1 + $0x70] sm:$0xff]   ;;  %v773_v28 = vld [vmem:[%s942_s1 + $0x78] sm:$0xff]   ;;  %v653_v40 = vld [vmem:[%s943_s2] ss:$0 sm:$0xff] }
   0xe   : > { %719 = vmatprep.subr.bf16.mxu1 %v754_v9  ;;  %v770_v25 = vld [vmem:[%s942_s1 + $0xf0] sm:$0xff]   ;;  %s692_s23 = sshll.u32 %s947_s16, 4  ;;  %v774_v29 = vld [vmem:[%s942_s1 + $0xf8] sm:$0xff]   ;;  %s651_s11 = sshll.u32 %s947_s16, 2 }
   0xf   : > { %v771_v26 = vld [vmem:[%s942_s1 + $0x30] sm:$0xff]   ;;  %s204_s6 = scalar_lea.vmem %s941_s0, %s692_s23  ;;  %v775_v30 = vld [vmem:[%s942_s1 + $0x38] sm:$0xff]   ;;  %s208_s14 = scalar_lea.vmem %s944_s3, %s651_s11 }
  0x10   : > { %698 = vmatpush3.bf16.msra.mxu0 %v755_v10  ;;  %v772_v27 = vld [vmem:[%s942_s1 + $0xb0] sm:$0xff]   ;;  %v776_v31 = vld [vmem:[%s942_s1 + $0xb8] sm:$0xff]   ;;  %v214_v32 = vld [vmem:[%s204_s6] sm:$0xff]  ;;  %s212_s20 = scalar_lea.vmem %s945_s4, %s651_s11 }
  0x11   : > { %720 = vmatpush3.bf16.msra.mxu1 %v756_v11  ;;  %699 = vmatprep.subr.bf16.mxu0 %v757_v12  ;;  %v215_v33 = vld [vmem:[%s204_s6 + $0x8] sm:$0xff]  ;;  %v654_v34 = vcombine.low %v214_v32, %v214_v32  ;;  %v655_v35 = vcombine.high %v214_v32, %v214_v32  ;;  %v573_v43 = vld [vmem:[%s208_s14] sm:$0xf] }
  0x12   : > { %721 = vmatprep.subr.bf16.mxu1 %v758_v13  ;;  %v656_v36 = vcombine.low %v215_v33, %v215_v33  ;;  %v657_v37 = vcombine.high %v215_v33, %v215_v33  ;;  %v574_v51 = vunpack.c.l.bf16 %v573_v43 }
  0x13   : > { %525 = vmatprep.mubr.bf16.mxu0 %v655_v35 }
  0x14   : > { %700 = vmatpush3.bf16.msra.mxu0 %v759_v14  ;;  %565 = vmatprep.mubr.bf16.mxu1 %v657_v37 }
  0x15   : > { %722 = vmatpush3.bf16.msra.mxu1 %v760_v15  ;;  %701 = vmatprep.subr.bf16.mxu0 %v761_v16 }
  0x16   : > { %723 = vmatprep.subr.bf16.mxu1 %v762_v17 }
  0x18   : > { %702 = vmatpush3.bf16.msra.mxu0 %v763_v18 }
  0x19   : > { %724 = vmatpush3.bf16.msra.mxu1 %v764_v19  ;;  %703 = vmatprep.subr.bf16.mxu0 %v765_v20 }
  0x1a   : > { %725 = vmatprep.subr.bf16.mxu1 %v766_v21 }
  0x1c   : > { %704 = vmatpush3.bf16.msra.mxu0 %v767_v22 }
  0x1d   : > { %726 = vmatpush3.bf16.msra.mxu1 %v768_v23  ;;  %705 = vmatprep.subr.bf16.mxu0 %v769_v24 }
  0x1e   : > { %727 = vmatprep.subr.bf16.mxu1 %v770_v25 }
  0x20   : > { %706 = vmatpush3.bf16.msra.mxu0 %v771_v26 }
  0x21   : > { %728 = vmatpush3.bf16.msra.mxu1 %v772_v27  ;;  %707 = vmatprep.subr.bf16.mxu0 %v773_v28 }
  0x22   : > { %729 = vmatprep.subr.bf16.mxu1 %v774_v29 }
  0x24   : > { %708 = vmatpush3.bf16.msra.mxu0 %v775_v30 }
  0x25   : > { %730 = vmatpush3.bf16.msra.mxu1 %v776_v31 }
  0x27   : > { %526 = vmatmul.mubr.bf16.vlgmr.msra.gmra.mrb[0].mxu0 %v654_v34 }
  0x28   : > { %566 = vmatmul.mubr.bf16.vlgmr.msra.gmra.mrb[0].mxu1 %v656_v36 }
  0xfa   : > { %v709_v38 = vpop.f32.mrb[0].mxu0 }
  0xfb   : > { %v731_v39 = vpop.f32.mrb[0].mxu1  ;;  %v710_v41 = vpop.f32.mrb[1].mxu0 }
  0xfc   : > { %v732_v42 = vpop.f32.mrb[1].mxu1  ;;  %v711_v44 = vadd.f32 %v710_v41, %v709_v38  ;;  %v712_v46 = vpop.f32.mrb[2].mxu0 }
  0xfd   : > { %v733_v45 = vadd.f32 %v732_v42, %v731_v39  ;;  %v734_v47 = vpop.f32.mrb[2].mxu1  ;;  %v713_v48 = vpop.f32.mrb[3].mxu0 }
  0xfe   : > { %v735_v49 = vpop.f32.mrb[3].mxu1  ;;  %v528_v50 = vadd.f32 %v711_v44, %v653_v40 }
 0x100   : > { %v568_v52 = vadd.f32 %v733_v45, %v528_v50 }
 0x102   : > { %v575_v53 = vadd.f32 %v574_v51, %v568_v52 }
 0x104   : > { %v576_v54 = vmax.f32 %v575_v53, 0.0 }
 0x106   : > { %v577_v55 = vpack.c.bf16 %v576_v54, %v576_v54 }
 0x108   : > { %578 = vst [vmem:[%s212_s20] sm:$0xf] %v577_v55 }
 0x109 PF: > { %s14_s15 = sadd.s32 1, %s787_s15  }
 0x10a   : > { %p11_p4 = scmp.ge.s32.totalorder %s14_s15, 4  }
 0x10c   :  { %13 = sbr.rel (!%p11_p4) target bundleno = 1 (0x1), region = 69 }

// kernel: _lambda_.24
= control target key start
LH: loop header
LB: loop body
LE: loop exit
PB: predicated region body
PF: predicated region fallthrough
CT: control target
= control target key end

     0   :  { %s429_s12 = smov 0   ;;  %s473_s0 = inlined_call_operand.vmem [shape: bf16[16,128], index: 0, kind: input, shape index: {}]   ;;  %s474_s1 = inlined_call_operand.vmem [shape: bf16[128,128], index: 1, kind: input, shape index: {}]   ;;  %s475_s2 = inlined_call_operand.vmem [shape: f32[1,128], index: 2, kind: input, shape index: {}]   ;;  %s476_s3 = inlined_call_operand.vmem [shape: bf16[16,128], index: 3, kind: output, shape index: {}]  }
   0x1 LB: > { %s334_s13 = sadd.s32 4294967295, %s405_s12   ;;  %p338_p0 = scmp.ge.s32.totalorder %s405_s12, 1  ;;  %s405_s12 = sphi %s429_s12, %s13_s12  }
   0x2   : > { %p136_p1 = scmp.lt.s32.totalorder %s405_s12, 3 }
   0x4   : > { %p137_p2 = pnand %p338_p0, %p136_p1 }
   0x5   : > { %v391_v0 = vld [vmem:[%s474_s1] sm:$0xff] (!%p137_p2)   ;;  %v407_v1 = vmov (!%p137_p2), 0.0   ;;  %v392_v2 = vld [vmem:[%s474_s1 + $0x8] sm:$0xff] (!%p137_p2)   ;;  %vm408_vm0 = vmmov (!%p137_p2), 0   ;;  %v393_v3 = vld [vmem:[%s474_s1 + $0x10] sm:$0xff] (!%p137_p2)   ;;  %p158_p3 = scmp.lt.s32.totalorder (!%p137_p2), %s334_s13, 1 }
   0x6   : > { %140 = sbr.rel (%p137_p2) target bundleno = 255 (0xff), region = 32  ;;  %361 = vmatprep.subr.bf16.mxu0 (!%p137_p2), %v407_v1  ;;  %377 = vmatprep.mubr.msk.bf16.mxu0 (!%p137_p2), %vm408_vm0, %v407_v1  ;;  %v394_v4 = vld [vmem:[%s474_s1 + $0x18] sm:$0xff] (!%p137_p2)   ;;  %v395_v5 = vld [vmem:[%s474_s1 + $0x20] sm:$0xff] (!%p137_p2)   ;;  %v396_v6 = vld [vmem:[%s474_s1 + $0x28] sm:$0xff] (!%p137_p2)  }
   0x7   : > { %362 = vmatpush3.bf16.msra.mxu0 (!%p137_p2), %v391_v0  ;;  %v397_v7 = vld [vmem:[%s474_s1 + $0x30] sm:$0xff] (!%p137_p2)   ;;  %v398_v8 = vld [vmem:[%s474_s1 + $0x38] sm:$0xff] (!%p137_p2)   ;;  %v341_v10 = vld [vmem:[%s475_s2] ss:$0 sm:$0xff] (!%p137_p2) }
   0x8   : > { %363 = vmatprep.subr.bf16.mxu0 (!%p137_p2), %v407_v1 }
   0xb   : > { %364 = vmatpush3.bf16.msra.mxu0 (!%p137_p2), %v392_v2 }
   0xc   : > { %365 = vmatprep.subr.bf16.mxu0 (!%p137_p2), %v407_v1 }
   0xd   : > { %s478_s13 = smov (!%p158_p3, %s334_s13), 1 }
   0xe   : > { %s339_s28 = sshll.u32 %s478_s13, 2 }
   0xf   : > { %366 = vmatpush3.bf16.msra.mxu0 %v393_v3  ;;  %s161_s6 = scalar_lea.vmem %s473_s0, %s339_s28  ;;  %s165_s11 = scalar_lea.vmem %s476_s3, %s339_s28 }
  0x10   : > { %367 = vmatprep.subr.bf16.mxu0 %v407_v1  ;;  %v167_v9 = vld [vmem:[%s161_s6] sm:$0xf] }
  0x13   : > { %368 = vmatpush3.bf16.msra.mxu0 %v394_v4 }
  0x14   : > { %369 = vmatprep.subr.bf16.mxu0 %v407_v1 }
  0x17   : > { %370 = vmatpush3.bf16.msra.mxu0 %v395_v5 }
  0x18   : > { %371 = vmatprep.subr.bf16.mxu0 %v407_v1 }
  0x1b   : > { %372 = vmatpush3.bf16.msra.mxu0 %v396_v6 }
  0x1c   : > { %373 = vmatprep.subr.bf16.mxu0 %v407_v1 }
  0x1f   : > { %374 = vmatpush3.bf16.msra.mxu0 %v397_v7 }
  0x20   : > { %375 = vmatprep.subr.bf16.mxu0 %v407_v1 }
  0x23   : > { %376 = vmatpush3.bf16.msra.mxu0 %v398_v8 }
  0x26   : > { %378 = vmatmul.mubr.bf16.vlgmr.msra.gmra.mrb[0].mxu0 %v167_v9 }
  0xf9   : > { %v273_v11 = vpop.f32.mrb[0].mxu0 }
  0xfa   : > { %v274_v12 = vadd.f32 %v341_v10, %v273_v11  ;;  %v379_v13 = vpop.f32.mrb[1].mxu0 }
  0xfb   : > { %v276_v14 = vpop.f32.mrb[2].mxu0 }
  0xfc   : > { %v279_v15 = vpack.c.bf16 %v274_v12, %v274_v12  ;;  %v380_v16 = vpop.f32.mrb[3].mxu0 }
  0xfe   : > { %280 = vst [vmem:[%s165_s11] sm:$0xf] %v279_v15 }
  0xff PF: > { %s13_s12 = sadd.s32 1, %s405_s12  }
 0x100   : > { %p10_p4 = scmp.ge.s32.totalorder %s13_s12, 4  }
 0x102   :  { %12 = sbr.rel (!%p10_p4) target bundleno = 1 (0x1), region = 62 }

// kernel: _lambda_.26
= control target key start
LH: loop header
LB: loop body
LE: loop exit
PB: predicated region body
PF: predicated region fallthrough
CT: control target
= control target key end

     0   :  { %s626_s1 = inlined_call_operand.vmem [shape: bf16[512,128], index: 1, kind: input, shape index: {}]   ;;  %s627_s0 = inlined_call_operand.vmem [shape: bf16[8,512], index: 0, kind: input, shape index: {}]   ;;  %s628_s2 = inlined_call_operand.vmem [shape: f32[1,128], index: 2, kind: input, shape index: {}]   ;;  %s629_s3 = inlined_call_operand.vmem [shape: bf16[8,128], index: 3, kind: output, shape index: {}]  }
   0x1   :  { %v462_v0 = vld [vmem:[%s626_s1 + $0x40] sm:$0xff]   ;;  %v466_v4 = vld [vmem:[%s626_s1 + $0x48] sm:$0xff]   ;;  %v470_v8 = vld [vmem:[%s626_s1 + $0x50] sm:$0xff]  }
   0x2   :  { %v463_v1 = vld [vmem:[%s626_s1 + $0xc0] sm:$0xff]   ;;  %418 = vmatprep.subr.bf16.mxu0 %v462_v0  ;;  %v467_v5 = vld [vmem:[%s626_s1 + $0xc8] sm:$0xff]   ;;  %v471_v9 = vld [vmem:[%s626_s1 + $0xd0] sm:$0xff]  }
   0x3   :  { %v464_v2 = vld [vmem:[%s626_s1] sm:$0xff]   ;;  %440 = vmatprep.subr.bf16.mxu1 %v463_v1  ;;  %v468_v6 = vld [vmem:[%s626_s1 + $0x8] sm:$0xff]   ;;  %v472_v10 = vld [vmem:[%s626_s1 + $0x10] sm:$0xff]  }
   0x4   :  { %v465_v3 = vld [vmem:[%s626_s1 + $0x80] sm:$0xff]   ;;  %419 = vmatpush3.bf16.msra.mxu0 %v464_v2  ;;  %v469_v7 = vld [vmem:[%s626_s1 + $0x88] sm:$0xff]   ;;  %v473_v11 = vld [vmem:[%s626_s1 + $0x90] sm:$0xff]  }
   0x5   :  { %441 = vmatpush3.bf16.msra.mxu1 %v465_v3  ;;  %420 = vmatprep.subr.bf16.mxu0 %v466_v4  ;;  %v474_v12 = vld [vmem:[%s626_s1 + $0x58] sm:$0xff]   ;;  %v478_v16 = vld [vmem:[%s626_s1 + $0x60] sm:$0xff]   ;;  %v482_v20 = vld [vmem:[%s626_s1 + $0x68] sm:$0xff]  }
   0x6   :  { %442 = vmatprep.subr.bf16.mxu1 %v467_v5  ;;  %v475_v13 = vld [vmem:[%s626_s1 + $0xd8] sm:$0xff]   ;;  %v479_v17 = vld [vmem:[%s626_s1 + $0xe0] sm:$0xff]   ;;  %v483_v21 = vld [vmem:[%s626_s1 + $0xe8] sm:$0xff]  }
   0x7   :  { %v476_v14 = vld [vmem:[%s626_s1 + $0x18] sm:$0xff]   ;;  %v480_v18 = vld [vmem:[%s626_s1 + $0x20] sm:$0xff]   ;;  %v484_v22 = vld [vmem:[%s626_s1 + $0x28] sm:$0xff]  }
   0x8   :  { %421 = vmatpush3.bf16.msra.mxu0 %v468_v6  ;;  %v477_v15 = vld [vmem:[%s626_s1 + $0x98] sm:$0xff]   ;;  %v481_v19 = vld [vmem:[%s626_s1 + $0xa0] sm:$0xff]   ;;  %v485_v23 = vld [vmem:[%s626_s1 + $0xa8] sm:$0xff]  }
   0x9   :  { %443 = vmatpush3.bf16.msra.mxu1 %v469_v7  ;;  %422 = vmatprep.subr.bf16.mxu0 %v470_v8  ;;  %v486_v24 = vld [vmem:[%s626_s1 + $0x70] sm:$0xff]   ;;  %v490_v28 = vld [vmem:[%s626_s1 + $0x78] sm:$0xff]   ;;  %v15_v32 = vld [vmem:[%s627_s0] sm:$0xff] }
   0xa   :  { %444 = vmatprep.subr.bf16.mxu1 %v471_v9  ;;  %v487_v25 = vld [vmem:[%s626_s1 + $0xf0] sm:$0xff]   ;;  %v491_v29 = vld [vmem:[%s626_s1 + $0xf8] sm:$0xff]   ;;  %v16_v33 = vld [vmem:[%s627_s0 + $0x8] sm:$0xff]  ;;  %v382_v34 = vcombine.low %v15_v32, %v15_v32  ;;  %v383_v35 = vcombine.high %v15_v32, %v15_v32 }
   0xb   :  { %v488_v26 = vld [vmem:[%s626_s1 + $0x30] sm:$0xff]   ;;  %v492_v30 = vld [vmem:[%s626_s1 + $0x38] sm:$0xff]   ;;  %v384_v36 = vcombine.low %v16_v33, %v16_v33  ;;  %v385_v37 = vcombine.high %v16_v33, %v16_v33  ;;  %v381_v40 = vld [vmem:[%s628_s2] ss:$0 sm:$0xff] }
   0xc   :  { %423 = vmatpush3.bf16.msra.mxu0 %v472_v10  ;;  %v489_v27 = vld [vmem:[%s626_s1 + $0xb0] sm:$0xff]   ;;  %v493_v31 = vld [vmem:[%s626_s1 + $0xb8] sm:$0xff]   ;;  %326 = vmatprep.mubr.bf16.mxu0 %v383_v35 }
   0xd   :  { %445 = vmatpush3.bf16.msra.mxu1 %v473_v11  ;;  %424 = vmatprep.subr.bf16.mxu0 %v474_v12 }
   0xe   :  { %446 = vmatprep.subr.bf16.mxu1 %v475_v13  ;;  %366 = vmatprep.mubr.bf16.mxu1 %v385_v37 }
  0x10   :  { %425 = vmatpush3.bf16.msra.mxu0 %v476_v14 }
  0x11   :  { %447 = vmatpush3.bf16.msra.mxu1 %v477_v15  ;;  %426 = vmatprep.subr.bf16.mxu0 %v478_v16 }
  0x12   :  { %448 = vmatprep.subr.bf16.mxu1 %v479_v17 }
  0x14   :  { %427 = vmatpush3.bf16.msra.mxu0 %v480_v18 }
  0x15   :  { %449 = vmatpush3.bf16.msra.mxu1 %v481_v19  ;;  %428 = vmatprep.subr.bf16.mxu0 %v482_v20 }
  0x16   :  { %450 = vmatprep.subr.bf16.mxu1 %v483_v21 }
  0x18   :  { %429 = vmatpush3.bf16.msra.mxu0 %v484_v22 }
  0x19   :  { %451 = vmatpush3.bf16.msra.mxu1 %v485_v23  ;;  %430 = vmatprep.subr.bf16.mxu0 %v486_v24 }
  0x1a   :  { %452 = vmatprep.subr.bf16.mxu1 %v487_v25 }
  0x1c   :  { %431 = vmatpush3.bf16.msra.mxu0 %v488_v26 }
  0x1d   :  { %453 = vmatpush3.bf16.msra.mxu1 %v489_v27  ;;  %432 = vmatprep.subr.bf16.mxu0 %v490_v28 }
  0x1e   :  { %454 = vmatprep.subr.bf16.mxu1 %v491_v29 }
  0x20   :  { %433 = vmatpush3.bf16.msra.mxu0 %v492_v30 }
  0x21   :  { %455 = vmatpush3.bf16.msra.mxu1 %v493_v31 }
  0x23   :  { %327 = vmatmul.mubr.bf16.vlgmr.msra.gmra.mrb[0].mxu0 %v382_v34 }
  0x24   :  { %367 = vmatmul.mubr.bf16.vlgmr.msra.gmra.mrb[0].mxu1 %v384_v36 }
  0xf6   :  { %v434_v38 = vpop.f32.mrb[0].mxu0 }
  0xf7   :  { %v456_v39 = vpop.f32.mrb[0].mxu1  ;;  %v435_v41 = vpop.f32.mrb[1].mxu0 }
  0xf8   :  { %v457_v42 = vpop.f32.mrb[1].mxu1  ;;  %v436_v43 = vadd.f32 %v435_v41, %v434_v38  ;;  %v437_v45 = vpop.f32.mrb[2].mxu0 }
  0xf9   :  { %v458_v44 = vadd.f32 %v457_v42, %v456_v39  ;;  %v459_v46 = vpop.f32.mrb[2].mxu1  ;;  %v438_v47 = vpop.f32.mrb[3].mxu0 }
  0xfa   :  { %v460_v48 = vpop.f32.mrb[3].mxu1  ;;  %v329_v49 = vadd.f32 %v436_v43, %v381_v40 }
  0xfc   :  { %v369_v50 = vadd.f32 %v458_v44, %v329_v49 }
  0xfe   :  { %v374_v51 = vmax.f32 %v369_v50, 0.0 }
 0x100   :  { %v375_v52 = vpack.c.bf16 %v374_v51, %v374_v51 }
 0x102   :  { %376 = vst [vmem:[%s629_s3] sm:$0xf] %v375_v52 }

// kernel: _lambda_.27
= control target key start
LH: loop header
LB: loop body
LE: loop exit
PB: predicated region body
PF: predicated region fallthrough
CT: control target
= control target key end

     0   :  { %v181_v0 = vmov 0.0   ;;  %vm182_vm0 = vmmov 0   ;;  %s236_s1 = inlined_call_operand.vmem [shape: bf16[128,128], index: 1, kind: input, shape index: {}]   ;;  %s237_s0 = inlined_call_operand.vmem [shape: bf16[8,128], index: 0, kind: input, shape index: {}]   ;;  %s238_s2 = inlined_call_operand.vmem [shape: f32[1,128], index: 2, kind: input, shape index: {}]   ;;  %s239_s3 = inlined_call_operand.vmem [shape: bf16[8,128], index: 3, kind: output, shape index: {}]  }
   0x1   :  { %151 = vmatprep.subr.bf16.mxu0 %v181_v0  ;;  %v173_v1 = vld [vmem:[%s236_s1] sm:$0xff]   ;;  %167 = vmatprep.mubr.msk.bf16.mxu0 %vm182_vm0, %v181_v0  ;;  %v174_v2 = vld [vmem:[%s236_s1 + $0x8] sm:$0xff]   ;;  %v175_v3 = vld [vmem:[%s236_s1 + $0x10] sm:$0xff]  }
   0x2   :  { %152 = vmatpush3.bf16.msra.mxu0 %v173_v1  ;;  %v176_v4 = vld [vmem:[%s236_s1 + $0x18] sm:$0xff]   ;;  %v177_v5 = vld [vmem:[%s236_s1 + $0x20] sm:$0xff]   ;;  %v178_v6 = vld [vmem:[%s236_s1 + $0x28] sm:$0xff]  }
   0x3   :  { %153 = vmatprep.subr.bf16.mxu0 %v181_v0  ;;  %v179_v7 = vld [vmem:[%s236_s1 + $0x30] sm:$0xff]   ;;  %v180_v8 = vld [vmem:[%s236_s1 + $0x38] sm:$0xff]   ;;  %v15_v9 = vld [vmem:[%s237_s0] sm:$0xf] }
   0x4   :  { %v133_v10 = vld [vmem:[%s238_s2] ss:$0 sm:$0xff] }
   0x6   :  { %154 = vmatpush3.bf16.msra.mxu0 %v174_v2 }
   0x7   :  { %155 = vmatprep.subr.bf16.mxu0 %v181_v0 }
   0xa   :  { %156 = vmatpush3.bf16.msra.mxu0 %v175_v3 }
   0xb   :  { %157 = vmatprep.subr.bf16.mxu0 %v181_v0 }
   0xe   :  { %158 = vmatpush3.bf16.msra.mxu0 %v176_v4 }
   0xf   :  { %159 = vmatprep.subr.bf16.mxu0 %v181_v0 }
  0x12   :  { %160 = vmatpush3.bf16.msra.mxu0 %v177_v5 }
  0x13   :  { %161 = vmatprep.subr.bf16.mxu0 %v181_v0 }
  0x16   :  { %162 = vmatpush3.bf16.msra.mxu0 %v178_v6 }
  0x17   :  { %163 = vmatprep.subr.bf16.mxu0 %v181_v0 }
  0x1a   :  { %164 = vmatpush3.bf16.msra.mxu0 %v179_v7 }
  0x1b   :  { %165 = vmatprep.subr.bf16.mxu0 %v181_v0 }
  0x1e   :  { %166 = vmatpush3.bf16.msra.mxu0 %v180_v8 }
  0x21   :  { %168 = vmatmul.mubr.bf16.vlgmr.msra.gmra.mrb[0].mxu0 %v15_v9 }
  0xf4   :  { %v121_v11 = vpop.f32.mrb[0].mxu0 }
  0xf5   :  { %v122_v12 = vadd.f32 %v133_v10, %v121_v11  ;;  %v169_v13 = vpop.f32.mrb[1].mxu0 }
  0xf6   :  { %v124_v14 = vpop.f32.mrb[2].mxu0 }
  0xf7   :  { %v127_v15 = vpack.c.bf16 %v122_v12, %v122_v12  ;;  %v170_v16 = vpop.f32.mrb[3].mxu0 }
  0xf9   :  { %128 = vst [vmem:[%s239_s3] sm:$0xf] %v127_v15 }

// kernel: _lambda_.29
= control target key start
LH: loop header
LB: loop body
LE: loop exit
PB: predicated region body
PF: predicated region fallthrough
CT: control target
= control target key end

     0   :  { %v890_v42 = vmov 0.0   ;;  %vm891_vm0 = vmmov 0   ;;  %s1098_s1 = inlined_call_operand.vmem [shape: bf16[896,128], index: 1, kind: input, shape index: {}]   ;;  %s1099_s0 = inlined_call_operand.vmem [shape: bf16[8,896], index: 0, kind: input, shape index: {}]   ;;  %s1100_s2 = inlined_call_operand.vmem [shape: f32[1,128], index: 2, kind: input, shape index: {}]   ;;  %s1101_s3 = inlined_call_operand.vmem [shape: bf16[8,128], index: 3, kind: output, shape index: {}]  }
   0x1   :  { %v827_v0 = vld [vmem:[%s1098_s1 + $0x40] sm:$0xff]   ;;  %v831_v4 = vld [vmem:[%s1098_s1 + $0x48] sm:$0xff]   ;;  %v835_v8 = vld [vmem:[%s1098_s1 + $0x50] sm:$0xff]  }
   0x2   :  { %v828_v1 = vld [vmem:[%s1098_s1] sm:$0xff]   ;;  %730 = vmatprep.subr.bf16.mxu0 %v827_v0  ;;  %v832_v5 = vld [vmem:[%s1098_s1 + $0x8] sm:$0xff]   ;;  %v836_v9 = vld [vmem:[%s1098_s1 + $0x10] sm:$0xff]  }
   0x3   :  { %v829_v2 = vld [vmem:[%s1098_s1 + $0xc0] sm:$0xff]   ;;  %731 = vmatpush3.bf16.msra.mxu0 %v828_v1  ;;  %v833_v6 = vld [vmem:[%s1098_s1 + $0xc8] sm:$0xff]   ;;  %v837_v10 = vld [vmem:[%s1098_s1 + $0xd0] sm:$0xff]  }
   0x4   :  { %v830_v3 = vld [vmem:[%s1098_s1 + $0x80] sm:$0xff]   ;;  %752 = vmatprep.subr.bf16.mxu1 %v829_v2  ;;  %732 = vmatprep.subr.bf16.mxu0 %v831_v4  ;;  %v834_v7 = vld [vmem:[%s1098_s1 + $0x88] sm:$0xff]   ;;  %v838_v11 = vld [vmem:[%s1098_s1 + $0x90] sm:$0xff]  }
   0x5   :  { %753 = vmatpush3.bf16.msra.mxu1 %v830_v3  ;;  %v839_v12 = vld [vmem:[%s1098_s1 + $0x58] sm:$0xff]   ;;  %v843_v16 = vld [vmem:[%s1098_s1 + $0x60] sm:$0xff]   ;;  %v847_v20 = vld [vmem:[%s1098_s1 + $0x68] sm:$0xff]  }
   0x6   :  { %754 = vmatprep.subr.bf16.mxu1 %v833_v6  ;;  %v840_v13 = vld [vmem:[%s1098_s1 + $0x18] sm:$0xff]   ;;  %v844_v17 = vld [vmem:[%s1098_s1 + $0x20] sm:$0xff]   ;;  %v848_v21 = vld [vmem:[%s1098_s1 + $0x28] sm:$0xff]  }
   0x7   :  { %733 = vmatpush3.bf16.msra.mxu0 %v832_v5  ;;  %v841_v14 = vld [vmem:[%s1098_s1 + $0xd8] sm:$0xff]   ;;  %v845_v18 = vld [vmem:[%s1098_s1 + $0xe0] sm:$0xff]   ;;  %v849_v22 = vld [vmem:[%s1098_s1 + $0xe8] sm:$0xff]  }
   0x8   :  { %734 = vmatprep.subr.bf16.mxu0 %v835_v8  ;;  %v842_v15 = vld [vmem:[%s1098_s1 + $0x98] sm:$0xff]   ;;  %v846_v19 = vld [vmem:[%s1098_s1 + $0xa0] sm:$0xff]   ;;  %v850_v23 = vld [vmem:[%s1098_s1 + $0xa8] sm:$0xff]  }
   0x9   :  { %755 = vmatpush3.bf16.msra.mxu1 %v834_v7  ;;  %v851_v24 = vld [vmem:[%s1098_s1 + $0x70] sm:$0xff]   ;;  %v855_v28 = vld [vmem:[%s1098_s1 + $0x78] sm:$0xff]   ;;  %v15_v31 = vld [vmem:[%s1099_s0] sm:$0xff] }
   0xa   :  { %756 = vmatprep.subr.bf16.mxu1 %v837_v10  ;;  %v852_v25 = vld [vmem:[%s1098_s1 + $0x30] sm:$0xff]   ;;  %v856_v29 = vld [vmem:[%s1098_s1 + $0x38] sm:$0xff]   ;;  %v667_v32 = vcombine.low %v15_v31, %v15_v31  ;;  %v668_v33 = vcombine.high %v15_v31, %v15_v31  ;;  %v861_v35 = vld [vmem:[%s1098_s1 + $0x140] sm:$0xff]  }
   0xb   :  { %735 = vmatpush3.bf16.msra.mxu0 %v836_v9  ;;  %v853_v26 = vld [vmem:[%s1098_s1 + $0xf0] sm:$0xff]   ;;  %v857_v30 = vld [vmem:[%s1098_s1 + $0xf8] sm:$0xff]   ;;  %v16_v36 = vld [vmem:[%s1099_s0 + $0x8] sm:$0xff] }
   0xc   :  { %736 = vmatprep.subr.bf16.mxu0 %v839_v12  ;;  %v854_v27 = vld [vmem:[%s1098_s1 + $0xb0] sm:$0xff]   ;;  %v860_v34 = vld [vmem:[%s1098_s1 + $0xb8] sm:$0xff]   ;;  %531 = vmatprep.mubr.bf16.mxu0 %v668_v33  ;;  %v669_v37 = vcombine.low %v16_v36, %v16_v36  ;;  %v670_v38 = vcombine.high %v16_v36, %v16_v36  ;;  %v864_v39 = vld [vmem:[%s1098_s1 + $0x100] sm:$0xff]  }
   0xd   :  { %757 = vmatpush3.bf16.msra.mxu1 %v838_v11  ;;  %v865_v40 = vld [vmem:[%s1098_s1 + $0x180] sm:$0xff]   ;;  %v866_v41 = vld [vmem:[%s1098_s1 + $0x148] sm:$0xff]   ;;  %v869_v45 = vld [vmem:[%s1098_s1 + $0x150] sm:$0xff]  }
   0xe   :  { %758 = vmatprep.subr.bf16.mxu1 %v841_v14  ;;  %571 = vmatprep.mubr.bf16.mxu1 %v670_v38  ;;  %v867_v43 = vld [vmem:[%s1098_s1 + $0x108] sm:$0xff]   ;;  %v870_v46 = vld [vmem:[%s1098_s1 + $0x110] sm:$0xff]   ;;  %v872_v48 = vld [vmem:[%s1098_s1 + $0x158] sm:$0xff]  }
   0xf   :  { %737 = vmatpush3.bf16.msra.mxu0 %v840_v13  ;;  %v868_v44 = vld [vmem:[%s1098_s1 + $0x188] sm:$0xff]   ;;  %v871_v47 = vld [vmem:[%s1098_s1 + $0x190] sm:$0xff]   ;;  %v873_v49 = vld [vmem:[%s1098_s1 + $0x118] sm:$0xff]  }
  0x10   :  { %738 = vmatprep.subr.bf16.mxu0 %v843_v16  ;;  %v875_v50 = vld [vmem:[%s1098_s1 + $0x160] sm:$0xff]   ;;  %v874_v51 = vld [vmem:[%s1098_s1 + $0x198] sm:$0xff]   ;;  %v878_v53 = vld [vmem:[%s1098_s1 + $0x168] sm:$0xff]  }
  0x11   :  { %759 = vmatpush3.bf16.msra.mxu1 %v842_v15  ;;  %v876_v52 = vld [vmem:[%s1098_s1 + $0x120] sm:$0xff]   ;;  %v879_v55 = vld [vmem:[%s1098_s1 + $0x128] sm:$0xff]   ;;  %v881_v56 = vld [vmem:[%s1098_s1 + $0x170] sm:$0xff]  }
  0x12   :  { %760 = vmatprep.subr.bf16.mxu1 %v845_v18  ;;  %v877_v54 = vld [vmem:[%s1098_s1 + $0x1a0] sm:$0xff]   ;;  %v880_v57 = vld [vmem:[%s1098_s1 + $0x1a8] sm:$0xff]   ;;  %v17_v58 = vld [vmem:[%s1099_s0 + $0x10] sm:$0xff] }
  0x13   :  { %739 = vmatpush3.bf16.msra.mxu0 %v844_v17  ;;  %v882_v59 = vld [vmem:[%s1098_s1 + $0x130] sm:$0xff]   ;;  %v672_v60 = vcombine.high %v17_v58, %v17_v58  ;;  %v884_v61 = vld [vmem:[%s1098_s1 + $0x178] sm:$0xff]   ;;  %v671_v1 = vcombine.low %v17_v58, %v17_v58  ;;  %v666_v4 = vld [vmem:[%s1100_s2] ss:$0 sm:$0xff] }
  0x14   :  { %740 = vmatprep.subr.bf16.mxu0 %v847_v20  ;;  %v883_v62 = vld [vmem:[%s1098_s1 + $0x1b0] sm:$0xff]   ;;  %v885_v63 = vld [vmem:[%s1098_s1 + $0x138] sm:$0xff]  }
  0x15   :  { %761 = vmatpush3.bf16.msra.mxu1 %v846_v19  ;;  %v888_v0 = vld [vmem:[%s1098_s1 + $0x1b8] sm:$0xff]  }
  0x16   :  { %762 = vmatprep.subr.bf16.mxu1 %v849_v22  ;;  %v889_v2 = vld [vmem:[%s1099_s0 + $0x18] ss:$0 sps:$4 sm:$0xff]  }
  0x17   :  { %741 = vmatpush3.bf16.msra.mxu0 %v848_v21 }
  0x18   :  { %742 = vmatprep.subr.bf16.mxu0 %v851_v24 }
  0x19   :  { %763 = vmatpush3.bf16.msra.mxu1 %v850_v23 }
  0x1a   :  { %764 = vmatprep.subr.bf16.mxu1 %v853_v26 }
  0x1b   :  { %743 = vmatpush3.bf16.msra.mxu0 %v852_v25 }
  0x1c   :  { %744 = vmatprep.subr.bf16.mxu0 %v855_v28 }
  0x1d   :  { %765 = vmatpush3.bf16.msra.mxu1 %v854_v27 }
  0x1e   :  { %766 = vmatprep.subr.bf16.mxu1 %v857_v30 }
  0x1f   :  { %745 = vmatpush3.bf16.msra.mxu0 %v856_v29 }
  0x20   :  { %774 = vmatprep.subr.bf16.mxu0 %v861_v35 }
  0x21   :  { %767 = vmatpush3.bf16.msra.mxu1 %v860_v34 }
  0x22   :  { %532 = vmatmul.mubr.bf16.vlgmr.msra.gmra.mrb[0].mxu0 %v667_v32  ;;  %805 = vmatprep.subr.bf16.mxu1 %v890_v42 }
  0x23   :  { %775 = vmatpush3.bf16.msra.mxu0 %v864_v39  ;;  %611 = vmatprep.mubr.bf16.mxu0 %v672_v60 }
  0x24   :  { %572 = vmatmul.mubr.bf16.vlgmr.msra.gmra.mrb[0].mxu1 %v669_v37  ;;  %776 = vmatprep.subr.bf16.mxu0 %v866_v41 }
  0x25   :  { %806 = vmatpush3.bf16.msra.mxu1 %v865_v40  ;;  %821 = vmatprep.mubr.msk.bf16.mxu1 %vm891_vm0, %v890_v42 }
  0x26   :  { %807 = vmatprep.subr.bf16.mxu1 %v890_v42 }
  0x27   :  { %777 = vmatpush3.bf16.msra.mxu0 %v867_v43 }
  0x28   :  { %778 = vmatprep.subr.bf16.mxu0 %v869_v45 }
  0x29   :  { %808 = vmatpush3.bf16.msra.mxu1 %v868_v44 }
  0x2a   :  { %809 = vmatprep.subr.bf16.mxu1 %v890_v42 }
  0x2b   :  { %779 = vmatpush3.bf16.msra.mxu0 %v870_v46 }
  0x2c   :  { %780 = vmatprep.subr.bf16.mxu0 %v872_v48 }
  0x2d   :  { %810 = vmatpush3.bf16.msra.mxu1 %v871_v47 }
  0x2e   :  { %811 = vmatprep.subr.bf16.mxu1 %v890_v42 }
  0x2f   :  { %781 = vmatpush3.bf16.msra.mxu0 %v873_v49 }
  0x30   :  { %782 = vmatprep.subr.bf16.mxu0 %v875_v50 }
  0x31   :  { %812 = vmatpush3.bf16.msra.mxu1 %v874_v51 }
  0x32   :  { %813 = vmatprep.subr.bf16.mxu1 %v890_v42 }
  0x33   :  { %783 = vmatpush3.bf16.msra.mxu0 %v876_v52 }
  0x34   :  { %784 = vmatprep.subr.bf16.mxu0 %v878_v53 }
  0x35   :  { %814 = vmatpush3.bf16.msra.mxu1 %v877_v54 }
  0x36   :  { %815 = vmatprep.subr.bf16.mxu1 %v890_v42 }
  0x37   :  { %785 = vmatpush3.bf16.msra.mxu0 %v879_v55 }
  0x38   :  { %786 = vmatprep.subr.bf16.mxu0 %v881_v56 }
  0x39   :  { %816 = vmatpush3.bf16.msra.mxu1 %v880_v57 }
  0x3a   :  { %817 = vmatprep.subr.bf16.mxu1 %v890_v42 }
  0x3b   :  { %787 = vmatpush3.bf16.msra.mxu0 %v882_v59 }
  0x3c   :  { %788 = vmatprep.subr.bf16.mxu0 %v884_v61 }
  0x3d   :  { %818 = vmatpush3.bf16.msra.mxu1 %v883_v62 }
  0x3e   :  { %819 = vmatprep.subr.bf16.mxu1 %v890_v42 }
  0x3f   :  { %789 = vmatpush3.bf16.msra.mxu0 %v885_v63 }
  0x41   :  { %820 = vmatpush3.bf16.msra.mxu1 %v888_v0 }
  0x42   :  { %612 = vmatmul.mubr.bf16.vlgmr.msra.gmra.mrb[4].mxu0 %v671_v1 }
  0x44   :  { %822 = vmatmul.mubr.bf16.vlgmr.msra.gmra.mrb[4].mxu1 %v889_v2 }
  0xf5   :  { %v746_v3 = vpop.f32.mrb[0].mxu0 }
  0xf6   :  { %v747_v5 = vpop.f32.mrb[1].mxu0 }
  0xf7   :  { %v748_v6 = vadd.f32 %v747_v5, %v746_v3  ;;  %v749_v7 = vpop.f32.mrb[2].mxu0  ;;  %v768_v8 = vpop.f32.mrb[0].mxu1 }
  0xf8   :  { %v750_v9 = vpop.f32.mrb[3].mxu0  ;;  %v769_v10 = vpop.f32.mrb[1].mxu1 }
  0xf9   :  { %v534_v11 = vadd.f32 %v748_v6, %v666_v4  ;;  %v770_v12 = vadd.f32 %v769_v10, %v768_v8  ;;  %v771_v13 = vpop.f32.mrb[2].mxu1 }
  0xfa   :  { %v772_v14 = vpop.f32.mrb[3].mxu1 }
  0xfb   :  { %v574_v15 = vadd.f32 %v770_v12, %v534_v11 }
 0x115   :  { %v790_v16 = vpop.f32.mrb[4].mxu0 }
 0x116   :  { %v791_v17 = vpop.f32.mrb[5].mxu0 }
 0x117   :  { %v792_v18 = vadd.f32 %v791_v17, %v790_v16  ;;  %v793_v19 = vpop.f32.mrb[6].mxu0  ;;  %v653_v20 = vpop.f32.mrb[4].mxu1 }
 0x118   :  { %v794_v21 = vpop.f32.mrb[7].mxu0  ;;  %v823_v22 = vpop.f32.mrb[5].mxu1 }
 0x119   :  { %v614_v23 = vadd.f32 %v792_v18, %v574_v15  ;;  %v656_v24 = vpop.f32.mrb[6].mxu1 }
 0x11a   :  { %v824_v25 = vpop.f32.mrb[7].mxu1 }
 0x11b   :  { %v654_v26 = vadd.f32 %v653_v20, %v614_v23 }
 0x11d   :  { %v659_v27 = vmax.f32 %v654_v26, 0.0 }
 0x11f   :  { %v660_v28 = vpack.c.bf16 %v659_v27, %v659_v27 }
 0x121   :  { %661 = vst [vmem:[%s1101_s3] sm:$0xf] %v660_v28 }

// kernel: _lambda_.28
= control target key start
LH: loop header
LB: loop body
LE: loop exit
PB: predicated region body
PF: predicated region fallthrough
CT: control target
= control target key end

     0   :  { %v896_v42 = vmov 0.0   ;;  %vm897_vm0 = vmmov 0   ;;  %s1112_s1 = inlined_call_operand.vmem [shape: bf16[896,128], index: 1, kind: input, shape index: {}]   ;;  %s1113_s0 = inlined_call_operand.vmem [shape: bf16[8,896], index: 0, kind: input, shape index: {}]   ;;  %s1114_s2 = inlined_call_operand.vmem [shape: f32[1,128], index: 2, kind: input, shape index: {}]   ;;  %s1115_s3 = inlined_call_operand.vmem [shape: bf16[8,128], index: 3, kind: input, shape index: {}]   ;;  %s1116_s4 = inlined_call_operand.vmem [shape: bf16[8,128], index: 4, kind: output, shape index: {}]  }
   0x1   :  { %v833_v0 = vld [vmem:[%s1112_s1 + $0x40] sm:$0xff]   ;;  %v837_v4 = vld [vmem:[%s1112_s1 + $0x48] sm:$0xff]   ;;  %v841_v8 = vld [vmem:[%s1112_s1 + $0x50] sm:$0xff]  }
   0x2   :  { %v834_v1 = vld [vmem:[%s1112_s1] sm:$0xff]   ;;  %736 = vmatprep.subr.bf16.mxu0 %v833_v0  ;;  %v838_v5 = vld [vmem:[%s1112_s1 + $0x8] sm:$0xff]   ;;  %v842_v9 = vld [vmem:[%s1112_s1 + $0x10] sm:$0xff]  }
   0x3   :  { %v835_v2 = vld [vmem:[%s1112_s1 + $0xc0] sm:$0xff]   ;;  %737 = vmatpush3.bf16.msra.mxu0 %v834_v1  ;;  %v839_v6 = vld [vmem:[%s1112_s1 + $0xc8] sm:$0xff]   ;;  %v843_v10 = vld [vmem:[%s1112_s1 + $0xd0] sm:$0xff]  }
   0x4   :  { %v836_v3 = vld [vmem:[%s1112_s1 + $0x80] sm:$0xff]   ;;  %758 = vmatprep.subr.bf16.mxu1 %v835_v2  ;;  %738 = vmatprep.subr.bf16.mxu0 %v837_v4  ;;  %v840_v7 = vld [vmem:[%s1112_s1 + $0x88] sm:$0xff]   ;;  %v844_v11 = vld [vmem:[%s1112_s1 + $0x90] sm:$0xff]  }
   0x5   :  { %759 = vmatpush3.bf16.msra.mxu1 %v836_v3  ;;  %v845_v12 = vld [vmem:[%s1112_s1 + $0x58] sm:$0xff]   ;;  %v849_v16 = vld [vmem:[%s1112_s1 + $0x60] sm:$0xff]   ;;  %v853_v20 = vld [vmem:[%s1112_s1 + $0x68] sm:$0xff]  }
   0x6   :  { %760 = vmatprep.subr.bf16.mxu1 %v839_v6  ;;  %v846_v13 = vld [vmem:[%s1112_s1 + $0x18] sm:$0xff]   ;;  %v850_v17 = vld [vmem:[%s1112_s1 + $0x20] sm:$0xff]   ;;  %v854_v21 = vld [vmem:[%s1112_s1 + $0x28] sm:$0xff]  }
   0x7   :  { %739 = vmatpush3.bf16.msra.mxu0 %v838_v5  ;;  %v847_v14 = vld [vmem:[%s1112_s1 + $0xd8] sm:$0xff]   ;;  %v851_v18 = vld [vmem:[%s1112_s1 + $0xe0] sm:$0xff]   ;;  %v855_v22 = vld [vmem:[%s1112_s1 + $0xe8] sm:$0xff]  }
   0x8   :  { %740 = vmatprep.subr.bf16.mxu0 %v841_v8  ;;  %v848_v15 = vld [vmem:[%s1112_s1 + $0x98] sm:$0xff]   ;;  %v852_v19 = vld [vmem:[%s1112_s1 + $0xa0] sm:$0xff]   ;;  %v856_v23 = vld [vmem:[%s1112_s1 + $0xa8] sm:$0xff]  }
   0x9   :  { %761 = vmatpush3.bf16.msra.mxu1 %v840_v7  ;;  %v857_v24 = vld [vmem:[%s1112_s1 + $0x70] sm:$0xff]   ;;  %v861_v28 = vld [vmem:[%s1112_s1 + $0x78] sm:$0xff]   ;;  %v18_v31 = vld [vmem:[%s1113_s0] sm:$0xff] }
   0xa   :  { %762 = vmatprep.subr.bf16.mxu1 %v843_v10  ;;  %v858_v25 = vld [vmem:[%s1112_s1 + $0x30] sm:$0xff]   ;;  %v862_v29 = vld [vmem:[%s1112_s1 + $0x38] sm:$0xff]   ;;  %v673_v32 = vcombine.low %v18_v31, %v18_v31  ;;  %v674_v33 = vcombine.high %v18_v31, %v18_v31  ;;  %v867_v35 = vld [vmem:[%s1112_s1 + $0x140] sm:$0xff]  }
   0xb   :  { %741 = vmatpush3.bf16.msra.mxu0 %v842_v9  ;;  %v859_v26 = vld [vmem:[%s1112_s1 + $0xf0] sm:$0xff]   ;;  %v863_v30 = vld [vmem:[%s1112_s1 + $0xf8] sm:$0xff]   ;;  %v19_v36 = vld [vmem:[%s1113_s0 + $0x8] sm:$0xff] }
   0xc   :  { %742 = vmatprep.subr.bf16.mxu0 %v845_v12  ;;  %v860_v27 = vld [vmem:[%s1112_s1 + $0xb0] sm:$0xff]   ;;  %v866_v34 = vld [vmem:[%s1112_s1 + $0xb8] sm:$0xff]   ;;  %534 = vmatprep.mubr.bf16.mxu0 %v674_v33  ;;  %v675_v37 = vcombine.low %v19_v36, %v19_v36  ;;  %v676_v38 = vcombine.high %v19_v36, %v19_v36  ;;  %v870_v39 = vld [vmem:[%s1112_s1 + $0x100] sm:$0xff]  }
   0xd   :  { %763 = vmatpush3.bf16.msra.mxu1 %v844_v11  ;;  %v871_v40 = vld [vmem:[%s1112_s1 + $0x180] sm:$0xff]   ;;  %v872_v41 = vld [vmem:[%s1112_s1 + $0x148] sm:$0xff]   ;;  %v875_v45 = vld [vmem:[%s1112_s1 + $0x150] sm:$0xff]  }
   0xe   :  { %764 = vmatprep.subr.bf16.mxu1 %v847_v14  ;;  %574 = vmatprep.mubr.bf16.mxu1 %v676_v38  ;;  %v873_v43 = vld [vmem:[%s1112_s1 + $0x108] sm:$0xff]   ;;  %v876_v46 = vld [vmem:[%s1112_s1 + $0x110] sm:$0xff]   ;;  %v878_v48 = vld [vmem:[%s1112_s1 + $0x158] sm:$0xff]  }
   0xf   :  { %743 = vmatpush3.bf16.msra.mxu0 %v846_v13  ;;  %v874_v44 = vld [vmem:[%s1112_s1 + $0x188] sm:$0xff]   ;;  %v877_v47 = vld [vmem:[%s1112_s1 + $0x190] sm:$0xff]   ;;  %v879_v49 = vld [vmem:[%s1112_s1 + $0x118] sm:$0xff]  }
  0x10   :  { %744 = vmatprep.subr.bf16.mxu0 %v849_v16  ;;  %v881_v50 = vld [vmem:[%s1112_s1 + $0x160] sm:$0xff]   ;;  %v880_v51 = vld [vmem:[%s1112_s1 + $0x198] sm:$0xff]   ;;  %v884_v53 = vld [vmem:[%s1112_s1 + $0x168] sm:$0xff]  }
  0x11   :  { %765 = vmatpush3.bf16.msra.mxu1 %v848_v15  ;;  %v882_v52 = vld [vmem:[%s1112_s1 + $0x120] sm:$0xff]   ;;  %v885_v55 = vld [vmem:[%s1112_s1 + $0x128] sm:$0xff]   ;;  %v887_v56 = vld [vmem:[%s1112_s1 + $0x170] sm:$0xff]  }
  0x12   :  { %766 = vmatprep.subr.bf16.mxu1 %v851_v18  ;;  %v883_v54 = vld [vmem:[%s1112_s1 + $0x1a0] sm:$0xff]   ;;  %v886_v57 = vld [vmem:[%s1112_s1 + $0x1a8] sm:$0xff]   ;;  %v20_v58 = vld [vmem:[%s1113_s0 + $0x10] sm:$0xff] }
  0x13   :  { %745 = vmatpush3.bf16.msra.mxu0 %v850_v17  ;;  %v888_v59 = vld [vmem:[%s1112_s1 + $0x130] sm:$0xff]   ;;  %v678_v60 = vcombine.high %v20_v58, %v20_v58  ;;  %v890_v61 = vld [vmem:[%s1112_s1 + $0x178] sm:$0xff]   ;;  %v677_v1 = vcombine.low %v20_v58, %v20_v58  ;;  %v672_v4 = vld [vmem:[%s1114_s2] ss:$0 sm:$0xff] }
  0x14   :  { %746 = vmatprep.subr.bf16.mxu0 %v853_v20  ;;  %v889_v62 = vld [vmem:[%s1112_s1 + $0x1b0] sm:$0xff]   ;;  %v891_v63 = vld [vmem:[%s1112_s1 + $0x138] sm:$0xff]   ;;  %v662_v18 = vld [vmem:[%s1115_s3] sm:$0xf] }
  0x15   :  { %767 = vmatpush3.bf16.msra.mxu1 %v852_v19  ;;  %v894_v0 = vld [vmem:[%s1112_s1 + $0x1b8] sm:$0xff]  }
  0x16   :  { %768 = vmatprep.subr.bf16.mxu1 %v855_v22  ;;  %v895_v2 = vld [vmem:[%s1113_s0 + $0x18] ss:$0 sps:$4 sm:$0xff]  }
  0x17   :  { %747 = vmatpush3.bf16.msra.mxu0 %v854_v21 }
  0x18   :  { %748 = vmatprep.subr.bf16.mxu0 %v857_v24 }
  0x19   :  { %769 = vmatpush3.bf16.msra.mxu1 %v856_v23 }
  0x1a   :  { %770 = vmatprep.subr.bf16.mxu1 %v859_v26 }
  0x1b   :  { %749 = vmatpush3.bf16.msra.mxu0 %v858_v25  ;;  %v663_v25 = vunpack.c.l.bf16 %v662_v18 }
  0x1c   :  { %750 = vmatprep.subr.bf16.mxu0 %v861_v28 }
  0x1d   :  { %771 = vmatpush3.bf16.msra.mxu1 %v860_v27 }
  0x1e   :  { %772 = vmatprep.subr.bf16.mxu1 %v863_v30 }
  0x1f   :  { %751 = vmatpush3.bf16.msra.mxu0 %v862_v29 }
  0x20   :  { %780 = vmatprep.subr.bf16.mxu0 %v867_v35 }
  0x21   :  { %773 = vmatpush3.bf16.msra.mxu1 %v866_v34 }
  0x22   :  { %535 = vmatmul.mubr.bf16.vlgmr.msra.gmra.mrb[0].mxu0 %v673_v32  ;;  %811 = vmatprep.subr.bf16.mxu1 %v896_v42 }
  0x23   :  { %781 = vmatpush3.bf16.msra.mxu0 %v870_v39  ;;  %614 = vmatprep.mubr.bf16.mxu0 %v678_v60 }
  0x24   :  { %575 = vmatmul.mubr.bf16.vlgmr.msra.gmra.mrb[0].mxu1 %v675_v37  ;;  %782 = vmatprep.subr.bf16.mxu0 %v872_v41 }
  0x25   :  { %812 = vmatpush3.bf16.msra.mxu1 %v871_v40  ;;  %827 = vmatprep.mubr.msk.bf16.mxu1 %vm897_vm0, %v896_v42 }
  0x26   :  { %813 = vmatprep.subr.bf16.mxu1 %v896_v42 }
  0x27   :  { %783 = vmatpush3.bf16.msra.mxu0 %v873_v43 }
  0x28   :  { %784 = vmatprep.subr.bf16.mxu0 %v875_v45 }
  0x29   :  { %814 = vmatpush3.bf16.msra.mxu1 %v874_v44 }
  0x2a   :  { %815 = vmatprep.subr.bf16.mxu1 %v896_v42 }
  0x2b   :  { %785 = vmatpush3.bf16.msra.mxu0 %v876_v46 }
  0x2c   :  { %786 = vmatprep.subr.bf16.mxu0 %v878_v48 }
  0x2d   :  { %816 = vmatpush3.bf16.msra.mxu1 %v877_v47 }
  0x2e   :  { %817 = vmatprep.subr.bf16.mxu1 %v896_v42 }
  0x2f   :  { %787 = vmatpush3.bf16.msra.mxu0 %v879_v49 }
  0x30   :  { %788 = vmatprep.subr.bf16.mxu0 %v881_v50 }
  0x31   :  { %818 = vmatpush3.bf16.msra.mxu1 %v880_v51 }
  0x32   :  { %819 = vmatprep.subr.bf16.mxu1 %v896_v42 }
  0x33   :  { %789 = vmatpush3.bf16.msra.mxu0 %v882_v52 }
  0x34   :  { %790 = vmatprep.subr.bf16.mxu0 %v884_v53 }
  0x35   :  { %820 = vmatpush3.bf16.msra.mxu1 %v883_v54 }
  0x36   :  { %821 = vmatprep.subr.bf16.mxu1 %v896_v42 }
  0x37   :  { %791 = vmatpush3.bf16.msra.mxu0 %v885_v55 }
  0x38   :  { %792 = vmatprep.subr.bf16.mxu0 %v887_v56 }
  0x39   :  { %822 = vmatpush3.bf16.msra.mxu1 %v886_v57 }
  0x3a   :  { %823 = vmatprep.subr.bf16.mxu1 %v896_v42 }
  0x3b   :  { %793 = vmatpush3.bf16.msra.mxu0 %v888_v59 }
  0x3c   :  { %794 = vmatprep.subr.bf16.mxu0 %v890_v61 }
  0x3d   :  { %824 = vmatpush3.bf16.msra.mxu1 %v889_v62 }
  0x3e   :  { %825 = vmatprep.subr.bf16.mxu1 %v896_v42 }
  0x3f   :  { %795 = vmatpush3.bf16.msra.mxu0 %v891_v63 }
  0x41   :  { %826 = vmatpush3.bf16.msra.mxu1 %v894_v0 }
  0x42   :  { %615 = vmatmul.mubr.bf16.vlgmr.msra.gmra.mrb[4].mxu0 %v677_v1 }
  0x44   :  { %828 = vmatmul.mubr.bf16.vlgmr.msra.gmra.mrb[4].mxu1 %v895_v2 }
  0xf5   :  { %v752_v3 = vpop.f32.mrb[0].mxu0 }
  0xf6   :  { %v753_v5 = vpop.f32.mrb[1].mxu0 }
  0xf7   :  { %v754_v6 = vadd.f32 %v753_v5, %v752_v3  ;;  %v755_v7 = vpop.f32.mrb[2].mxu0  ;;  %v774_v8 = vpop.f32.mrb[0].mxu1 }
  0xf8   :  { %v756_v9 = vpop.f32.mrb[3].mxu0  ;;  %v775_v10 = vpop.f32.mrb[1].mxu1 }
  0xf9   :  { %v537_v11 = vadd.f32 %v754_v6, %v672_v4  ;;  %v776_v12 = vadd.f32 %v775_v10, %v774_v8  ;;  %v777_v13 = vpop.f32.mrb[2].mxu1 }
  0xfa   :  { %v778_v14 = vpop.f32.mrb[3].mxu1 }
  0xfb   :  { %v577_v15 = vadd.f32 %v776_v12, %v537_v11 }
 0x115   :  { %v796_v16 = vpop.f32.mrb[4].mxu0 }
 0x116   :  { %v797_v17 = vpop.f32.mrb[5].mxu0 }
 0x117   :  { %v798_v19 = vadd.f32 %v797_v17, %v796_v16  ;;  %v799_v20 = vpop.f32.mrb[6].mxu0  ;;  %v656_v21 = vpop.f32.mrb[4].mxu1 }
 0x118   :  { %v800_v22 = vpop.f32.mrb[7].mxu0  ;;  %v829_v23 = vpop.f32.mrb[5].mxu1 }
 0x119   :  { %v617_v24 = vadd.f32 %v798_v19, %v577_v15  ;;  %v659_v26 = vpop.f32.mrb[6].mxu1 }
 0x11a   :  { %v830_v27 = vpop.f32.mrb[7].mxu1 }
 0x11b   :  { %v657_v28 = vadd.f32 %v656_v21, %v617_v24 }
 0x11d   :  { %v664_v29 = vadd.f32 %v663_v25, %v657_v28 }
 0x11f   :  { %v665_v30 = vmax.f32 %v664_v29, 0.0 }
 0x121   :  { %v666_v31 = vpack.c.bf16 %v665_v30, %v665_v30 }
 0x123   :  { %667 = vst [vmem:[%s1116_s4] sm:$0xf] %v666_v31 }

// kernel: _lambda_.32
= control target key start
LH: loop header
LB: loop body
LE: loop exit
PB: predicated region body
PF: predicated region fallthrough
CT: control target
= control target key end

     0   :  { %s175_s6 = smov 0   ;;  %s195_s0 = inlined_call_operand.vmem [shape: bf16[2,1,64], index: 0, kind: input, shape index: {}]   ;;  %s196_s1 = inlined_call_operand.vmem [shape: f32[2,1,64], index: 1, kind: output, shape index: {}]  }
   0x1 LB: > { %s156_s7 = sadd.s32 4294967295, %s177_s6   ;;  %p160_p0 = scmp.ge.s32.totalorder %s177_s6, 1  ;;  %s177_s6 = sphi %s175_s6, %s11_s6  }
   0x2   : > { %p85_p1 = scmp.lt.s32.totalorder %s177_s6, 3 }
   0x4   : > { %p86_p2 = pnand %p160_p0, %p85_p1 }
   0x5   : > { %p101_p3 = scmp.lt.s32.totalorder (!%p86_p2), %s156_s7, 1  ;;  %vm110_vm0 = vcmask (!%p86_p2), 516096  }
   0x6   : > { %89 = sbr.rel (%p86_p2) target bundleno = 19 (0x13), region = 24 }
   0xd   : > { %s198_s7 = smov (!%p101_p3, %s156_s7), 1 }
   0xe   : > { %s103_s10 = scalar_lea.vmem %s195_s0, %s198_s7  ;;  %s106_s13 = scalar_lea.vmem %s196_s1, %s198_s7 }
   0xf   : > { %v107_v0 = vld [vmem:[%s103_s10] sm:$0x1] }
  0x10   : > { %v108_v1 = vunpack.c.l.bf16 %v107_v0 }
  0x12   : > { %111 = vst.msk [vmem:[%s106_s13] sm:$0x1] %vm110_vm0, %v108_v1 }
  0x13 PF: > { %s11_s6 = sadd.s32 1, %s177_s6  }
  0x14   : > { %p8_p4 = scmp.ge.s32.totalorder %s11_s6, 4  }
  0x16   :  { %10 = sbr.rel (!%p8_p4) target bundleno = 1 (0x1), region = 54 }

// kernel: _lambda_.33
= control target key start
LH: loop header
LB: loop body
LE: loop exit
PB: predicated region body
PF: predicated region fallthrough
CT: control target
= control target key end

     0   :  { %v180_v0 = vmov 0.0   ;;  %vm181_vm0 = vmmov 0   ;;  %s235_s1 = inlined_call_operand.vmem [shape: bf16[128,128], index: 1, kind: input, shape index: {}]   ;;  %s236_s0 = inlined_call_operand.vmem [shape: bf16[8,128], index: 0, kind: input, shape index: {}]   ;;  %s237_s2 = inlined_call_operand.vmem [shape: f32[1,128], index: 2, kind: input, shape index: {}]   ;;  %s238_s3 = inlined_call_operand.vmem [shape: f32[8,128], index: 3, kind: output, shape index: {}]  }
   0x1   :  { %150 = vmatprep.subr.bf16.mxu0 %v180_v0  ;;  %v172_v1 = vld [vmem:[%s235_s1] sm:$0xff]   ;;  %166 = vmatprep.mubr.msk.bf16.mxu0 %vm181_vm0, %v180_v0  ;;  %v173_v2 = vld [vmem:[%s235_s1 + $0x8] sm:$0xff]   ;;  %v174_v3 = vld [vmem:[%s235_s1 + $0x10] sm:$0xff]  }
   0x2   :  { %151 = vmatpush3.bf16.msra.mxu0 %v172_v1  ;;  %v175_v4 = vld [vmem:[%s235_s1 + $0x18] sm:$0xff]   ;;  %v176_v5 = vld [vmem:[%s235_s1 + $0x20] sm:$0xff]   ;;  %v177_v6 = vld [vmem:[%s235_s1 + $0x28] sm:$0xff]  }
   0x3   :  { %152 = vmatprep.subr.bf16.mxu0 %v180_v0  ;;  %v178_v7 = vld [vmem:[%s235_s1 + $0x30] sm:$0xff]   ;;  %v179_v8 = vld [vmem:[%s235_s1 + $0x38] sm:$0xff]   ;;  %v15_v9 = vld [vmem:[%s236_s0] sm:$0xf] }
   0x4   :  { %v132_v10 = vld [vmem:[%s237_s2] ss:$0 sm:$0xff] }
   0x6   :  { %153 = vmatpush3.bf16.msra.mxu0 %v173_v2 }
   0x7   :  { %154 = vmatprep.subr.bf16.mxu0 %v180_v0 }
   0xa   :  { %155 = vmatpush3.bf16.msra.mxu0 %v174_v3 }
   0xb   :  { %156 = vmatprep.subr.bf16.mxu0 %v180_v0 }
   0xe   :  { %157 = vmatpush3.bf16.msra.mxu0 %v175_v4 }
   0xf   :  { %158 = vmatprep.subr.bf16.mxu0 %v180_v0 }
  0x12   :  { %159 = vmatpush3.bf16.msra.mxu0 %v176_v5 }
  0x13   :  { %160 = vmatprep.subr.bf16.mxu0 %v180_v0 }
  0x16   :  { %161 = vmatpush3.bf16.msra.mxu0 %v177_v6 }
  0x17   :  { %162 = vmatprep.subr.bf16.mxu0 %v180_v0 }
  0x1a   :  { %163 = vmatpush3.bf16.msra.mxu0 %v178_v7 }
  0x1b   :  { %164 = vmatprep.subr.bf16.mxu0 %v180_v0 }
  0x1e   :  { %165 = vmatpush3.bf16.msra.mxu0 %v179_v8 }
  0x21   :  { %167 = vmatmul.mubr.bf16.vlgmr.msra.gmra.mrb[0].mxu0 %v15_v9 }
  0xf4   :  { %v121_v11 = vpop.f32.mrb[0].mxu0 }
  0xf5   :  { %v122_v12 = vadd.f32 %v132_v10, %v121_v11  ;;  %v168_v13 = vpop.f32.mrb[1].mxu0 }
  0xf6   :  { %v124_v14 = vpop.f32.mrb[2].mxu0 }
  0xf7   :  { %127 = vst [vmem:[%s238_s3] sm:$0xff] %v122_v12  ;;  %v169_v15 = vpop.f32.mrb[3].mxu0 }

// kernel: _lambda_.31
= control target key start
LH: loop header
LB: loop body
LE: loop exit
PB: predicated region body
PF: predicated region fallthrough
CT: control target
= control target key end

     0   :  { %s2065_s1 = inlined_call_operand.vmem [shape: bf16[1792,128], index: 1, kind: input, shape index: {}]   ;;  %s2066_s0 = inlined_call_operand.vmem [shape: bf16[8,1792], index: 0, kind: input, shape index: {}]   ;;  %s2067_s2 = inlined_call_operand.vmem [shape: f32[1,128], index: 2, kind: input, shape index: {}]   ;;  %s2068_s3 = inlined_call_operand.vmem [shape: bf16[8,128], index: 3, kind: input, shape index: {}]   ;;  %s2069_s4 = inlined_call_operand.vmem [shape: bf16[8,128], index: 4, kind: output, shape index: {}]  }
   0x1   :  { %v1548_v0 = vld [vmem:[%s2065_s1 + $0x40] sm:$0xff]   ;;  %v1552_v4 = vld [vmem:[%s2065_s1 + $0x48] sm:$0xff]   ;;  %v1556_v8 = vld [vmem:[%s2065_s1 + $0x50] sm:$0xff]  }
   0x2   :  { %v1549_v1 = vld [vmem:[%s2065_s1] sm:$0xff]   ;;  %1394 = vmatprep.subr.bf16.mxu0 %v1548_v0  ;;  %v1553_v5 = vld [vmem:[%s2065_s1 + $0x8] sm:$0xff]   ;;  %v1557_v9 = vld [vmem:[%s2065_s1 + $0x10] sm:$0xff]  }
   0x3   :  { %v1550_v2 = vld [vmem:[%s2065_s1 + $0xc0] sm:$0xff]   ;;  %1395 = vmatpush3.bf16.msra.mxu0 %v1549_v1  ;;  %v1554_v6 = vld [vmem:[%s2065_s1 + $0xc8] sm:$0xff]   ;;  %v1558_v10 = vld [vmem:[%s2065_s1 + $0xd0] sm:$0xff]  }
   0x4   :  { %v1551_v3 = vld [vmem:[%s2065_s1 + $0x80] sm:$0xff]   ;;  %1416 = vmatprep.subr.bf16.mxu1 %v1550_v2  ;;  %1396 = vmatprep.subr.bf16.mxu0 %v1552_v4  ;;  %v1555_v7 = vld [vmem:[%s2065_s1 + $0x88] sm:$0xff]   ;;  %v1559_v11 = vld [vmem:[%s2065_s1 + $0x90] sm:$0xff]  }
   0x5   :  { %1417 = vmatpush3.bf16.msra.mxu1 %v1551_v3  ;;  %v1560_v12 = vld [vmem:[%s2065_s1 + $0x58] sm:$0xff]   ;;  %v1564_v16 = vld [vmem:[%s2065_s1 + $0x60] sm:$0xff]   ;;  %v1568_v20 = vld [vmem:[%s2065_s1 + $0x68] sm:$0xff]  }
   0x6   :  { %1418 = vmatprep.subr.bf16.mxu1 %v1554_v6  ;;  %v1561_v13 = vld [vmem:[%s2065_s1 + $0x18] sm:$0xff]   ;;  %v1565_v17 = vld [vmem:[%s2065_s1 + $0x20] sm:$0xff]   ;;  %v1569_v21 = vld [vmem:[%s2065_s1 + $0x28] sm:$0xff]  }
   0x7   :  { %1397 = vmatpush3.bf16.msra.mxu0 %v1553_v5  ;;  %v1562_v14 = vld [vmem:[%s2065_s1 + $0xd8] sm:$0xff]   ;;  %v1566_v18 = vld [vmem:[%s2065_s1 + $0xe0] sm:$0xff]   ;;  %v1570_v22 = vld [vmem:[%s2065_s1 + $0xe8] sm:$0xff]  }
   0x8   :  { %1398 = vmatprep.subr.bf16.mxu0 %v1556_v8  ;;  %v1563_v15 = vld [vmem:[%s2065_s1 + $0x98] sm:$0xff]   ;;  %v1567_v19 = vld [vmem:[%s2065_s1 + $0xa0] sm:$0xff]   ;;  %v1571_v23 = vld [vmem:[%s2065_s1 + $0xa8] sm:$0xff]  }
   0x9   :  { %1419 = vmatpush3.bf16.msra.mxu1 %v1555_v7  ;;  %v1572_v24 = vld [vmem:[%s2065_s1 + $0x70] sm:$0xff]   ;;  %v1576_v28 = vld [vmem:[%s2065_s1 + $0x78] sm:$0xff]   ;;  %v18_v31 = vld [vmem:[%s2066_s0] sm:$0xff] }
   0xa   :  { %1420 = vmatprep.subr.bf16.mxu1 %v1558_v10  ;;  %v1573_v25 = vld [vmem:[%s2065_s1 + $0x30] sm:$0xff]   ;;  %v1577_v29 = vld [vmem:[%s2065_s1 + $0x38] sm:$0xff]   ;;  %v1268_v32 = vcombine.low %v18_v31, %v18_v31  ;;  %v1269_v33 = vcombine.high %v18_v31, %v18_v31  ;;  %v1582_v35 = vld [vmem:[%s2065_s1 + $0x140] sm:$0xff]  }
   0xb   :  { %1399 = vmatpush3.bf16.msra.mxu0 %v1557_v9  ;;  %v1574_v26 = vld [vmem:[%s2065_s1 + $0xf0] sm:$0xff]   ;;  %v1578_v30 = vld [vmem:[%s2065_s1 + $0xf8] sm:$0xff]   ;;  %v19_v36 = vld [vmem:[%s2066_s0 + $0x8] sm:$0xff] }
   0xc   :  { %1400 = vmatprep.subr.bf16.mxu0 %v1560_v12  ;;  %v1575_v27 = vld [vmem:[%s2065_s1 + $0xb0] sm:$0xff]   ;;  %v1581_v34 = vld [vmem:[%s2065_s1 + $0xb8] sm:$0xff]   ;;  %1009 = vmatprep.mubr.bf16.mxu0 %v1269_v33  ;;  %v1270_v37 = vcombine.low %v19_v36, %v19_v36  ;;  %v1271_v38 = vcombine.high %v19_v36, %v19_v36  ;;  %v1585_v39 = vld [vmem:[%s2065_s1 + $0x100] sm:$0xff]  }
   0xd   :  { %1421 = vmatpush3.bf16.msra.mxu1 %v1559_v11  ;;  %v1586_v40 = vld [vmem:[%s2065_s1 + $0x1c0] sm:$0xff]   ;;  %v1588_v42 = vld [vmem:[%s2065_s1 + $0x148] sm:$0xff]   ;;  %v1592_v46 = vld [vmem:[%s2065_s1 + $0x150] sm:$0xff]  }
   0xe   :  { %1422 = vmatprep.subr.bf16.mxu1 %v1562_v14  ;;  %1049 = vmatprep.mubr.bf16.mxu1 %v1271_v38  ;;  %v1587_v41 = vld [vmem:[%s2065_s1 + $0x180] sm:$0xff]   ;;  %v1589_v43 = vld [vmem:[%s2065_s1 + $0x108] sm:$0xff]   ;;  %v1593_v47 = vld [vmem:[%s2065_s1 + $0x110] sm:$0xff]  }
   0xf   :  { %1401 = vmatpush3.bf16.msra.mxu0 %v1561_v13  ;;  %v1590_v44 = vld [vmem:[%s2065_s1 + $0x1c8] sm:$0xff]   ;;  %v1594_v48 = vld [vmem:[%s2065_s1 + $0x1d0] sm:$0xff]   ;;  %v1596_v50 = vld [vmem:[%s2065_s1 + $0x158] sm:$0xff]  }
  0x10   :  { %1402 = vmatprep.subr.bf16.mxu0 %v1564_v16  ;;  %v1591_v45 = vld [vmem:[%s2065_s1 + $0x188] sm:$0xff]   ;;  %v1595_v49 = vld [vmem:[%s2065_s1 + $0x190] sm:$0xff]   ;;  %v1597_v51 = vld [vmem:[%s2065_s1 + $0x118] sm:$0xff]  }
  0x11   :  { %1423 = vmatpush3.bf16.msra.mxu1 %v1563_v15  ;;  %v1598_v52 = vld [vmem:[%s2065_s1 + $0x1d8] sm:$0xff]   ;;  %v1600_v54 = vld [vmem:[%s2065_s1 + $0x160] sm:$0xff]   ;;  %v1604_v58 = vld [vmem:[%s2065_s1 + $0x168] sm:$0xff]  }
  0x12   :  { %1424 = vmatprep.subr.bf16.mxu1 %v1566_v18  ;;  %v1599_v53 = vld [vmem:[%s2065_s1 + $0x198] sm:$0xff]   ;;  %v1601_v55 = vld [vmem:[%s2065_s1 + $0x120] sm:$0xff]   ;;  %v1605_v59 = vld [vmem:[%s2065_s1 + $0x128] sm:$0xff]  }
  0x13   :  { %1403 = vmatpush3.bf16.msra.mxu0 %v1565_v17  ;;  %v1602_v56 = vld [vmem:[%s2065_s1 + $0x1e0] sm:$0xff]   ;;  %v1606_v60 = vld [vmem:[%s2065_s1 + $0x1e8] sm:$0xff]   ;;  %v1608_v62 = vld [vmem:[%s2065_s1 + $0x170] sm:$0xff]  }
  0x14   :  { %1404 = vmatprep.subr.bf16.mxu0 %v1568_v20  ;;  %v1603_v57 = vld [vmem:[%s2065_s1 + $0x1a0] sm:$0xff]   ;;  %v1607_v61 = vld [vmem:[%s2065_s1 + $0x1a8] sm:$0xff]   ;;  %v1609_v63 = vld [vmem:[%s2065_s1 + $0x130] sm:$0xff]  }
  0x15   :  { %1425 = vmatpush3.bf16.msra.mxu1 %v1567_v19  ;;  %v1610_v0 = vld [vmem:[%s2065_s1 + $0x1f0] sm:$0xff]   ;;  %v1612_v2 = vld [vmem:[%s2065_s1 + $0x178] sm:$0xff]   ;;  %v1618_v9 = vld [vmem:[%s2065_s1 + $0x240] sm:$0xff]  }
  0x16   :  { %1426 = vmatprep.subr.bf16.mxu1 %v1570_v22  ;;  %v1611_v1 = vld [vmem:[%s2065_s1 + $0x1b0] sm:$0xff]   ;;  %v1613_v3 = vld [vmem:[%s2065_s1 + $0x138] sm:$0xff]   ;;  %v1621_v13 = vld [vmem:[%s2065_s1 + $0x200] sm:$0xff]  }
  0x17   :  { %1405 = vmatpush3.bf16.msra.mxu0 %v1569_v21  ;;  %v1614_v4 = vld [vmem:[%s2065_s1 + $0x1f8] sm:$0xff]   ;;  %v20_v5 = vld [vmem:[%s2066_s0 + $0x10] sm:$0xff]  ;;  %v1622_v14 = vld [vmem:[%s2065_s1 + $0x2c0] sm:$0xff]  }
  0x18   :  { %1406 = vmatprep.subr.bf16.mxu0 %v1572_v24  ;;  %v1272_v6 = vcombine.low %v20_v5, %v20_v5  ;;  %v1273_v7 = vcombine.high %v20_v5, %v20_v5  ;;  %v1617_v8 = vld [vmem:[%s2065_s1 + $0x1b8] sm:$0xff]   ;;  %v1623_v15 = vld [vmem:[%s2065_s1 + $0x280] sm:$0xff]   ;;  %v1624_v16 = vld [vmem:[%s2065_s1 + $0x248] sm:$0xff]  }
  0x19   :  { %1427 = vmatpush3.bf16.msra.mxu1 %v1571_v23  ;;  %v21_v10 = vld [vmem:[%s2066_s0 + $0x18] sm:$0xff]  ;;  %v1625_v17 = vld [vmem:[%s2065_s1 + $0x208] sm:$0xff]   ;;  %v1628_v20 = vld [vmem:[%s2065_s1 + $0x250] sm:$0xff]  }
  0x1a   :  { %1428 = vmatprep.subr.bf16.mxu1 %v1574_v26  ;;  %v1274_v11 = vcombine.low %v21_v10, %v21_v10  ;;  %v1275_v12 = vcombine.high %v21_v10, %v21_v10  ;;  %v1626_v18 = vld [vmem:[%s2065_s1 + $0x2c8] sm:$0xff]   ;;  %v1629_v21 = vld [vmem:[%s2065_s1 + $0x210] sm:$0xff]   ;;  %v1632_v24 = vld [vmem:[%s2065_s1 + $0x258] sm:$0xff]  }
  0x1b   :  { %1407 = vmatpush3.bf16.msra.mxu0 %v1573_v25  ;;  %v1627_v19 = vld [vmem:[%s2065_s1 + $0x288] sm:$0xff]   ;;  %v1630_v22 = vld [vmem:[%s2065_s1 + $0x2d0] sm:$0xff]   ;;  %v1633_v25 = vld [vmem:[%s2065_s1 + $0x218] sm:$0xff]  }
  0x1c   :  { %1408 = vmatprep.subr.bf16.mxu0 %v1576_v28  ;;  %v1631_v23 = vld [vmem:[%s2065_s1 + $0x290] sm:$0xff]   ;;  %v1634_v26 = vld [vmem:[%s2065_s1 + $0x2d8] sm:$0xff]   ;;  %v1636_v28 = vld [vmem:[%s2065_s1 + $0x260] sm:$0xff]  }
  0x1d   :  { %1429 = vmatpush3.bf16.msra.mxu1 %v1575_v27  ;;  %v1635_v27 = vld [vmem:[%s2065_s1 + $0x298] sm:$0xff]   ;;  %v1639_v31 = vld [vmem:[%s2065_s1 + $0x2a0] sm:$0xff]   ;;  %v1641_v33 = vld [vmem:[%s2065_s1 + $0x228] sm:$0xff]  }
  0x1e   :  { %1430 = vmatprep.subr.bf16.mxu1 %v1578_v30  ;;  %v1638_v30 = vld [vmem:[%s2065_s1 + $0x2e0] sm:$0xff]   ;;  %v1644_v36 = vld [vmem:[%s2065_s1 + $0x270] sm:$0xff]  }
  0x1f   :  { %1409 = vmatpush3.bf16.msra.mxu0 %v1577_v29  ;;  %v1637_v29 = vld [vmem:[%s2065_s1 + $0x220] sm:$0xff]   ;;  %v1646_v38 = vld [vmem:[%s2065_s1 + $0x2f0] sm:$0xff]  }
  0x20   :  { %1438 = vmatprep.subr.bf16.mxu0 %v1582_v35  ;;  %v1643_v35 = vld [vmem:[%s2065_s1 + $0x2a8] sm:$0xff]  }
  0x21   :  { %1431 = vmatpush3.bf16.msra.mxu1 %v1581_v34  ;;  %v1642_v34 = vld [vmem:[%s2065_s1 + $0x2e8] sm:$0xff]  }
  0x22   :  { %1010 = vmatmul.mubr.bf16.vlgmr.msra.gmra.mrb[0].mxu0 %v1268_v32  ;;  %1460 = vmatprep.subr.bf16.mxu1 %v1586_v40  ;;  %v1640_v32 = vld [vmem:[%s2065_s1 + $0x268] sm:$0xff]   ;;  %v1648_v40 = vld [vmem:[%s2065_s1 + $0x278] sm:$0xff]  }
  0x23   :  { %1439 = vmatpush3.bf16.msra.mxu0 %v1585_v39  ;;  %1089 = vmatprep.mubr.bf16.mxu0 %v1273_v7  ;;  %v1647_v39 = vld [vmem:[%s2065_s1 + $0x2b0] sm:$0xff]  }
  0x24   :  { %1050 = vmatmul.mubr.bf16.vlgmr.msra.gmra.mrb[0].mxu1 %v1270_v37  ;;  %1440 = vmatprep.subr.bf16.mxu0 %v1588_v42  ;;  %v1645_v37 = vld [vmem:[%s2065_s1 + $0x230] sm:$0xff]   ;;  %v1650_v42 = vld [vmem:[%s2065_s1 + $0x2f8] sm:$0xff]  }
  0x25   :  { %1461 = vmatpush3.bf16.msra.mxu1 %v1587_v41  ;;  %1129 = vmatprep.mubr.bf16.mxu1 %v1275_v12  ;;  %v1649_v41 = vld [vmem:[%s2065_s1 + $0x238] sm:$0xff]  }
  0x26   :  { %1462 = vmatprep.subr.bf16.mxu1 %v1590_v44 }
  0x27   :  { %1441 = vmatpush3.bf16.msra.mxu0 %v1589_v43  ;;  %v22_v43 = vld [vmem:[%s2066_s0 + $0x20] sm:$0xff] }
  0x28   :  { %1442 = vmatprep.subr.bf16.mxu0 %v1592_v46  ;;  %v1276_v44 = vcombine.low %v22_v43, %v22_v43  ;;  %v1653_v46 = vld [vmem:[%s2065_s1 + $0x2b8] sm:$0xff]  }
  0x29   :  { %1463 = vmatpush3.bf16.msra.mxu1 %v1591_v45  ;;  %v1277_v45 = vcombine.high %v22_v43, %v22_v43 }
  0x2a   :  { %1464 = vmatprep.subr.bf16.mxu1 %v1594_v48  ;;  %v23_v48 = vld [vmem:[%s2066_s0 + $0x28] sm:$0xff] }
  0x2b   :  { %1443 = vmatpush3.bf16.msra.mxu0 %v1593_v47  ;;  %v1654_v47 = vld [vmem:[%s2065_s1 + $0x340] sm:$0xff]  }
  0x2c   :  { %1444 = vmatprep.subr.bf16.mxu0 %v1596_v50  ;;  %v1279_v50 = vcombine.high %v23_v48, %v23_v48 }
  0x2d   :  { %1465 = vmatpush3.bf16.msra.mxu1 %v1595_v49  ;;  %v1278_v49 = vcombine.low %v23_v48, %v23_v48 }
  0x2e   :  { %1466 = vmatprep.subr.bf16.mxu1 %v1598_v52  ;;  %v1658_v52 = vld [vmem:[%s2065_s1 + $0x348] sm:$0xff]  }
  0x2f   :  { %1445 = vmatpush3.bf16.msra.mxu0 %v1597_v51  ;;  %v1657_v51 = vld [vmem:[%s2065_s1 + $0x300] sm:$0xff]  }
  0x30   :  { %1446 = vmatprep.subr.bf16.mxu0 %v1600_v54  ;;  %v1660_v54 = vld [vmem:[%s2065_s1 + $0x350] sm:$0xff]  }
  0x31   :  { %1467 = vmatpush3.bf16.msra.mxu1 %v1599_v53  ;;  %v1659_v53 = vld [vmem:[%s2065_s1 + $0x308] sm:$0xff]  }
  0x32   :  { %1468 = vmatprep.subr.bf16.mxu1 %v1602_v56  ;;  %v1662_v56 = vld [vmem:[%s2065_s1 + $0x358] sm:$0xff]  }
  0x33   :  { %1447 = vmatpush3.bf16.msra.mxu0 %v1601_v55  ;;  %v1661_v55 = vld [vmem:[%s2065_s1 + $0x310] sm:$0xff]  }
  0x34   :  { %1448 = vmatprep.subr.bf16.mxu0 %v1604_v58  ;;  %v1664_v58 = vld [vmem:[%s2065_s1 + $0x360] sm:$0xff]  }
  0x35   :  { %1469 = vmatpush3.bf16.msra.mxu1 %v1603_v57  ;;  %v1663_v57 = vld [vmem:[%s2065_s1 + $0x318] sm:$0xff]  }
  0x36   :  { %1470 = vmatprep.subr.bf16.mxu1 %v1606_v60  ;;  %v1666_v60 = vld [vmem:[%s2065_s1 + $0x368] sm:$0xff]  }
  0x37   :  { %1449 = vmatpush3.bf16.msra.mxu0 %v1605_v59  ;;  %v1665_v59 = vld [vmem:[%s2065_s1 + $0x320] sm:$0xff]  }
  0x38   :  { %1450 = vmatprep.subr.bf16.mxu0 %v1608_v62 }
  0x39   :  { %1471 = vmatpush3.bf16.msra.mxu1 %v1607_v61  ;;  %v24_v61 = vld [vmem:[%s2066_s0 + $0x30] sm:$0xff] }
  0x3a   :  { %1472 = vmatprep.subr.bf16.mxu1 %v1610_v0  ;;  %v1281_v62 = vcombine.high %v24_v61, %v24_v61  ;;  %v1668_v0 = vld [vmem:[%s2065_s1 + $0x370] sm:$0xff]  }
  0x3b   :  { %1451 = vmatpush3.bf16.msra.mxu0 %v1609_v63  ;;  %v1667_v63 = vld [vmem:[%s2065_s1 + $0x328] sm:$0xff]  }
  0x3c   :  { %1452 = vmatprep.subr.bf16.mxu0 %v1612_v2  ;;  %v1670_v2 = vld [vmem:[%s2065_s1 + $0x378] sm:$0xff]  }
  0x3d   :  { %1473 = vmatpush3.bf16.msra.mxu1 %v1611_v1  ;;  %v1669_v1 = vld [vmem:[%s2065_s1 + $0x330] sm:$0xff]  }
  0x3e   :  { %1474 = vmatprep.subr.bf16.mxu1 %v1614_v4  ;;  %v1280_v4 = vcombine.low %v24_v61, %v24_v61 }
  0x3f   :  { %1453 = vmatpush3.bf16.msra.mxu0 %v1613_v3  ;;  %v1671_v3 = vld [vmem:[%s2065_s1 + $0x338] sm:$0xff]  }
  0x40   :  { %1482 = vmatprep.subr.bf16.mxu0 %v1618_v9 }
  0x41   :  { %1475 = vmatpush3.bf16.msra.mxu1 %v1617_v8 }
  0x42   :  { %1090 = vmatmul.mubr.bf16.vlgmr.msra.gmra.mrb[4].mxu0 %v1272_v6  ;;  %1504 = vmatprep.subr.bf16.mxu1 %v1622_v14  ;;  %v1267_v6 = vld [vmem:[%s2067_s2] ss:$0 sm:$0xff] }
  0x43   :  { %1483 = vmatpush3.bf16.msra.mxu0 %v1621_v13  ;;  %1169 = vmatprep.mubr.bf16.mxu0 %v1277_v45 }
  0x44   :  { %1130 = vmatmul.mubr.bf16.vlgmr.msra.gmra.mrb[4].mxu1 %v1274_v11  ;;  %1484 = vmatprep.subr.bf16.mxu0 %v1624_v16 }
  0x45   :  { %1505 = vmatpush3.bf16.msra.mxu1 %v1623_v15  ;;  %1209 = vmatprep.mubr.bf16.mxu1 %v1279_v50 }
  0x46   :  { %1506 = vmatprep.subr.bf16.mxu1 %v1626_v18 }
  0x47   :  { %1485 = vmatpush3.bf16.msra.mxu0 %v1625_v17 }
  0x48   :  { %1486 = vmatprep.subr.bf16.mxu0 %v1628_v20 }
  0x49   :  { %1507 = vmatpush3.bf16.msra.mxu1 %v1627_v19 }
  0x4a   :  { %1508 = vmatprep.subr.bf16.mxu1 %v1630_v22 }
  0x4b   :  { %1487 = vmatpush3.bf16.msra.mxu0 %v1629_v21 }
  0x4c   :  { %1488 = vmatprep.subr.bf16.mxu0 %v1632_v24 }
  0x4d   :  { %1509 = vmatpush3.bf16.msra.mxu1 %v1631_v23 }
  0x4e   :  { %1510 = vmatprep.subr.bf16.mxu1 %v1634_v26 }
  0x4f   :  { %1489 = vmatpush3.bf16.msra.mxu0 %v1633_v25 }
  0x50   :  { %1490 = vmatprep.subr.bf16.mxu0 %v1636_v28 }
  0x51   :  { %1511 = vmatpush3.bf16.msra.mxu1 %v1635_v27 }
  0x52   :  { %1512 = vmatprep.subr.bf16.mxu1 %v1638_v30 }
  0x53   :  { %1491 = vmatpush3.bf16.msra.mxu0 %v1637_v29 }
  0x54   :  { %1492 = vmatprep.subr.bf16.mxu0 %v1640_v32 }
  0x55   :  { %1513 = vmatpush3.bf16.msra.mxu1 %v1639_v31 }
  0x56   :  { %1514 = vmatprep.subr.bf16.mxu1 %v1642_v34 }
  0x57   :  { %1493 = vmatpush3.bf16.msra.mxu0 %v1641_v33 }
  0x58   :  { %1494 = vmatprep.subr.bf16.mxu0 %v1644_v36 }
  0x59   :  { %1515 = vmatpush3.bf16.msra.mxu1 %v1643_v35 }
  0x5a   :  { %1516 = vmatprep.subr.bf16.mxu1 %v1646_v38 }
  0x5b   :  { %1495 = vmatpush3.bf16.msra.mxu0 %v1645_v37 }
  0x5c   :  { %1496 = vmatprep.subr.bf16.mxu0 %v1648_v40 }
  0x5d   :  { %1517 = vmatpush3.bf16.msra.mxu1 %v1647_v39 }
  0x5e   :  { %1518 = vmatprep.subr.bf16.mxu1 %v1650_v42  ;;  %v1257_v42 = vld [vmem:[%s2068_s3] sm:$0xf] }
  0x5f   :  { %1497 = vmatpush3.bf16.msra.mxu0 %v1649_v41 }
  0x60   :  { %1526 = vmatprep.subr.bf16.mxu0 %v1654_v47 }
  0x61   :  { %1519 = vmatpush3.bf16.msra.mxu1 %v1653_v46  ;;  %v1258_v46 = vunpack.c.l.bf16 %v1257_v42 }
  0x62   :  { %1170 = vmatmul.mubr.bf16.vlgmr.msra.gmra.mrb[8].mxu0 %v1276_v44 }
  0x63   :  { %1527 = vmatpush3.bf16.msra.mxu0 %v1657_v51  ;;  %1249 = vmatprep.mubr.bf16.mxu0 %v1281_v62 }
  0x64   :  { %1210 = vmatmul.mubr.bf16.vlgmr.msra.gmra.mrb[8].mxu1 %v1278_v49  ;;  %1528 = vmatprep.subr.bf16.mxu0 %v1658_v52 }
  0x67   :  { %1529 = vmatpush3.bf16.msra.mxu0 %v1659_v53 }
  0x68   :  { %1530 = vmatprep.subr.bf16.mxu0 %v1660_v54 }
  0x6b   :  { %1531 = vmatpush3.bf16.msra.mxu0 %v1661_v55 }
  0x6c   :  { %1532 = vmatprep.subr.bf16.mxu0 %v1662_v56 }
  0x6f   :  { %1533 = vmatpush3.bf16.msra.mxu0 %v1663_v57 }
  0x70   :  { %1534 = vmatprep.subr.bf16.mxu0 %v1664_v58 }
  0x73   :  { %1535 = vmatpush3.bf16.msra.mxu0 %v1665_v59 }
  0x74   :  { %1536 = vmatprep.subr.bf16.mxu0 %v1666_v60 }
  0x77   :  { %1537 = vmatpush3.bf16.msra.mxu0 %v1667_v63 }
  0x78   :  { %1538 = vmatprep.subr.bf16.mxu0 %v1668_v0 }
  0x7b   :  { %1539 = vmatpush3.bf16.msra.mxu0 %v1669_v1 }
  0x7c   :  { %1540 = vmatprep.subr.bf16.mxu0 %v1670_v2 }
  0x7f   :  { %1541 = vmatpush3.bf16.msra.mxu0 %v1671_v3 }
  0x82   :  { %1250 = vmatmul.mubr.bf16.vlgmr.msra.gmra.mrb[12].mxu0 %v1280_v4 }
  0xf5   :  { %v1410_v5 = vpop.f32.mrb[0].mxu0 }
  0xf6   :  { %v1411_v7 = vpop.f32.mrb[1].mxu0 }
  0xf7   :  { %v1412_v8 = vadd.f32 %v1411_v7, %v1410_v5  ;;  %v1413_v9 = vpop.f32.mrb[2].mxu0  ;;  %v1432_v10 = vpop.f32.mrb[0].mxu1 }
  0xf8   :  { %v1414_v11 = vpop.f32.mrb[3].mxu0  ;;  %v1433_v12 = vpop.f32.mrb[1].mxu1 }
  0xf9   :  { %v1012_v13 = vadd.f32 %v1412_v8, %v1267_v6  ;;  %v1434_v14 = vadd.f32 %v1433_v12, %v1432_v10  ;;  %v1435_v15 = vpop.f32.mrb[2].mxu1 }
  0xfa   :  { %v1436_v16 = vpop.f32.mrb[3].mxu1 }
  0xfb   :  { %v1052_v17 = vadd.f32 %v1434_v14, %v1012_v13 }
 0x115   :  { %v1454_v18 = vpop.f32.mrb[4].mxu0 }
 0x116   :  { %v1455_v19 = vpop.f32.mrb[5].mxu0 }
 0x117   :  { %v1456_v20 = vadd.f32 %v1455_v19, %v1454_v18  ;;  %v1457_v21 = vpop.f32.mrb[6].mxu0  ;;  %v1476_v22 = vpop.f32.mrb[4].mxu1 }
 0x118   :  { %v1458_v23 = vpop.f32.mrb[7].mxu0  ;;  %v1477_v25 = vpop.f32.mrb[5].mxu1 }
 0x119   :  { %v1092_v24 = vadd.f32 %v1456_v20, %v1052_v17  ;;  %v1478_v26 = vadd.f32 %v1477_v25, %v1476_v22  ;;  %v1479_v27 = vpop.f32.mrb[6].mxu1 }
 0x11a   :  { %v1480_v28 = vpop.f32.mrb[7].mxu1 }
 0x11b   :  { %v1132_v29 = vadd.f32 %v1478_v26, %v1092_v24 }
 0x135   :  { %v1498_v30 = vpop.f32.mrb[8].mxu0 }
 0x136   :  { %v1499_v31 = vpop.f32.mrb[9].mxu0 }
 0x137   :  { %v1500_v32 = vadd.f32 %v1499_v31, %v1498_v30  ;;  %v1501_v33 = vpop.f32.mrb[10].mxu0  ;;  %v1520_v34 = vpop.f32.mrb[8].mxu1 }
 0x138   :  { %v1502_v35 = vpop.f32.mrb[11].mxu0  ;;  %v1521_v36 = vpop.f32.mrb[9].mxu1 }
 0x139   :  { %v1172_v37 = vadd.f32 %v1500_v32, %v1132_v29  ;;  %v1522_v38 = vadd.f32 %v1521_v36, %v1520_v34  ;;  %v1523_v39 = vpop.f32.mrb[10].mxu1 }
 0x13a   :  { %v1524_v40 = vpop.f32.mrb[11].mxu1 }
 0x13b   :  { %v1212_v41 = vadd.f32 %v1522_v38, %v1172_v37 }
 0x155   :  { %v1542_v43 = vpop.f32.mrb[12].mxu0 }
 0x156   :  { %v1543_v44 = vpop.f32.mrb[13].mxu0 }
 0x157   :  { %v1544_v45 = vadd.f32 %v1543_v44, %v1542_v43  ;;  %v1545_v47 = vpop.f32.mrb[14].mxu0 }
 0x158   :  { %v1546_v48 = vpop.f32.mrb[15].mxu0 }
 0x159   :  { %v1252_v49 = vadd.f32 %v1544_v45, %v1212_v41 }
 0x15b   :  { %v1259_v50 = vadd.f32 %v1258_v46, %v1252_v49 }
 0x15d   :  { %v1260_v51 = vmax.f32 %v1259_v50, 0.0 }
 0x15f   :  { %v1261_v52 = vpack.c.bf16 %v1260_v51, %v1260_v51 }
 0x161   :  { %1262 = vst [vmem:[%s2069_s4] sm:$0xf] %v1261_v52 }

</bundles_post_ra>
